<compile_context>
chip_gen: v7x
topology: tpu7x:2x2x1
jax: 0.10.0
libtpu: 0.0.40
codegen_flags: <defaults>
</compile_context>

<pallas_src>
import functools

import jax
import jax.numpy as jnp
from jax.experimental import pallas as pl
from jax.experimental.pallas import tpu as pltpu


# ----------------------------------------------------------------------------
# Kernel: the full RecBlock (t+1 ConvBlocks) for one batch element / grid step.
# ----------------------------------------------------------------------------
def _recblock_kernel(x_ref, wb_ref, brow_ref, o_ref, a_ref,
                     *, D, HWC, C, t, eps, slope):
    # x_ref   : (1, D+2, HWC)   D-padded input, layout l = h*W*C + w*C + c
    # wb_ref  : (3, HWC, HWC)   banded conv weights (bf16), one slab per kd
    # brow_ref: (1, HWC)        bias replicated into the lane layout
    # o_ref   : (1, D, HWC)     output (lane-dense store)
    # a_ref   : (D+2, HWC) f32  VMEM scratch holding the current padded activation
    xfull = x_ref[0]                         # (D+2, HWC) f32
    a_ref[...] = xfull                       # rows 0 and D+1 are the zero halo
    x_int = xfull[1:1 + D, :]                # (D, HWC) unpadded input rows
    brow = brow_ref[...]                     # (1, HWC)
    inv_cnt = 1.0 / float(D * (HWC // C))    # 1 / (D*H*W)

    def _fold_channels(v):
        # v: (1, HWC).  After folding, lane l holds the sum over all lanes
        # congruent to l mod C, i.e. the per-channel total already broadcast
        # into the lane layout.  The result is independent of the roll sign
        # convention because each fold halves the current period.
        w = HWC // 2
        while w >= C:
            v = v + pltpu.roll(v, shift=w, axis=1)
            w //= 2
        return v

    for it in range(t + 1):
        # ---- Conv3d(3x3x3, pad=1) as 3 fat matmuls (kh/kw folded into wb) ----
        acc = jnp.zeros((D, HWC), jnp.float32)
        for kd in range(3):
            lhs = a_ref[pl.ds(kd, D), :].astype(jnp.bfloat16)      # (D, HWC)
            acc = acc + jnp.dot(lhs, wb_ref[kd],
                                preferred_element_type=jnp.float32)
        acc = acc + brow                                            # conv bias

        # TODO(synk): Dropout3d(p=0.5) is identity in eval mode; training-mode
        # stochastic channel dropout is intentionally not emulated.

        # ---- InstanceNorm3d (no affine): per-channel stats over D*H*W --------
        s1 = jnp.sum(acc, axis=0, keepdims=True)                    # (1, HWC)
        s2 = jnp.sum(acc * acc, axis=0, keepdims=True)              # (1, HWC)
        mean_row = _fold_channels(s1) * inv_cnt                     # (1, HWC)
        ex2_row = _fold_channels(s2) * inv_cnt
        var_row = ex2_row - mean_row * mean_row
        scale_row = jax.lax.rsqrt(var_row + eps)                    # EUP
        y = (acc - mean_row) * scale_row

        # ---- LeakyReLU(0.01) -------------------------------------------------
        z = jnp.where(y >= 0, y, slope * y)

        if it < t:
            # next ConvBlock input = out + x  (interior rows only; halo stays 0)
            a_ref[pl.ds(1, D), :] = z + x_int
        else:
            o_ref[0] = z


# ----------------------------------------------------------------------------
# Wrapper: weight packing + pallas_call (NCDHW public API, like PyTorch).
# ----------------------------------------------------------------------------
def rec_block_forward(x_ncdhw, weight_oidhw, bias, *, t=2, eps=1e-5, slope=0.01):
    N, C, D, H, W = x_ncdhw.shape
    HWC = H * W * C
    f32 = jnp.float32
    # the channel lane-fold needs H*W to be a power of two
    assert (H * W) & (H * W - 1) == 0, "H*W must be a power of two"

    # activations: NCDHW -> (N, D, H*W*C) with l = h*W*C + w*C + c, then a
    # 1-row zero halo on the D axis only (H/W padding is folded into weights).
    x = jnp.transpose(x_ncdhw, (0, 2, 3, 4, 1)).reshape(N, D, HWC).astype(f32)
    x = jnp.pad(x, ((0, 0), (1, 1), (0, 0)))                       # (N, D+2, HWC)

    # Banded weight slabs: wb[kd, hi*W*C + wi*C + ci, h*W*C + w*C + co]
    #   = weight[co, ci, kd, hi-h+1, wi-w+1]   (zero if the offset is outside
    #     the 3x3 window -> implements the H/W zero padding).
    wt = weight_oidhw.astype(f32)                                   # (Co,Ci,3,3,3)
    rng_h = jnp.arange(H)
    rng_w = jnp.arange(W)
    k3 = jnp.arange(3)
    oh_h = (rng_h[None, None, :] ==
            (rng_h[:, None, None] + k3[None, :, None] - 1)).astype(f32)  # (h,kh,hi)
    oh_w = (rng_w[None, None, :] ==
            (rng_w[:, None, None] + k3[None, :, None] - 1)).astype(f32)  # (w,kw,wi)
    wb = jnp.einsum('hap,wbq,oidab->dpqihwo', oh_h, oh_w, wt)
    wb = wb.reshape(3, HWC, HWC).astype(jnp.bfloat16)

    # bias replicated into the lane layout: brow[l] = bias[l % C]
    b_row = jnp.tile(bias.astype(f32), H * W).reshape(1, HWC)

    kernel = functools.partial(_recblock_kernel, D=D, HWC=HWC, C=C, t=t,
                               eps=eps, slope=slope)

    out = pl.pallas_call(
        kernel,
        out_shape=jax.ShapeDtypeStruct((N, D, HWC), f32),
        grid_spec=pltpu.PrefetchScalarGridSpec(
            num_scalar_prefetch=0,
            grid=(N,),
            in_specs=[
                pl.BlockSpec((1, D + 2, HWC), lambda n: (n, 0, 0)),
                pl.BlockSpec((3, HWC, HWC), lambda n: (0, 0, 0)),   # resident
                pl.BlockSpec((1, HWC), lambda n: (0, 0)),           # resident
            ],
            out_specs=pl.BlockSpec((1, D, HWC), lambda n: (n, 0, 0)),
            scratch_shapes=[pltpu.VMEM((D + 2, HWC), f32)],
        ),
        compiler_params=pltpu.CompilerParams(
            dimension_semantics=("parallel",),   # batch axis -> both v7x cores
        ),
    )(x, wb, b_row)

    # (N, D, H*W*C) -> NCDHW
    return out.reshape(N, D, H, W, C).transpose(0, 4, 1, 2, 3)


# ----------------------------------------------------------------------------
# Pure-JAX reference (independent path via lax.conv) for a sanity check.
# ----------------------------------------------------------------------------
def _ref_convblock(x_ncdhw, w, b, eps=1e-5, slope=0.01):
    y = jax.lax.conv_general_dilated(
        x_ncdhw, w, window_strides=(1, 1, 1),
        padding=[(1, 1)] * 3,
        dimension_numbers=("NCDHW", "OIDHW", "NCDHW"),
        precision=jax.lax.Precision.HIGHEST,
    )
    y = y + b[None, :, None, None, None]
    mean = y.mean(axis=(2, 3, 4), keepdims=True)
    var = ((y - mean) ** 2).mean(axis=(2, 3, 4), keepdims=True)
    y = (y - mean) / jnp.sqrt(var + eps)
    return jnp.where(y >= 0, y, slope * y)


def _ref_recblock(x_ncdhw, w, b, t=2):
    out = _ref_convblock(x_ncdhw, w, b)
    for _ in range(t):
        out = _ref_convblock(out + x_ncdhw, w, b)
    return out


if __name__ == "__main__":
    # Small shapes: N=2, C=8 channels, 8^3 spatial (PyTorch NCDHW input).
    N, C, D, H, W = 2, 8, 8, 8, 8
    t = 2

    key = jax.random.PRNGKey(0)
    kx, kw, kb = jax.random.split(key, 3)
    x = jax.random.normal(kx, (N, C, D, H, W), dtype=jnp.float32)
    weight = jax.random.normal(kw, (C, C, 3, 3, 3), dtype=jnp.float32) * 0.1
    bias = jax.random.normal(kb, (C,), dtype=jnp.float32) * 0.1

    out = jax.block_until_ready(rec_block_forward(x, weight, bias, t=t))
    ref = jax.block_until_ready(_ref_recblock(x, weight, bias, t=t))

    assert out.shape == (N, C, D, H, W), out.shape
    err = float(jnp.max(jnp.abs(out - ref)))
    # Kernel uses bf16 MXU operands (f32 accumulate) vs. an f32-HIGHEST
    # reference; outputs are instance-normalized (O(1)), expected diff ~1e-2.
    assert err < 5e-2, err
    print("KERNEL_OK")
</pallas_src>

<mosaic_0001>
module attributes {stable_mosaic.version = 11 : i64} {
  func.func @_recblock_kernel(%arg0: i32, %arg1: memref<1x10x512xf32, #tpu.memory_space<vmem>>, %arg2: memref<3x512x512xbf16, #tpu.memory_space<vmem>>, %arg3: memref<1x512xf32, #tpu.memory_space<vmem>>, %arg4: memref<1x8x512xf32, #tpu.memory_space<vmem>>, %arg5: memref<10x512xf32, #tpu.memory_space<vmem>>) attributes {dimension_semantics = [#tpu.dimension_semantics<parallel>], iteration_bounds = array<i64: 2>, scalar_prefetch = 0 : i64, scratch_operands = 1 : i64, tpu.core_type = #tpu.core_type<tc>, window_params = [{transform_indices = @transform_0, window_bounds = array<i64: 1, 10, 512>}, {pipeline_mode = #tpu.pipeline_mode<synchronous>, transform_indices = @transform_1, window_bounds = array<i64: 3, 512, 512>}, {pipeline_mode = #tpu.pipeline_mode<synchronous>, transform_indices = @transform_2, window_bounds = array<i64: 1, 512>}, {transform_indices = @transform_3, window_bounds = array<i64: 1, 8, 512>}]} {
    %c0 = arith.constant 0 : index
    %c0_0 = arith.constant 0 : index
    %c0_1 = arith.constant 0 : index
    %0 = vector.load %arg1[%c0, %c0_0, %c0_1] : memref<1x10x512xf32, #tpu.memory_space<vmem>>, vector<1x10x512xf32>
    %1 = vector.shape_cast %0 : vector<1x10x512xf32> to vector<10x512xf32>
    %c0_2 = arith.constant 0 : index
    %c0_3 = arith.constant 0 : index
    %2 = vector.load %arg5[%c0_2, %c0_3] : memref<10x512xf32, #tpu.memory_space<vmem>>, vector<10x512xf32>
    tpu.vector_store %arg5[%c0_2, %c0_3], %1 {strides = array<i32>} : memref<10x512xf32, #tpu.memory_space<vmem>>, vector<10x512xf32>,
    %3 = vector.extract_strided_slice %1 {offsets = [1, 0], sizes = [8, 512], strides = [1, 1]} : vector<10x512xf32> to vector<8x512xf32>
    %c0_4 = arith.constant 0 : index
    %c0_5 = arith.constant 0 : index
    %4 = vector.load %arg3[%c0_4, %c0_5] : memref<1x512xf32, #tpu.memory_space<vmem>>, vector<1x512xf32>
    %cst = arith.constant 0.000000e+00 : f32
    %5 = vector.broadcast %cst : f32 to vector<8x512xf32>
    %c0_6 = arith.constant 0 : index
    %c0_7 = arith.constant 0 : index
    %6 = vector.load %arg5[%c0_6, %c0_7] : memref<10x512xf32, #tpu.memory_space<vmem>>, vector<8x512xf32>
    %7 = arith.truncf %6 : vector<8x512xf32> to vector<8x512xbf16>
    %c0_8 = arith.constant 0 : index
    %c0_9 = arith.constant 0 : index
    %c0_10 = arith.constant 0 : index
    %8 = vector.load %arg2[%c0_8, %c0_9, %c0_10] : memref<3x512x512xbf16, #tpu.memory_space<vmem>>, vector<1x512x512xbf16>
    %9 = vector.shape_cast %8 : vector<1x512x512xbf16> to vector<512x512xbf16>
    %cst_11 = arith.constant dense<0.000000e+00> : vector<8x512xf32>
    %10 = tpu.matmul %7, %9, %cst_11 {dimension_numbers = #tpu.dot_dimension_numbers<[1], [0], [0], [1], [0, 0, 1, 1], [], []>} : vector<8x512xbf16>, vector<512x512xbf16>, vector<8x512xf32> -> vector<8x512xf32>
    %11 = arith.addf %5, %10 : vector<8x512xf32>
    %c1 = arith.constant 1 : index
    %c0_12 = arith.constant 0 : index
    %12 = vector.load %arg5[%c1, %c0_12] : memref<10x512xf32, #tpu.memory_space<vmem>>, vector<8x512xf32>
    %13 = arith.truncf %12 : vector<8x512xf32> to vector<8x512xbf16>
    %c1_13 = arith.constant 1 : index
    %c0_14 = arith.constant 0 : index
    %c0_15 = arith.constant 0 : index
    %14 = vector.load %arg2[%c1_13, %c0_14, %c0_15] : memref<3x512x512xbf16, #tpu.memory_space<vmem>>, vector<1x512x512xbf16>
    %15 = vector.shape_cast %14 : vector<1x512x512xbf16> to vector<512x512xbf16>
    %cst_16 = arith.constant dense<0.000000e+00> : vector<8x512xf32>
    %16 = tpu.matmul %13, %15, %cst_16 {dimension_numbers = #tpu.dot_dimension_numbers<[1], [0], [0], [1], [0, 0, 1, 1], [], []>} : vector<8x512xbf16>, vector<512x512xbf16>, vector<8x512xf32> -> vector<8x512xf32>
    %17 = arith.addf %11, %16 : vector<8x512xf32>
    %c2 = arith.constant 2 : index
    %c0_17 = arith.constant 0 : index
    %18 = vector.load %arg5[%c2, %c0_17] : memref<10x512xf32, #tpu.memory_space<vmem>>, vector<8x512xf32>
    %19 = arith.truncf %18 : vector<8x512xf32> to vector<8x512xbf16>
    %c2_18 = arith.constant 2 : index
    %c0_19 = arith.constant 0 : index
    %c0_20 = arith.constant 0 : index
    %20 = vector.load %arg2[%c2_18, %c0_19, %c0_20] : memref<3x512x512xbf16, #tpu.memory_space<vmem>>, vector<1x512x512xbf16>
    %21 = vector.shape_cast %20 : vector<1x512x512xbf16> to vector<512x512xbf16>
    %cst_21 = arith.constant dense<0.000000e+00> : vector<8x512xf32>
    %22 = tpu.matmul %19, %21, %cst_21 {dimension_numbers = #tpu.dot_dimension_numbers<[1], [0], [0], [1], [0, 0, 1, 1], [], []>} : vector<8x512xbf16>, vector<512x512xbf16>, vector<8x512xf32> -> vector<8x512xf32>
    %23 = arith.addf %17, %22 : vector<8x512xf32>
    %24 = vector.broadcast %4 : vector<1x512xf32> to vector<8x512xf32>
    %25 = arith.addf %23, %24 : vector<8x512xf32>
    %cst_22 = arith.constant dense<0.000000e+00> : vector<512xf32>
    %26 = vector.multi_reduction <add>, %25, %cst_22 [0] : vector<8x512xf32> to vector<512xf32>
    %27 = vector.shape_cast %26 : vector<512xf32> to vector<1x512xf32>
    %28 = arith.mulf %25, %25 : vector<8x512xf32>
    %cst_23 = arith.constant dense<0.000000e+00> : vector<512xf32>
    %29 = vector.multi_reduction <add>, %28, %cst_23 [0] : vector<8x512xf32> to vector<512xf32>
    %30 = vector.shape_cast %29 : vector<512xf32> to vector<1x512xf32>
    %c256_i32 = arith.constant 256 : i32
    %31 = tpu.dynamic_rotate %27 by %c256_i32 dim 1 : vector<1x512xf32>, i32 -> vector<1x512xf32>
    %32 = arith.addf %27, %31 : vector<1x512xf32>
    %c128_i32 = arith.constant 128 : i32
    %33 = tpu.dynamic_rotate %32 by %c128_i32 dim 1 : vector<1x512xf32>, i32 -> vector<1x512xf32>
    %34 = arith.addf %32, %33 : vector<1x512xf32>
    %c64_i32 = arith.constant 64 : i32
    %35 = tpu.dynamic_rotate %34 by %c64_i32 dim 1 : vector<1x512xf32>, i32 -> vector<1x512xf32>
    %36 = arith.addf %34, %35 : vector<1x512xf32>
    %c32_i32 = arith.constant 32 : i32
    %37 = tpu.dynamic_rotate %36 by %c32_i32 dim 1 : vector<1x512xf32>, i32 -> vector<1x512xf32>
    %38 = arith.addf %36, %37 : vector<1x512xf32>
    %c16_i32 = arith.constant 16 : i32
    %39 = tpu.dynamic_rotate %38 by %c16_i32 dim 1 : vector<1x512xf32>, i32 -> vector<1x512xf32>
    %40 = arith.addf %38, %39 : vector<1x512xf32>
    %c8_i32 = arith.constant 8 : i32
    %41 = tpu.dynamic_rotate %40 by %c8_i32 dim 1 : vector<1x512xf32>, i32 -> vector<1x512xf32>
    %42 = arith.addf %40, %41 : vector<1x512xf32>
    %cst_24 = arith.constant 0.001953125 : f32
    %43 = vector.broadcast %cst_24 : f32 to vector<1x512xf32>
    %44 = arith.mulf %42, %43 : vector<1x512xf32>
    %c256_i32_25 = arith.constant 256 : i32
    %45 = tpu.dynamic_rotate %30 by %c256_i32_25 dim 1 : vector<1x512xf32>, i32 -> vector<1x512xf32>
    %46 = arith.addf %30, %45 : vector<1x512xf32>
    %c128_i32_26 = arith.constant 128 : i32
    %47 = tpu.dynamic_rotate %46 by %c128_i32_26 dim 1 : vector<1x512xf32>, i32 -> vector<1x512xf32>
    %48 = arith.addf %46, %47 : vector<1x512xf32>
    %c64_i32_27 = arith.constant 64 : i32
    %49 = tpu.dynamic_rotate %48 by %c64_i32_27 dim 1 : vector<1x512xf32>, i32 -> vector<1x512xf32>
    %50 = arith.addf %48, %49 : vector<1x512xf32>
    %c32_i32_28 = arith.constant 32 : i32
    %51 = tpu.dynamic_rotate %50 by %c32_i32_28 dim 1 : vector<1x512xf32>, i32 -> vector<1x512xf32>
    %52 = arith.addf %50, %51 : vector<1x512xf32>
    %c16_i32_29 = arith.constant 16 : i32
    %53 = tpu.dynamic_rotate %52 by %c16_i32_29 dim 1 : vector<1x512xf32>, i32 -> vector<1x512xf32>
    %54 = arith.addf %52, %53 : vector<1x512xf32>
    %c8_i32_30 = arith.constant 8 : i32
    %55 = tpu.dynamic_rotate %54 by %c8_i32_30 dim 1 : vector<1x512xf32>, i32 -> vector<1x512xf32>
    %56 = arith.addf %54, %55 : vector<1x512xf32>
    %cst_31 = arith.constant 0.001953125 : f32
    %57 = vector.broadcast %cst_31 : f32 to vector<1x512xf32>
    %58 = arith.mulf %56, %57 : vector<1x512xf32>
    %59 = arith.mulf %44, %44 : vector<1x512xf32>
    %60 = arith.subf %58, %59 : vector<1x512xf32>
    %cst_32 = arith.constant 9.99999974E-6 : f32
    %61 = vector.broadcast %cst_32 : f32 to vector<1x512xf32>
    %62 = arith.addf %60, %61 : vector<1x512xf32>
    %63 = math.rsqrt %62 : vector<1x512xf32>
    %64 = vector.broadcast %44 : vector<1x512xf32> to vector<8x512xf32>
    %65 = arith.subf %25, %64 : vector<8x512xf32>
    %66 = vector.broadcast %63 : vector<1x512xf32> to vector<8x512xf32>
    %67 = arith.mulf %65, %66 : vector<8x512xf32>
    %cst_33 = arith.constant 0.000000e+00 : f32
    %68 = vector.broadcast %cst_33 : f32 to vector<8x512xf32>
    %69 = arith.cmpf oge, %67, %68 : vector<8x512xf32>
    %cst_34 = arith.constant 0.00999999977 : f32
    %70 = vector.broadcast %cst_34 : f32 to vector<8x512xf32>
    %71 = arith.mulf %70, %67 : vector<8x512xf32>
    %72 = arith.select %69, %67, %71 : vector<8x512xi1>, vector<8x512xf32>
    %73 = arith.addf %72, %3 : vector<8x512xf32>
    %c1_35 = arith.constant 1 : index
    %c0_36 = arith.constant 0 : index
    %74 = vector.load %arg5[%c1_35, %c0_36] : memref<10x512xf32, #tpu.memory_space<vmem>>, vector<8x512xf32>
    tpu.vector_store %arg5[%c1_35, %c0_36], %73 {strides = array<i32>} : memref<10x512xf32, #tpu.memory_space<vmem>>, vector<8x512xf32>,
    %cst_37 = arith.constant 0.000000e+00 : f32
    %75 = vector.broadcast %cst_37 : f32 to vector<8x512xf32>
    %c0_38 = arith.constant 0 : index
    %c0_39 = arith.constant 0 : index
    %76 = vector.load %arg5[%c0_38, %c0_39] : memref<10x512xf32, #tpu.memory_space<vmem>>, vector<8x512xf32>
    %77 = arith.truncf %76 : vector<8x512xf32> to vector<8x512xbf16>
    %c0_40 = arith.constant 0 : index
    %c0_41 = arith.constant 0 : index
    %c0_42 = arith.constant 0 : index
    %78 = vector.load %arg2[%c0_40, %c0_41, %c0_42] : memref<3x512x512xbf16, #tpu.memory_space<vmem>>, vector<1x512x512xbf16>
    %79 = vector.shape_cast %78 : vector<1x512x512xbf16> to vector<512x512xbf16>
    %cst_43 = arith.constant dense<0.000000e+00> : vector<8x512xf32>
    %80 = tpu.matmul %77, %79, %cst_43 {dimension_numbers = #tpu.dot_dimension_numbers<[1], [0], [0], [1], [0, 0, 1, 1], [], []>} : vector<8x512xbf16>, vector<512x512xbf16>, vector<8x512xf32> -> vector<8x512xf32>
    %81 = arith.addf %75, %80 : vector<8x512xf32>
    %c1_44 = arith.constant 1 : index
    %c0_45 = arith.constant 0 : index
    %82 = vector.load %arg5[%c1_44, %c0_45] : memref<10x512xf32, #tpu.memory_space<vmem>>, vector<8x512xf32>
    %83 = arith.truncf %82 : vector<8x512xf32> to vector<8x512xbf16>
    %c1_46 = arith.constant 1 : index
    %c0_47 = arith.constant 0 : index
    %c0_48 = arith.constant 0 : index
    %84 = vector.load %arg2[%c1_46, %c0_47, %c0_48] : memref<3x512x512xbf16, #tpu.memory_space<vmem>>, vector<1x512x512xbf16>
    %85 = vector.shape_cast %84 : vector<1x512x512xbf16> to vector<512x512xbf16>
    %cst_49 = arith.constant dense<0.000000e+00> : vector<8x512xf32>
    %86 = tpu.matmul %83, %85, %cst_49 {dimension_numbers = #tpu.dot_dimension_numbers<[1], [0], [0], [1], [0, 0, 1, 1], [], []>} : vector<8x512xbf16>, vector<512x512xbf16>, vector<8x512xf32> -> vector<8x512xf32>
    %87 = arith.addf %81, %86 : vector<8x512xf32>
    %c2_50 = arith.constant 2 : index
    %c0_51 = arith.constant 0 : index
    %88 = vector.load %arg5[%c2_50, %c0_51] : memref<10x512xf32, #tpu.memory_space<vmem>>, vector<8x512xf32>
    %89 = arith.truncf %88 : vector<8x512xf32> to vector<8x512xbf16>
    %c2_52 = arith.constant 2 : index
    %c0_53 = arith.constant 0 : index
    %c0_54 = arith.constant 0 : index
    %90 = vector.load %arg2[%c2_52, %c0_53, %c0_54] : memref<3x512x512xbf16, #tpu.memory_space<vmem>>, vector<1x512x512xbf16>
    %91 = vector.shape_cast %90 : vector<1x512x512xbf16> to vector<512x512xbf16>
    %cst_55 = arith.constant dense<0.000000e+00> : vector<8x512xf32>
    %92 = tpu.matmul %89, %91, %cst_55 {dimension_numbers = #tpu.dot_dimension_numbers<[1], [0], [0], [1], [0, 0, 1, 1], [], []>} : vector<8x512xbf16>, vector<512x512xbf16>, vector<8x512xf32> -> vector<8x512xf32>
    %93 = arith.addf %87, %92 : vector<8x512xf32>
    %94 = vector.broadcast %4 : vector<1x512xf32> to vector<8x512xf32>
    %95 = arith.addf %93, %94 : vector<8x512xf32>
    %cst_56 = arith.constant dense<0.000000e+00> : vector<512xf32>
    %96 = vector.multi_reduction <add>, %95, %cst_56 [0] : vector<8x512xf32> to vector<512xf32>
    %97 = vector.shape_cast %96 : vector<512xf32> to vector<1x512xf32>
    %98 = arith.mulf %95, %95 : vector<8x512xf32>
    %cst_57 = arith.constant dense<0.000000e+00> : vector<512xf32>
    %99 = vector.multi_reduction <add>, %98, %cst_57 [0] : vector<8x512xf32> to vector<512xf32>
    %100 = vector.shape_cast %99 : vector<512xf32> to vector<1x512xf32>
    %c256_i32_58 = arith.constant 256 : i32
    %101 = tpu.dynamic_rotate %97 by %c256_i32_58 dim 1 : vector<1x512xf32>, i32 -> vector<1x512xf32>
    %102 = arith.addf %97, %101 : vector<1x512xf32>
    %c128_i32_59 = arith.constant 128 : i32
    %103 = tpu.dynamic_rotate %102 by %c128_i32_59 dim 1 : vector<1x512xf32>, i32 -> vector<1x512xf32>
    %104 = arith.addf %102, %103 : vector<1x512xf32>
    %c64_i32_60 = arith.constant 64 : i32
    %105 = tpu.dynamic_rotate %104 by %c64_i32_60 dim 1 : vector<1x512xf32>, i32 -> vector<1x512xf32>
    %106 = arith.addf %104, %105 : vector<1x512xf32>
    %c32_i32_61 = arith.constant 32 : i32
    %107 = tpu.dynamic_rotate %106 by %c32_i32_61 dim 1 : vector<1x512xf32>, i32 -> vector<1x512xf32>
    %108 = arith.addf %106, %107 : vector<1x512xf32>
    %c16_i32_62 = arith.constant 16 : i32
    %109 = tpu.dynamic_rotate %108 by %c16_i32_62 dim 1 : vector<1x512xf32>, i32 -> vector<1x512xf32>
    %110 = arith.addf %108, %109 : vector<1x512xf32>
    %c8_i32_63 = arith.constant 8 : i32
    %111 = tpu.dynamic_rotate %110 by %c8_i32_63 dim 1 : vector<1x512xf32>, i32 -> vector<1x512xf32>
    %112 = arith.addf %110, %111 : vector<1x512xf32>
    %cst_64 = arith.constant 0.001953125 : f32
    %113 = vector.broadcast %cst_64 : f32 to vector<1x512xf32>
    %114 = arith.mulf %112, %113 : vector<1x512xf32>
    %c256_i32_65 = arith.constant 256 : i32
    %115 = tpu.dynamic_rotate %100 by %c256_i32_65 dim 1 : vector<1x512xf32>, i32 -> vector<1x512xf32>
    %116 = arith.addf %100, %115 : vector<1x512xf32>
    %c128_i32_66 = arith.constant 128 : i32
    %117 = tpu.dynamic_rotate %116 by %c128_i32_66 dim 1 : vector<1x512xf32>, i32 -> vector<1x512xf32>
    %118 = arith.addf %116, %117 : vector<1x512xf32>
    %c64_i32_67 = arith.constant 64 : i32
    %119 = tpu.dynamic_rotate %118 by %c64_i32_67 dim 1 : vector<1x512xf32>, i32 -> vector<1x512xf32>
    %120 = arith.addf %118, %119 : vector<1x512xf32>
    %c32_i32_68 = arith.constant 32 : i32
    %121 = tpu.dynamic_rotate %120 by %c32_i32_68 dim 1 : vector<1x512xf32>, i32 -> vector<1x512xf32>
    %122 = arith.addf %120, %121 : vector<1x512xf32>
    %c16_i32_69 = arith.constant 16 : i32
    %123 = tpu.dynamic_rotate %122 by %c16_i32_69 dim 1 : vector<1x512xf32>, i32 -> vector<1x512xf32>
    %124 = arith.addf %122, %123 : vector<1x512xf32>
    %c8_i32_70 = arith.constant 8 : i32
    %125 = tpu.dynamic_rotate %124 by %c8_i32_70 dim 1 : vector<1x512xf32>, i32 -> vector<1x512xf32>
    %126 = arith.addf %124, %125 : vector<1x512xf32>
    %cst_71 = arith.constant 0.001953125 : f32
    %127 = vector.broadcast %cst_71 : f32 to vector<1x512xf32>
    %128 = arith.mulf %126, %127 : vector<1x512xf32>
    %129 = arith.mulf %114, %114 : vector<1x512xf32>
    %130 = arith.subf %128, %129 : vector<1x512xf32>
    %cst_72 = arith.constant 9.99999974E-6 : f32
    %131 = vector.broadcast %cst_72 : f32 to vector<1x512xf32>
    %132 = arith.addf %130, %131 : vector<1x512xf32>
    %133 = math.rsqrt %132 : vector<1x512xf32>
    %134 = vector.broadcast %114 : vector<1x512xf32> to vector<8x512xf32>
    %135 = arith.subf %95, %134 : vector<8x512xf32>
    %136 = vector.broadcast %133 : vector<1x512xf32> to vector<8x512xf32>
    %137 = arith.mulf %135, %136 : vector<8x512xf32>
    %cst_73 = arith.constant 0.000000e+00 : f32
    %138 = vector.broadcast %cst_73 : f32 to vector<8x512xf32>
    %139 = arith.cmpf oge, %137, %138 : vector<8x512xf32>
    %cst_74 = arith.constant 0.00999999977 : f32
    %140 = vector.broadcast %cst_74 : f32 to vector<8x512xf32>
    %141 = arith.mulf %140, %137 : vector<8x512xf32>
    %142 = arith.select %139, %137, %141 : vector<8x512xi1>, vector<8x512xf32>
    %143 = arith.addf %142, %3 : vector<8x512xf32>
    %c1_75 = arith.constant 1 : index
    %c0_76 = arith.constant 0 : index
    %144 = vector.load %arg5[%c1_75, %c0_76] : memref<10x512xf32, #tpu.memory_space<vmem>>, vector<8x512xf32>
    tpu.vector_store %arg5[%c1_75, %c0_76], %143 {strides = array<i32>} : memref<10x512xf32, #tpu.memory_space<vmem>>, vector<8x512xf32>,
    %cst_77 = arith.constant 0.000000e+00 : f32
    %145 = vector.broadcast %cst_77 : f32 to vector<8x512xf32>
    %c0_78 = arith.constant 0 : index
    %c0_79 = arith.constant 0 : index
    %146 = vector.load %arg5[%c0_78, %c0_79] : memref<10x512xf32, #tpu.memory_space<vmem>>, vector<8x512xf32>
    %147 = arith.truncf %146 : vector<8x512xf32> to vector<8x512xbf16>
    %c0_80 = arith.constant 0 : index
    %c0_81 = arith.constant 0 : index
    %c0_82 = arith.constant 0 : index
    %148 = vector.load %arg2[%c0_80, %c0_81, %c0_82] : memref<3x512x512xbf16, #tpu.memory_space<vmem>>, vector<1x512x512xbf16>
    %149 = vector.shape_cast %148 : vector<1x512x512xbf16> to vector<512x512xbf16>
    %cst_83 = arith.constant dense<0.000000e+00> : vector<8x512xf32>
    %150 = tpu.matmul %147, %149, %cst_83 {dimension_numbers = #tpu.dot_dimension_numbers<[1], [0], [0], [1], [0, 0, 1, 1], [], []>} : vector<8x512xbf16>, vector<512x512xbf16>, vector<8x512xf32> -> vector<8x512xf32>
    %151 = arith.addf %145, %150 : vector<8x512xf32>
    %c1_84 = arith.constant 1 : index
    %c0_85 = arith.constant 0 : index
    %152 = vector.load %arg5[%c1_84, %c0_85] : memref<10x512xf32, #tpu.memory_space<vmem>>, vector<8x512xf32>
    %153 = arith.truncf %152 : vector<8x512xf32> to vector<8x512xbf16>
    %c1_86 = arith.constant 1 : index
    %c0_87 = arith.constant 0 : index
    %c0_88 = arith.constant 0 : index
    %154 = vector.load %arg2[%c1_86, %c0_87, %c0_88] : memref<3x512x512xbf16, #tpu.memory_space<vmem>>, vector<1x512x512xbf16>
    %155 = vector.shape_cast %154 : vector<1x512x512xbf16> to vector<512x512xbf16>
    %cst_89 = arith.constant dense<0.000000e+00> : vector<8x512xf32>
    %156 = tpu.matmul %153, %155, %cst_89 {dimension_numbers = #tpu.dot_dimension_numbers<[1], [0], [0], [1], [0, 0, 1, 1], [], []>} : vector<8x512xbf16>, vector<512x512xbf16>, vector<8x512xf32> -> vector<8x512xf32>
    %157 = arith.addf %151, %156 : vector<8x512xf32>
    %c2_90 = arith.constant 2 : index
    %c0_91 = arith.constant 0 : index
    %158 = vector.load %arg5[%c2_90, %c0_91] : memref<10x512xf32, #tpu.memory_space<vmem>>, vector<8x512xf32>
    %159 = arith.truncf %158 : vector<8x512xf32> to vector<8x512xbf16>
    %c2_92 = arith.constant 2 : index
    %c0_93 = arith.constant 0 : index
    %c0_94 = arith.constant 0 : index
    %160 = vector.load %arg2[%c2_92, %c0_93, %c0_94] : memref<3x512x512xbf16, #tpu.memory_space<vmem>>, vector<1x512x512xbf16>
    %161 = vector.shape_cast %160 : vector<1x512x512xbf16> to vector<512x512xbf16>
    %cst_95 = arith.constant dense<0.000000e+00> : vector<8x512xf32>
    %162 = tpu.matmul %159, %161, %cst_95 {dimension_numbers = #tpu.dot_dimension_numbers<[1], [0], [0], [1], [0, 0, 1, 1], [], []>} : vector<8x512xbf16>, vector<512x512xbf16>, vector<8x512xf32> -> vector<8x512xf32>
    %163 = arith.addf %157, %162 : vector<8x512xf32>
    %164 = vector.broadcast %4 : vector<1x512xf32> to vector<8x512xf32>
    %165 = arith.addf %163, %164 : vector<8x512xf32>
    %cst_96 = arith.constant dense<0.000000e+00> : vector<512xf32>
    %166 = vector.multi_reduction <add>, %165, %cst_96 [0] : vector<8x512xf32> to vector<512xf32>
    %167 = vector.shape_cast %166 : vector<512xf32> to vector<1x512xf32>
    %168 = arith.mulf %165, %165 : vector<8x512xf32>
    %cst_97 = arith.constant dense<0.000000e+00> : vector<512xf32>
    %169 = vector.multi_reduction <add>, %168, %cst_97 [0] : vector<8x512xf32> to vector<512xf32>
    %170 = vector.shape_cast %169 : vector<512xf32> to vector<1x512xf32>
    %c256_i32_98 = arith.constant 256 : i32
    %171 = tpu.dynamic_rotate %167 by %c256_i32_98 dim 1 : vector<1x512xf32>, i32 -> vector<1x512xf32>
    %172 = arith.addf %167, %171 : vector<1x512xf32>
    %c128_i32_99 = arith.constant 128 : i32
    %173 = tpu.dynamic_rotate %172 by %c128_i32_99 dim 1 : vector<1x512xf32>, i32 -> vector<1x512xf32>
    %174 = arith.addf %172, %173 : vector<1x512xf32>
    %c64_i32_100 = arith.constant 64 : i32
    %175 = tpu.dynamic_rotate %174 by %c64_i32_100 dim 1 : vector<1x512xf32>, i32 -> vector<1x512xf32>
    %176 = arith.addf %174, %175 : vector<1x512xf32>
    %c32_i32_101 = arith.constant 32 : i32
    %177 = tpu.dynamic_rotate %176 by %c32_i32_101 dim 1 : vector<1x512xf32>, i32 -> vector<1x512xf32>
    %178 = arith.addf %176, %177 : vector<1x512xf32>
    %c16_i32_102 = arith.constant 16 : i32
    %179 = tpu.dynamic_rotate %178 by %c16_i32_102 dim 1 : vector<1x512xf32>, i32 -> vector<1x512xf32>
    %180 = arith.addf %178, %179 : vector<1x512xf32>
    %c8_i32_103 = arith.constant 8 : i32
    %181 = tpu.dynamic_rotate %180 by %c8_i32_103 dim 1 : vector<1x512xf32>, i32 -> vector<1x512xf32>
    %182 = arith.addf %180, %181 : vector<1x512xf32>
    %cst_104 = arith.constant 0.001953125 : f32
    %183 = vector.broadcast %cst_104 : f32 to vector<1x512xf32>
    %184 = arith.mulf %182, %183 : vector<1x512xf32>
    %c256_i32_105 = arith.constant 256 : i32
    %185 = tpu.dynamic_rotate %170 by %c256_i32_105 dim 1 : vector<1x512xf32>, i32 -> vector<1x512xf32>
    %186 = arith.addf %170, %185 : vector<1x512xf32>
    %c128_i32_106 = arith.constant 128 : i32
    %187 = tpu.dynamic_rotate %186 by %c128_i32_106 dim 1 : vector<1x512xf32>, i32 -> vector<1x512xf32>
    %188 = arith.addf %186, %187 : vector<1x512xf32>
    %c64_i32_107 = arith.constant 64 : i32
    %189 = tpu.dynamic_rotate %188 by %c64_i32_107 dim 1 : vector<1x512xf32>, i32 -> vector<1x512xf32>
    %190 = arith.addf %188, %189 : vector<1x512xf32>
    %c32_i32_108 = arith.constant 32 : i32
    %191 = tpu.dynamic_rotate %190 by %c32_i32_108 dim 1 : vector<1x512xf32>, i32 -> vector<1x512xf32>
    %192 = arith.addf %190, %191 : vector<1x512xf32>
    %c16_i32_109 = arith.constant 16 : i32
    %193 = tpu.dynamic_rotate %192 by %c16_i32_109 dim 1 : vector<1x512xf32>, i32 -> vector<1x512xf32>
    %194 = arith.addf %192, %193 : vector<1x512xf32>
    %c8_i32_110 = arith.constant 8 : i32
    %195 = tpu.dynamic_rotate %194 by %c8_i32_110 dim 1 : vector<1x512xf32>, i32 -> vector<1x512xf32>
    %196 = arith.addf %194, %195 : vector<1x512xf32>
    %cst_111 = arith.constant 0.001953125 : f32
    %197 = vector.broadcast %cst_111 : f32 to vector<1x512xf32>
    %198 = arith.mulf %196, %197 : vector<1x512xf32>
    %199 = arith.mulf %184, %184 : vector<1x512xf32>
    %200 = arith.subf %198, %199 : vector<1x512xf32>
    %cst_112 = arith.constant 9.99999974E-6 : f32
    %201 = vector.broadcast %cst_112 : f32 to vector<1x512xf32>
    %202 = arith.addf %200, %201 : vector<1x512xf32>
    %203 = math.rsqrt %202 : vector<1x512xf32>
    %204 = vector.broadcast %184 : vector<1x512xf32> to vector<8x512xf32>
    %205 = arith.subf %165, %204 : vector<8x512xf32>
    %206 = vector.broadcast %203 : vector<1x512xf32> to vector<8x512xf32>
    %207 = arith.mulf %205, %206 : vector<8x512xf32>
    %cst_113 = arith.constant 0.000000e+00 : f32
    %208 = vector.broadcast %cst_113 : f32 to vector<8x512xf32>
    %209 = arith.cmpf oge, %207, %208 : vector<8x512xf32>
    %cst_114 = arith.constant 0.00999999977 : f32
    %210 = vector.broadcast %cst_114 : f32 to vector<8x512xf32>
    %211 = arith.mulf %210, %207 : vector<8x512xf32>
    %212 = arith.select %209, %207, %211 : vector<8x512xi1>, vector<8x512xf32>
    %c0_115 = arith.constant 0 : index
    %c0_116 = arith.constant 0 : index
    %c0_117 = arith.constant 0 : index
    %213 = vector.load %arg4[%c0_115, %c0_116, %c0_117] : memref<1x8x512xf32, #tpu.memory_space<vmem>>, vector<1x8x512xf32>
    %214 = vector.shape_cast %213 : vector<1x8x512xf32> to vector<8x512xf32>
    %215 = vector.shape_cast %212 : vector<8x512xf32> to vector<1x8x512xf32>
    tpu.vector_store %arg4[%c0_115, %c0_116, %c0_117], %215 {strides = array<i32>} : memref<1x8x512xf32, #tpu.memory_space<vmem>>, vector<1x8x512xf32>,
    return
  }
  func.func @transform_0(%arg0: i32) -> (i32, i32, i32) {
    %c0_i32 = arith.constant 0 : i32
    %c0_i32_0 = arith.constant 0 : i32
    %c0_i32_1 = arith.constant 0 : i32
    return %arg0, %c0_i32, %c0_i32_0 : i32, i32, i32
  }
  func.func @transform_1(%arg0: i32) -> (i32, i32, i32) {
    %c0_i32 = arith.constant 0 : i32
    %c0_i32_0 = arith.constant 0 : i32
    %c0_i32_1 = arith.constant 0 : i32
    %c0_i32_2 = arith.constant 0 : i32
    return %c0_i32, %c0_i32_0, %c0_i32_1 : i32, i32, i32
  }
  func.func @transform_2(%arg0: i32) -> (i32, i32) {
    %c0_i32 = arith.constant 0 : i32
    %c0_i32_0 = arith.constant 0 : i32
    %c0_i32_1 = arith.constant 0 : i32
    return %c0_i32, %c0_i32_0 : i32, i32
  }
  func.func @transform_3(%arg0: i32) -> (i32, i32, i32) {
    %c0_i32 = arith.constant 0 : i32
    %c0_i32_0 = arith.constant 0 : i32
    %c0_i32_1 = arith.constant 0 : i32
    return %arg0, %c0_i32, %c0_i32_0 : i32, i32, i32
  }
}

</mosaic_0001>

<bundles_post_ra>
// kernel: tpu_custom_call.1
= control target key start
LH: loop header
LB: loop body
LE: loop exit
PB: predicated region body
PF: predicated region fallthrough
CT: control target
= control target key end

     0   :  { %8 = vsyncpa [#allocation4], 0  ;;  %s13064_s0 = inlined_call_operand.vmem [shape: f32[2,10,512], index: 0, kind: input, shape index: {}]   ;;  %s13065_s1 = inlined_call_operand.hbm [shape: bf16[3,512,512], index: 1, kind: input, shape index: {}]   ;;  %s13066_s2 = inlined_call_operand.hbm [shape: f32[1,512], index: 2, kind: input, shape index: {}]   ;;  %s13067_s3 = inlined_call_operand.hbm [shape: f32[2,8,512], index: 3, kind: output, shape index: {}]  }
   0x1   :  { %9 = vsyncpa [#allocation7], 0 }
   0x2   :  { %10 = vsyncpa [#allocation5], 0 }
   0x3   :  { %12 = vsyncpa [#allocation5 + $0x1], 0  ;;  %s12533_s12 = smov 0   ;;  %s12535_s13 = smov 0  }
   0x4   :  { %s12537_s14 = smov 0   ;;  %s12539_s15 = smov 0  }
   0x5 LB: > { %s12554_s16 = sadd.s32 4294967295, %s12502_s15   ;;  %s9400_s17 = sadd.s32 4294967294, %s12502_s15   ;;  %s12502_s15 = sphi %s12539_s15, %s13085_s15   ;;  %s12498_s14 = sphi %s12537_s14, %s13084_s14   ;;  %s12494_s13 = sphi %s12535_s13, %s13083_s13   ;;  %s12490_s12 = sphi %s12533_s12, %s13082_s12  }
   0x6   : > { %s12558_s18 = sadd.s32 1, %s12502_s15   ;;  %s93_s19 = sadd.s32 1, %s12498_s14 }
   0x7   : > { %s90_s20 = ssub.s32 %s12502_s15, %s12558_s18  ;;  %p103_p0 = scmp.ne.s32.totalorder %s12498_s14, %s12494_s13 }
   0x8   : > { %p91_p1 = scmp.eq.s32.totalorder %s90_s20, 0  ;;  %p104_p2 = scmp.eq.s32.totalorder %s12554_s16, 1 }
   0x9   : > { %p109_p3 = scmp.ne.s32.totalorder %s12494_s13, %s12490_s12  ;;  %p110_p4 = scmp.eq.s32.totalorder %s9400_s17, 1 }
   0xa   : > { %s12569_s21 = scalar_select %p91_p1, %s12498_s14, %s93_s19  }
   0xb   : > { %p12571_p5 = por %p104_p2, %p103_p0  ;;  %p12575_p6 = por %p110_p4, %p109_p3 }
   0xc   : > { %p9401_p7 = scmp.ge.s32.totalorder %s12502_s15, 1  ;;  %p117_p8 = scmp.lt.s32.totalorder %s12502_s15, 3 }
   0xd   : > { %s13071_s22 = scalar_select %p12571_p5, 1, 0 }
   0xe   : > { %s13072_s23 = scalar_select %p12575_p6, 1, 0 }
   0xf   : > { %p13068_p9 = scmp.eq.s32.totalorder %s12554_s16, 0  ;;  %p12582_p10 = pnand %p9401_p7, %p117_p8 }
  0x10   : > { %s12504_s25 = smov [#allocation3]   ;;  %s12505_s28 = smov [#allocation6]  }
  0x11   : > { %s13073_s24 = scalar_select %p12582_p10, 1, 0 }
  0x12   : > { %s129_s26 = sshll.u32 %s12504_s25, 4  ;;  %p10580_p11 = pneg %p12582_p10  ;;  %s130_s26 = int_to_ptr.vmem [resolvable:$true] %s129_s26 }
  0x13   : > { %s143_s29 = sshll.u32 %s12505_s28, 4  ;;  %s12376_s5 = scalar_lea.hbm %s13065_s1, 49152  ;;  %s12594_s29 = int_to_ptr.vmem [resolvable:$true] %s143_s29 }
  0x14   : > { %p12590_p12 = pnand %p13068_p9, %p10580_p11  ;;  %p12377_p13 = scmp.ne.s32.totalorder %s13065_s1, %s12376_s5 }
  0x15   : > { %p12383_p3 = scmp.lt.u32.totalorder %s12376_s5, %s13065_s1 }
  0x16   : > { %p12378_p0 = pneg %p12590_p12 }
  0x18   : > { %p12379_p1 = pnand %p12378_p0, %p12377_p13 }
  0x1a   : > { %p12380_p2 = pneg %p12379_p1 }
  0x1c   : > { %p12385_p4 = pnand %p12383_p3, %p12380_p2 }
  0x1e   : > { %12388 = shalt.err (!%p12385_p4)
}
  0x1f   : > { %s12389_s10 = scalar_lea.vmem %s130_s26, 49152  ;;  %p12397_p9 = scmp.lt.s32.totalorder %s130_s26, %s130_s26 }
  0x20   : > { %p12390_p7 = scmp.ne.s32.totalorder %s130_s26, %s12389_s10  ;;  %p12398_p6 = scmp.lt.s32.totalorder %s12389_s10, %s12389_s10 }
  0x22   : > { %p12392_p8 = pnand %p12390_p7, %p12378_p0  ;;  %p12399_p5 = por %p12398_p6, %p12397_p9 }
  0x24   : > { %p12393_p11 = pneg %p12392_p8 }
  0x26   : > { %p12400_p10 = pnand %p12399_p5, %p12393_p11 }
  0x28   : > { %12403 = shalt.err (!%p12400_p10)
}
  0x29   : > { %s12506_s11 = smov 256   ;;  %s12507_s17 = smov 16  }
  0x2a   : > { %10583 = dma.hbm_to_vmem [thread:$0]  (!%p12590_p12), %s13065_s1, 49152, %s130_s26, [#allocation4], %s12506_s11, %s12506_s11, %s12507_s17  }
  0x2b   : > { %s12404_s30 = scalar_lea.hbm %s13066_s2, 64 }
  0x2c   : > { %p12405_p13 = scmp.ne.s32.totalorder %s13066_s2, %s12404_s30  ;;  %p12411_p9 = scmp.lt.u32.totalorder %s12404_s30, %s13066_s2 }
  0x2e   : > { %p12407_p5 = pnand %p12405_p13, %p12378_p0 }
  0x30   : > { %p12408_p6 = pneg %p12407_p5 }
  0x32   : > { %p12413_p10 = pnand %p12411_p9, %p12408_p6 }
  0x34   : > { %12416 = shalt.err (!%p12413_p10)
}
  0x35   : > { %s12417_s26 = scalar_lea.vmem %s12594_s29, 64  ;;  %p12425_p4 = scmp.lt.s32.totalorder %s12594_s29, %s12594_s29 }
  0x36   : > { %p12418_p1 = scmp.ne.s32.totalorder %s12594_s29, %s12417_s26  ;;  %p12426_p7 = scmp.lt.s32.totalorder %s12417_s26, %s12417_s26 }
  0x38   : > { %p12420_p2 = pnand %p12418_p1, %p12378_p0  ;;  %p12427_p8 = por %p12426_p7, %p12425_p4 }
  0x3a   : > { %p12421_p3 = pneg %p12420_p2 }
  0x3c   : > { %p12428_p11 = pnand %p12427_p8, %p12421_p3 }
  0x3e   : > { %12431 = shalt.err (!%p12428_p11)
}
  0x3f   : > { %10586 = dma.hbm_to_vmem [thread:$0]  (!%p12590_p12), %s13066_s2, 64, %s12594_s29, [#allocation7]  }
  0x40   : > { %p13075_p13 = scmp.ne.s32.totalorder %s13073_s24, 0 }
  0x41   : > { %p13076_p5 = scmp.eq.s32.totalorder (!%p13075_p13), %s12554_s16, 0 }
  0x42   : > { %164 = sbr.rel (%p13075_p13) target bundleno = 3359 (0xd1f), region = 32 }
  0x49   : > { %12477 = dma.done.wait (%p13076_p5), [#allocation4], 49152   ;;  %p13077_p0 = pmov %p13076_p5 }
  0x4b   : > { %12479 = vsyncadd (%p13077_p0), [#allocation4], 4294918144  ;;  %p13078_p6 = pmov %p13077_p0 }
  0x4c   : > { %p13079_p9 = pmov %p13077_p0 }
  0x4d   : > { %12481 = dma.done.wait (%p13078_p6), [#allocation7], 64  }
  0x4e   : > { %12483 = vsyncadd (%p13079_p9), [#allocation7], 4294967232  ;;  %v10636_v0 = vld [vmem:[#allocation3 + $0x404] ss:$16 sps:$4 sm:$0xff]   ;;  %v10640_v2 = vld [vmem:[#allocation3 + $0x400] ss:$16 sps:$4 sm:$0xff]  }
  0x4f   : > { %v10638_v1 = vld [vmem:[#allocation3 + $0x604] ss:$16 sps:$4 sm:$0xff]   ;;  %1163 = vmatprep.subr.bf16.mxu0 %v10636_v0  ;;  %v10641_v3 = vld [vmem:[#allocation3 + $0x600] ss:$16 sps:$4 sm:$0xff]   ;;  %p192_p12 = scmp.lt.s32.totalorder %s12554_s16, 1  ;;  %s12508_s17 = smov 64  }
  0x50   : > { %1204 = vmatprep.subr.bf16.mxu1 %v10638_v1  ;;  %v10642_v4 = vld [vmem:[#allocation3 + $0x424] ss:$16 sps:$4 sm:$0xff]   ;;  %1164 = vmatpush1.bf16.msra.mxu0 %v10640_v2  ;;  %v10646_v6 = vld [vmem:[#allocation3 + $0x420] ss:$16 sps:$4 sm:$0xff]   ;;  %s12509_s19 = smov 32   ;;  %s12510_s20 = smov 16  }
  0x51   : > { %1205 = vmatpush1.bf16.msra.mxu1 %v10641_v3  ;;  %v10644_v5 = vld [vmem:[#allocation3 + $0x624] ss:$16 sps:$4 sm:$0xff]   ;;  %1165 = vmatprep.subr.bf16.mxu0 %v10642_v4  ;;  %v10647_v7 = vld [vmem:[#allocation3 + $0x620] ss:$16 sps:$4 sm:$0xff]   ;;  %s193_s24 = scalar_select %p192_p12, %s12554_s16, 1  ;;  %vm3243_vm0 = vcmask 1046528  }
  0x52   : > { %1206 = vmatprep.subr.bf16.mxu1 %v10644_v5  ;;  %v10648_v8 = vld [vmem:[#allocation3 + $0x444] ss:$16 sps:$4 sm:$0xff]   ;;  %v10652_v10 = vld [vmem:[#allocation3 + $0x440] ss:$16 sps:$4 sm:$0xff]   ;;  %s12511_s25 = smov 8   ;;  %s189_s28 = sand.u32 1, %s12494_s13  }
  0x53   : > { %v10650_v9 = vld [vmem:[#allocation3 + $0x644] ss:$16 sps:$4 sm:$0xff]   ;;  %v10653_v11 = vld [vmem:[#allocation3 + $0x640] ss:$16 sps:$4 sm:$0xff]   ;;  %s10568_s27 = sshll.u32 %s193_s24, 6  ;;  %s9408_s30 = sshll.u32 %s189_s28, 5 }
  0x54   : > { %1166 = vmatpush1.bf16.msra.mxu0 %v10646_v6  ;;  %v10654_v12 = vld [vmem:[#allocation3 + $0x464] ss:$16 sps:$4 sm:$0xff]   ;;  %v10658_v14 = vld [vmem:[#allocation3 + $0x460] ss:$16 sps:$4 sm:$0xff]   ;;  %s196_s11 = scalar_lea.vmem %s13064_s0, %s10568_s27  ;;  %s10569_s4 = sshll.u32 %s12554_s16, 9 }
  0x55   : > { %1207 = vmatpush1.bf16.msra.mxu1 %v10647_v7  ;;  %1167 = vmatprep.subr.bf16.mxu0 %v10648_v8  ;;  %v10656_v13 = vld [vmem:[#allocation3 + $0x664] ss:$16 sps:$4 sm:$0xff]   ;;  %v10659_v15 = vld [vmem:[#allocation3 + $0x660] ss:$16 sps:$4 sm:$0xff]   ;;  %v12658_v48 = vld [vmem:[%s196_s11 + $0x8] sm:$0xff]  ;;  %s191_s5 = scalar_lea.vmem [#allocation8], %s9408_s30  ;;  %s13020_s8 = scalar_lea.hbm %s13067_s3, %s10569_s4 }
  0x56   : > { %1208 = vmatprep.subr.bf16.mxu1 %v10650_v9  ;;  %v10660_v16 = vld [vmem:[#allocation3 + $0x484] ss:$16 sps:$4 sm:$0xff]   ;;  %v10664_v18 = vld [vmem:[#allocation3 + $0x480] ss:$16 sps:$4 sm:$0xff]   ;;  %v12660_v51 = vld [vmem:[%s196_s11 + $0x28] sm:$0x3] }
  0x57   : > { %v10662_v17 = vld [vmem:[#allocation3 + $0x684] ss:$16 sps:$4 sm:$0xff]   ;;  %v10665_v19 = vld [vmem:[#allocation3 + $0x680] ss:$16 sps:$4 sm:$0xff]   ;;  %206 = vst [vmem:[#allocation2 + $0x8] sm:$0xff] %v12658_v48  ;;  %v12663_v52 = vld [vmem:[%s196_s11 + $0x18] sm:$0xff] }
  0x58   : > { %1168 = vmatpush1.bf16.msra.mxu0 %v10652_v10  ;;  %v10666_v20 = vld [vmem:[#allocation3 + $0x4a4] ss:$16 sps:$4 sm:$0xff]   ;;  %v10670_v22 = vld [vmem:[#allocation3 + $0x4a0] ss:$16 sps:$4 sm:$0xff]   ;;  %v12665_v53 = vld [vmem:[%s196_s11 + $0x38] sm:$0x3] }
  0x59   : > { %1209 = vmatpush1.bf16.msra.mxu1 %v10653_v11  ;;  %1169 = vmatprep.subr.bf16.mxu0 %v10654_v12  ;;  %v10668_v21 = vld [vmem:[#allocation3 + $0x6a4] ss:$16 sps:$4 sm:$0xff]   ;;  %v10671_v23 = vld [vmem:[#allocation3 + $0x6a0] ss:$16 sps:$4 sm:$0xff]   ;;  %210 = vst [vmem:[#allocation2 + $0x28] sm:$0x3] %v12660_v51 }
  0x5a   : > { %1210 = vmatprep.subr.bf16.mxu1 %v10656_v13  ;;  %v10672_v24 = vld [vmem:[#allocation3 + $0x4c4] ss:$16 sps:$4 sm:$0xff]   ;;  %v10676_v26 = vld [vmem:[#allocation3 + $0x4c0] ss:$16 sps:$4 sm:$0xff]   ;;  %208 = vst [vmem:[#allocation2 + $0x18] sm:$0xff] %v12663_v52  ;;  %s9319_s6 = sshll.u32 %s191_s5, 4  ;;  %s13022_s6 = int_to_ptr.vmem [resolvable:$true] %s9319_s6 }
  0x5b   : > { %v10674_v25 = vld [vmem:[#allocation3 + $0x6c4] ss:$16 sps:$4 sm:$0xff]   ;;  %v10677_v27 = vld [vmem:[#allocation3 + $0x6c0] ss:$16 sps:$4 sm:$0xff]   ;;  %212 = vst [vmem:[#allocation2 + $0x38] sm:$0x3] %v12665_v53 }
  0x5c   : > { %1170 = vmatpush1.bf16.msra.mxu0 %v10658_v14  ;;  %v10678_v28 = vld [vmem:[#allocation3 + $0x4e4] ss:$16 sps:$4 sm:$0xff]   ;;  %v10682_v30 = vld [vmem:[#allocation3 + $0x4e0] ss:$16 sps:$4 sm:$0xff]   ;;  %s9305_s16 = scalar_lea.sflag [#allocation5], %s189_s28  ;;  %s12432_s9 = scalar_lea.vmem %s13022_s6, 512 }
  0x5d   : > { %1211 = vmatpush1.bf16.msra.mxu1 %v10659_v15  ;;  %1171 = vmatprep.subr.bf16.mxu0 %v10660_v16  ;;  %v10680_v29 = vld [vmem:[#allocation3 + $0x6e4] ss:$16 sps:$4 sm:$0xff]   ;;  %v10683_v31 = vld [vmem:[#allocation3 + $0x6e0] ss:$16 sps:$4 sm:$0xff]   ;;  %p12433_p10 = scmp.ne.s32.totalorder %s13022_s6, %s12432_s9  ;;  %p13080_p1 = scmp.ne.s32.totalorder %s13071_s22, 0 }
  0x5e   : > { %1212 = vmatprep.subr.bf16.mxu1 %v10662_v17  ;;  %v10684_v32 = vld [vmem:[#allocation3 + $0x504] ss:$16 sps:$4 sm:$0xff]   ;;  %v10688_v34 = vld [vmem:[#allocation3 + $0x500] ss:$16 sps:$4 sm:$0xff]   ;;  %v351_v0 = vld [vmem:[#allocation2 + $0x8] sm:$0xfe] }
  0x5f   : > { %v10686_v33 = vld [vmem:[#allocation3 + $0x704] ss:$16 sps:$4 sm:$0xff]   ;;  %v10689_v35 = vld [vmem:[#allocation3 + $0x700] ss:$16 sps:$4 sm:$0xff]   ;;  %p12434_p2 = pnand %p12433_p10, %p13080_p1  ;;  %s12512_s24 = smov [#allocation8]  }
  0x60   : > { %1172 = vmatpush1.bf16.msra.mxu0 %v10664_v18  ;;  %v10690_v36 = vld [vmem:[#allocation3 + $0x524] ss:$16 sps:$4 sm:$0xff]   ;;  %v10694_v38 = vld [vmem:[#allocation3 + $0x520] ss:$16 sps:$4 sm:$0xff]   ;;  %v355_v3 = vld [vmem:[#allocation2 + $0x28] sm:$0x1] }
  0x61   : > { %1213 = vmatpush1.bf16.msra.mxu1 %v10665_v19  ;;  %1173 = vmatprep.subr.bf16.mxu0 %v10666_v20  ;;  %v10692_v37 = vld [vmem:[#allocation3 + $0x724] ss:$16 sps:$4 sm:$0xff]   ;;  %v10695_v39 = vld [vmem:[#allocation3 + $0x720] ss:$16 sps:$4 sm:$0xff]   ;;  %v353_v4 = vld [vmem:[#allocation2 + $0x18] sm:$0xfe]  ;;  %v359_v6 = vpack.c.bf16 %v355_v3, %v351_v0  ;;  %p12435_p3 = pneg %p12434_p2 }
  0x62   : > { %1214 = vmatprep.subr.bf16.mxu1 %v10668_v21  ;;  %v10696_v40 = vld [vmem:[#allocation3 + $0x544] ss:$16 sps:$4 sm:$0xff]   ;;  %v10700_v42 = vld [vmem:[#allocation3 + $0x540] ss:$16 sps:$4 sm:$0xff]   ;;  %v357_v5 = vld [vmem:[#allocation2 + $0x38] sm:$0x1] }
  0x63   : > { %v10698_v41 = vld [vmem:[#allocation3 + $0x744] ss:$16 sps:$4 sm:$0xff]   ;;  %v10701_v43 = vld [vmem:[#allocation3 + $0x740] ss:$16 sps:$4 sm:$0xff]   ;;  %v361_v7 = vpack.c.bf16 %v357_v5, %v353_v4  ;;  %v499_v14 = vshrl.u32 %v359_v6, 16  ;;  %v501_v15 = vshll.u32 %v359_v6, 16 }
  0x64   : > { %1174 = vmatpush1.bf16.msra.mxu0 %v10670_v22  ;;  %v10702_v44 = vld [vmem:[#allocation3 + $0x564] ss:$16 sps:$4 sm:$0xff]   ;;  %v10706_v46 = vld [vmem:[#allocation3 + $0x560] ss:$16 sps:$4 sm:$0xff]   ;;  %v10762_v0 = vld [vmem:[#allocation3 + $0x4a8] ss:$16 sps:$4 sm:$0xff]  }
  0x65   : > { %1215 = vmatpush1.bf16.msra.mxu1 %v10671_v23  ;;  %1175 = vmatprep.subr.bf16.mxu0 %v10672_v24  ;;  %v10704_v45 = vld [vmem:[#allocation3 + $0x764] ss:$16 sps:$4 sm:$0xff]   ;;  %v10707_v47 = vld [vmem:[#allocation3 + $0x760] ss:$16 sps:$4 sm:$0xff]   ;;  %v513_v16 = vshrl.u32 %v361_v7, 16  ;;  %v515_v17 = vshll.u32 %v361_v7, 16 }
  0x66   : > { %1216 = vmatprep.subr.bf16.mxu1 %v10674_v25  ;;  %v10708_v49 = vld [vmem:[#allocation3 + $0x584] ss:$16 sps:$4 sm:$0xff]   ;;  %v12670_v55 = vld [vmem:[%s196_s11 + $0x20] sm:$0x3]  ;;  %v12673_v57 = vld [vmem:[%s196_s11 + $0x30] sm:$0x3] }
  0x67   : > { %v10710_v50 = vld [vmem:[#allocation3 + $0x784] ss:$16 sps:$4 sm:$0xff]   ;;  %209 = vst [vmem:[#allocation2 + $0x20] sm:$0x3] %v12670_v55  ;;  %211 = vst [vmem:[#allocation2 + $0x30] sm:$0x3] %v12673_v57 }
  0x68   : > { %1176 = vmatpush1.bf16.msra.mxu0 %v10676_v26  ;;  %v197_v54 = vld [vmem:[%s196_s11] sm:$0xff]  ;;  %v199_v56 = vld [vmem:[%s196_s11 + $0x10] sm:$0xff]  ;;  %v503_v23 = vrot.slane %v501_v15, 1  ;;  %v517_v24 = vrot.slane %v515_v17, 1  ;;  %v10773_v3 = vld [vmem:[#allocation3 + $0x6cc] ss:$16 sps:$4 sm:$0xff]  }
  0x69   : > { %1217 = vmatpush1.bf16.msra.mxu1 %v10677_v27  ;;  %1177 = vmatprep.subr.bf16.mxu0 %v10678_v28  ;;  %205 = vst [vmem:[#allocation2] sm:$0xff] %v197_v54  ;;  %207 = vst [vmem:[#allocation2 + $0x10] sm:$0xff] %v199_v56  ;;  %v10712_v58 = vld [vmem:[#allocation3 + $0x580] ss:$16 sps:$4 sm:$0xff]   ;;  %v10714_v60 = vld [vmem:[#allocation3 + $0x5a4] ss:$16 sps:$4 sm:$0xff]  }
  0x6a   : > { %1218 = vmatprep.subr.bf16.mxu1 %v10680_v29  ;;  %v10713_v59 = vld [vmem:[#allocation3 + $0x780] ss:$16 sps:$4 sm:$0xff]   ;;  %v10716_v61 = vld [vmem:[#allocation3 + $0x7a4] ss:$16 sps:$4 sm:$0xff]   ;;  %v504_v27 = vor.u32 %v503_v23, %v499_v14  ;;  %v518_v28 = vor.u32 %v517_v24, %v513_v16  ;;  %v10750_v54 = vld [vmem:[#allocation3 + $0x468] ss:$16 sps:$4 sm:$0xff]  }
  0x6b   : > { %v10718_v62 = vld [vmem:[#allocation3 + $0x5a0] ss:$16 sps:$4 sm:$0xff]   ;;  %v10720_v1 = vld [vmem:[#allocation3 + $0x5c4] ss:$16 sps:$4 sm:$0xff]   ;;  %v10753_v56 = vld [vmem:[#allocation3 + $0x668] ss:$16 sps:$4 sm:$0xff]  }
  0x6c   : > { %1178 = vmatpush1.bf16.msra.mxu0 %v10682_v30  ;;  %v10719_v63 = vld [vmem:[#allocation3 + $0x7a0] ss:$16 sps:$4 sm:$0xff]   ;;  %v10722_v2 = vld [vmem:[#allocation3 + $0x7c4] ss:$16 sps:$4 sm:$0xff]   ;;  %1195 = vmatprep.mubr.bf16.mxu0 %v504_v27  ;;  %v10768_v4 = vld [vmem:[#allocation3 + $0x4c8] ss:$16 sps:$4 sm:$0xff]  }
  0x6d   : > { %1219 = vmatpush1.bf16.msra.mxu1 %v10683_v31  ;;  %1179 = vmatprep.subr.bf16.mxu0 %v10684_v32  ;;  %v10724_v13 = vld [vmem:[#allocation3 + $0x5c0] ss:$16 sps:$4 sm:$0xff]   ;;  %v10726_v21 = vld [vmem:[#allocation3 + $0x5e4] ss:$16 sps:$4 sm:$0xff]   ;;  %v10771_v5 = vld [vmem:[#allocation3 + $0x6c8] ss:$16 sps:$4 sm:$0xff]  }
  0x6e   : > { %1220 = vmatprep.subr.bf16.mxu1 %v10686_v33  ;;  %v354_v9 = vld [vmem:[#allocation2 + $0x20] sm:$0x1]  ;;  %v356_v12 = vld [vmem:[#allocation2 + $0x30] sm:$0x1]  ;;  %v10728_v22 = vld [vmem:[#allocation3 + $0x7e4] ss:$16 sps:$4 sm:$0xff]   ;;  %1236 = vmatprep.mubr.bf16.mxu1 %v518_v28 }
  0x6f   : > { %v10725_v18 = vld [vmem:[#allocation3 + $0x7c0] ss:$16 sps:$4 sm:$0xff]   ;;  %v10776_v6 = vld [vmem:[#allocation3 + $0x4ec] ss:$16 sps:$4 sm:$0xff]   ;;  %v10786_v16 = vld [vmem:[#allocation3 + $0x528] ss:$16 sps:$4 sm:$0xff]  }
  0x70   : > { %1180 = vmatpush1.bf16.msra.mxu0 %v10688_v34  ;;  %v350_v8 = vld [vmem:[#allocation2] sm:$0xfe]  ;;  %v352_v10 = vld [vmem:[#allocation2 + $0x10] sm:$0xfe]  ;;  %v10734_v34 = vld [vmem:[#allocation3 + $0x40c] ss:$16 sps:$4 sm:$0xff]  }
  0x71   : > { %1221 = vmatpush1.bf16.msra.mxu1 %v10689_v35  ;;  %1181 = vmatprep.subr.bf16.mxu0 %v10690_v36  ;;  %v358_v11 = vpack.c.bf16 %v354_v9, %v350_v8  ;;  %v360_v20 = vpack.c.bf16 %v356_v12, %v352_v10  ;;  %v10730_v26 = vld [vmem:[#allocation3 + $0x5e0] ss:$16 sps:$4 sm:$0xff]   ;;  %v10737_v35 = vld [vmem:[#allocation3 + $0x60c] ss:$16 sps:$4 sm:$0xff]   ;;  %v10774_v8 = vld [vmem:[#allocation3 + $0x4e8] ss:$16 sps:$4 sm:$0xff]  }
  0x72   : > { %1222 = vmatprep.subr.bf16.mxu1 %v10692_v37  ;;  %v10731_v33 = vld [vmem:[#allocation3 + $0x7e0] ss:$16 sps:$4 sm:$0xff]   ;;  %v10779_v7 = vld [vmem:[#allocation3 + $0x6ec] ss:$16 sps:$4 sm:$0xff]   ;;  %v10777_v9 = vld [vmem:[#allocation3 + $0x6e8] ss:$16 sps:$4 sm:$0xff]  }
  0x73   : > { %v494_v19 = vshll.u32 %v358_v11, 16  ;;  %v508_v25 = vshll.u32 %v360_v20, 16  ;;  %v492_v29 = vshrl.u32 %v358_v11, 16  ;;  %v506_v31 = vshrl.u32 %v360_v20, 16  ;;  %v10782_v10 = vld [vmem:[#allocation3 + $0x50c] ss:$16 sps:$4 sm:$0xff]  }
  0x74   : > { %1182 = vmatpush1.bf16.msra.mxu0 %v10694_v38  ;;  %v10732_v38 = vld [vmem:[#allocation3 + $0x408] ss:$16 sps:$4 sm:$0xff]   ;;  %v10785_v11 = vld [vmem:[#allocation3 + $0x70c] ss:$16 sps:$4 sm:$0xff]   ;;  %s12436_s27 = sshll.u32 %s12512_s24, 4  ;;  %s12437_s27 = int_to_ptr.vmem [resolvable:$false] %s12436_s27 }
  0x75   : > { %1223 = vmatpush1.bf16.msra.mxu1 %v10695_v39  ;;  %1183 = vmatprep.subr.bf16.mxu0 %v10696_v40  ;;  %v496_v30 = vrot.slane %v494_v19, 1  ;;  %v510_v32 = vrot.slane %v508_v25, 1  ;;  %v10735_v39 = vld [vmem:[#allocation3 + $0x608] ss:$16 sps:$4 sm:$0xff]   ;;  %v10740_v40 = vld [vmem:[#allocation3 + $0x42c] ss:$16 sps:$4 sm:$0xff]   ;;  %p12439_p4 = scmp.lt.s32.totalorder %s13022_s6, %s12437_s27 }
  0x76   : > { %1224 = vmatprep.subr.bf16.mxu1 %v10698_v41  ;;  %v10743_v41 = vld [vmem:[#allocation3 + $0x62c] ss:$16 sps:$4 sm:$0xff]   ;;  %v10780_v12 = vld [vmem:[#allocation3 + $0x508] ss:$16 sps:$4 sm:$0xff]   ;;  %s12438_s29 = scalar_lea.vmem %s12437_s27, 1024 }
  0x77   : > { %v12676_v36 = vor.u32 %v496_v30, %v492_v29  ;;  %v12678_v37 = vor.u32 %v510_v32, %v506_v31  ;;  %v10788_v14 = vld [vmem:[#allocation3 + $0x52c] ss:$16 sps:$4 sm:$0xff]   ;;  %v10789_v17 = vld [vmem:[#allocation3 + $0x728] ss:$16 sps:$4 sm:$0xff]   ;;  %p12440_p7 = scmp.lt.s32.totalorder %s12438_s29, %s12432_s9 }
  0x78   : > { %1184 = vmatpush1.bf16.msra.mxu0 %v10700_v42  ;;  %v10738_v42 = vld [vmem:[#allocation3 + $0x428] ss:$16 sps:$4 sm:$0xff]   ;;  %v10791_v15 = vld [vmem:[#allocation3 + $0x72c] ss:$16 sps:$4 sm:$0xff]  }
  0x79   : > { %1225 = vmatpush1.bf16.msra.mxu1 %v10701_v43  ;;  %1185 = vmatprep.subr.bf16.mxu0 %v10702_v44  ;;  %v10741_v43 = vld [vmem:[#allocation3 + $0x628] ss:$16 sps:$4 sm:$0xff]   ;;  %v10746_v44 = vld [vmem:[#allocation3 + $0x44c] ss:$16 sps:$4 sm:$0xff]   ;;  %p12441_p8 = por %p12440_p7, %p12439_p4 }
  0x7a   : > { %1226 = vmatprep.subr.bf16.mxu1 %v10704_v45  ;;  %v10749_v45 = vld [vmem:[#allocation3 + $0x64c] ss:$16 sps:$4 sm:$0xff]   ;;  %v10792_v20 = vld [vmem:[#allocation3 + $0x548] ss:$16 sps:$4 sm:$0xff]  }
  0x7b   : > { %v10797_v19 = vld [vmem:[#allocation3 + $0x74c] ss:$16 sps:$4 sm:$0xff]   ;;  %v10798_v24 = vld [vmem:[#allocation3 + $0x568] ss:$16 sps:$4 sm:$0xff]   ;;  %p12442_p11 = pnand %p12441_p8, %p12435_p3 }
  0x7c   : > { %1186 = vmatpush1.bf16.msra.mxu0 %v10706_v46  ;;  %v10744_v46 = vld [vmem:[#allocation3 + $0x448] ss:$16 sps:$4 sm:$0xff]   ;;  %v10803_v23 = vld [vmem:[#allocation3 + $0x76c] ss:$16 sps:$4 sm:$0xff]  }
  0x7d   : > { %1227 = vmatpush1.bf16.msra.mxu1 %v10707_v47  ;;  %1187 = vmatprep.subr.bf16.mxu0 %v10708_v49  ;;  %v10747_v47 = vld [vmem:[#allocation3 + $0x648] ss:$16 sps:$4 sm:$0xff]   ;;  %v10752_v49 = vld [vmem:[#allocation3 + $0x46c] ss:$16 sps:$4 sm:$0xff]  }
  0x7e   : > { %1228 = vmatprep.subr.bf16.mxu1 %v10710_v50  ;;  %v10755_v50 = vld [vmem:[#allocation3 + $0x66c] ss:$16 sps:$4 sm:$0xff]   ;;  %v10801_v25 = vld [vmem:[#allocation3 + $0x768] ss:$16 sps:$4 sm:$0xff]  }
  0x7f   : > { %v10807_v29 = vld [vmem:[#allocation3 + $0x788] ss:$16 sps:$4 sm:$0xff]   ;;  %v10812_v30 = vld [vmem:[#allocation3 + $0x5ac] ss:$16 sps:$4 sm:$0xff]  }
  0x80   : > { %1188 = vmatpush1.bf16.msra.mxu0 %v10712_v58  ;;  %v10758_v58 = vld [vmem:[#allocation3 + $0x48c] ss:$16 sps:$4 sm:$0xff]   ;;  %v10810_v32 = vld [vmem:[#allocation3 + $0x5a8] ss:$16 sps:$4 sm:$0xff]  }
  0x81   : > { %1229 = vmatpush1.bf16.msra.mxu1 %v10713_v59  ;;  %1189 = vmatprep.subr.bf16.mxu0 %v10714_v60  ;;  %v10761_v59 = vld [vmem:[#allocation3 + $0x68c] ss:$16 sps:$4 sm:$0xff]   ;;  %v10756_v60 = vld [vmem:[#allocation3 + $0x488] ss:$16 sps:$4 sm:$0xff]  }
  0x82   : > { %1230 = vmatprep.subr.bf16.mxu1 %v10716_v61  ;;  %v10759_v61 = vld [vmem:[#allocation3 + $0x688] ss:$16 sps:$4 sm:$0xff]   ;;  %v10815_v31 = vld [vmem:[#allocation3 + $0x7ac] ss:$16 sps:$4 sm:$0xff]  }
  0x84   : > { %1190 = vmatpush1.bf16.msra.mxu0 %v10718_v62  ;;  %v10764_v62 = vld [vmem:[#allocation3 + $0x4ac] ss:$16 sps:$4 sm:$0xff]  }
  0x85   : > { %1231 = vmatpush1.bf16.msra.mxu1 %v10719_v63  ;;  %1191 = vmatprep.subr.bf16.mxu0 %v10720_v1  ;;  %v10767_v63 = vld [vmem:[#allocation3 + $0x6ac] ss:$16 sps:$4 sm:$0xff]   ;;  %v10765_v1 = vld [vmem:[#allocation3 + $0x6a8] ss:$16 sps:$4 sm:$0xff]  }
  0x86   : > { %1232 = vmatprep.subr.bf16.mxu1 %v10722_v2  ;;  %v10770_v2 = vld [vmem:[#allocation3 + $0x4cc] ss:$16 sps:$4 sm:$0xff]  }
  0x88   : > { %1192 = vmatpush1.bf16.msra.mxu0 %v10724_v13  ;;  %v10783_v13 = vld [vmem:[#allocation3 + $0x708] ss:$16 sps:$4 sm:$0xff]  }
  0x89   : > { %1233 = vmatpush1.bf16.msra.mxu1 %v10725_v18  ;;  %1193 = vmatprep.subr.bf16.mxu0 %v10726_v21  ;;  %v10794_v18 = vld [vmem:[#allocation3 + $0x54c] ss:$16 sps:$4 sm:$0xff]   ;;  %v10795_v21 = vld [vmem:[#allocation3 + $0x748] ss:$16 sps:$4 sm:$0xff]  }
  0x8a   : > { %1234 = vmatprep.subr.bf16.mxu1 %v10728_v22  ;;  %v10800_v22 = vld [vmem:[#allocation3 + $0x56c] ss:$16 sps:$4 sm:$0xff]  }
  0x8c   : > { %1194 = vmatpush1.bf16.msra.mxu0 %v10730_v26  ;;  %v10806_v26 = vld [vmem:[#allocation3 + $0x58c] ss:$16 sps:$4 sm:$0xff]  }
  0x8d   : > { %1235 = vmatpush1.bf16.msra.mxu1 %v10731_v33  ;;  %1245 = vmatprep.subr.bf16.mxu0 %v10734_v34  ;;  %v10813_v33 = vld [vmem:[#allocation3 + $0x7a8] ss:$16 sps:$4 sm:$0xff]   ;;  %v10818_v34 = vld [vmem:[#allocation3 + $0x5cc] ss:$16 sps:$4 sm:$0xff]  }
  0x8e   : > { %1286 = vmatprep.subr.bf16.mxu1 %v10737_v35  ;;  %v10821_v35 = vld [vmem:[#allocation3 + $0x7cc] ss:$16 sps:$4 sm:$0xff]  }
  0x8f   : > { %1196 = vmatmul.mubr.bf16.vlgmr.msra.gmra.mrb[0].mxu0 %v12676_v36 }
  0x90   : > { %1237 = vmatmul.mubr.bf16.vlgmr.msra.gmra.mrb[0].mxu1 %v12678_v37  ;;  %1246 = vmatpush1.bf16.msra.mxu0 %v10732_v38  ;;  %v10816_v38 = vld [vmem:[#allocation3 + $0x5c8] ss:$16 sps:$4 sm:$0xff]  }
  0x91   : > { %1287 = vmatpush1.bf16.msra.mxu1 %v10735_v39  ;;  %1247 = vmatprep.subr.bf16.mxu0 %v10740_v40  ;;  %v10819_v39 = vld [vmem:[#allocation3 + $0x7c8] ss:$16 sps:$4 sm:$0xff]   ;;  %v10824_v40 = vld [vmem:[#allocation3 + $0x5ec] ss:$16 sps:$4 sm:$0xff]  }
  0x92   : > { %1288 = vmatprep.subr.bf16.mxu1 %v10743_v41  ;;  %1277 = vmatprep.mubr.bf16.mxu0 %v504_v27  ;;  %v10809_v27 = vld [vmem:[#allocation3 + $0x78c] ss:$16 sps:$4 sm:$0xff]  }
  0x93   : > { %1318 = vmatprep.mubr.bf16.mxu1 %v518_v28  ;;  %v10804_v28 = vld [vmem:[#allocation3 + $0x588] ss:$16 sps:$4 sm:$0xff]   ;;  %v10827_v41 = vld [vmem:[#allocation3 + $0x7ec] ss:$16 sps:$4 sm:$0xff]  }
  0x94   : > { %1248 = vmatpush1.bf16.msra.mxu0 %v10738_v42  ;;  %v10822_v42 = vld [vmem:[#allocation3 + $0x5e8] ss:$16 sps:$4 sm:$0xff]  }
  0x95   : > { %1289 = vmatpush1.bf16.msra.mxu1 %v10741_v43  ;;  %1249 = vmatprep.subr.bf16.mxu0 %v10746_v44  ;;  %v10825_v43 = vld [vmem:[#allocation3 + $0x7e8] ss:$16 sps:$4 sm:$0xff]   ;;  %v10830_v44 = vld [vmem:[#allocation3 + $0x4] ss:$16 sps:$4 sm:$0xff]  }
  0x96   : > { %1290 = vmatprep.subr.bf16.mxu1 %v10749_v45  ;;  %v10833_v45 = vld [vmem:[#allocation3 + $0x204] ss:$16 sps:$4 sm:$0xff]  }
  0x98   : > { %1250 = vmatpush1.bf16.msra.mxu0 %v10744_v46  ;;  %v10828_v46 = vld [vmem:[#allocation3] ss:$16 sps:$4 sm:$0xff]  }
  0x99   : > { %1291 = vmatpush1.bf16.msra.mxu1 %v10747_v47  ;;  %1251 = vmatprep.subr.bf16.mxu0 %v10752_v49  ;;  %v10831_v47 = vld [vmem:[#allocation3 + $0x200] ss:$16 sps:$4 sm:$0xff]   ;;  %v10836_v49 = vld [vmem:[#allocation3 + $0x24] ss:$16 sps:$4 sm:$0xff]  }
  0x9a   : > { %1292 = vmatprep.subr.bf16.mxu1 %v10755_v50  ;;  %v10839_v50 = vld [vmem:[#allocation3 + $0x224] ss:$16 sps:$4 sm:$0xff]  }
  0x9c   : > { %1252 = vmatpush1.bf16.msra.mxu0 %v10750_v54  ;;  %v12684_v54 = vpack.c.bf16 %v12658_v48, %v12658_v48  ;;  %v10840_v48 = vld [vmem:[#allocation3 + $0x40] ss:$16 sps:$4 sm:$0xff]  }
  0x9d   : > { %1293 = vmatpush1.bf16.msra.mxu1 %v10753_v56  ;;  %1253 = vmatprep.subr.bf16.mxu0 %v10758_v58  ;;  %v12688_v56 = vpack.c.bf16 %v12663_v52, %v12663_v52  ;;  %v10834_v58 = vld [vmem:[#allocation3 + $0x20] ss:$16 sps:$4 sm:$0xff]  }
  0x9e   : > { %1294 = vmatprep.subr.bf16.mxu1 %v10761_v59  ;;  %v10837_v59 = vld [vmem:[#allocation3 + $0x220] ss:$16 sps:$4 sm:$0xff]  }
  0x9f   : > { %v10843_v52 = vld [vmem:[#allocation3 + $0x240] ss:$16 sps:$4 sm:$0xff]  }
  0xa0   : > { %1254 = vmatpush1.bf16.msra.mxu0 %v10756_v60  ;;  %v10842_v60 = vld [vmem:[#allocation3 + $0x44] ss:$16 sps:$4 sm:$0xff]  }
  0xa1   : > { %1295 = vmatpush1.bf16.msra.mxu1 %v10759_v61  ;;  %1255 = vmatprep.subr.bf16.mxu0 %v10764_v62  ;;  %v10845_v61 = vld [vmem:[#allocation3 + $0x244] ss:$16 sps:$4 sm:$0xff]  }
  0xa2   : > { %1296 = vmatprep.subr.bf16.mxu1 %v10767_v63  ;;  %v10848_v62 = vld [vmem:[#allocation3 + $0x64] ss:$16 sps:$4 sm:$0xff]   ;;  %v10849_v63 = vld [vmem:[#allocation3 + $0x260] ss:$16 sps:$4 sm:$0xff]  }
  0xa4   : > { %1256 = vmatpush1.bf16.msra.mxu0 %v10762_v0  ;;  %v10854_v0 = vld [vmem:[#allocation3 + $0x84] ss:$16 sps:$4 sm:$0xff]  }
  0xa5   : > { %1297 = vmatpush1.bf16.msra.mxu1 %v10765_v1  ;;  %1257 = vmatprep.subr.bf16.mxu0 %v10770_v2  ;;  %v10857_v1 = vld [vmem:[#allocation3 + $0x284] ss:$16 sps:$4 sm:$0xff]   ;;  %v10852_v2 = vld [vmem:[#allocation3 + $0x80] ss:$16 sps:$4 sm:$0xff]  }
  0xa6   : > { %1298 = vmatprep.subr.bf16.mxu1 %v10773_v3  ;;  %v10855_v3 = vld [vmem:[#allocation3 + $0x280] ss:$16 sps:$4 sm:$0xff]  }
  0xa8   : > { %1258 = vmatpush1.bf16.msra.mxu0 %v10768_v4  ;;  %v10860_v4 = vld [vmem:[#allocation3 + $0xa4] ss:$16 sps:$4 sm:$0xff]  }
  0xa9   : > { %1299 = vmatpush1.bf16.msra.mxu1 %v10771_v5  ;;  %1259 = vmatprep.subr.bf16.mxu0 %v10776_v6  ;;  %v10863_v5 = vld [vmem:[#allocation3 + $0x2a4] ss:$16 sps:$4 sm:$0xff]   ;;  %v10858_v6 = vld [vmem:[#allocation3 + $0xa0] ss:$16 sps:$4 sm:$0xff]  }
  0xaa   : > { %1300 = vmatprep.subr.bf16.mxu1 %v10779_v7  ;;  %v10861_v7 = vld [vmem:[#allocation3 + $0x2a0] ss:$16 sps:$4 sm:$0xff]  }
  0xac   : > { %1260 = vmatpush1.bf16.msra.mxu0 %v10774_v8  ;;  %v10866_v8 = vld [vmem:[#allocation3 + $0xc4] ss:$16 sps:$4 sm:$0xff]  }
  0xad   : > { %1301 = vmatpush1.bf16.msra.mxu1 %v10777_v9  ;;  %1261 = vmatprep.subr.bf16.mxu0 %v10782_v10  ;;  %v10869_v9 = vld [vmem:[#allocation3 + $0x2c4] ss:$16 sps:$4 sm:$0xff]   ;;  %v10864_v10 = vld [vmem:[#allocation3 + $0xc0] ss:$16 sps:$4 sm:$0xff]  }
  0xae   : > { %1302 = vmatprep.subr.bf16.mxu1 %v10785_v11  ;;  %v10867_v11 = vld [vmem:[#allocation3 + $0x2c0] ss:$16 sps:$4 sm:$0xff]  }
  0xb0   : > { %1262 = vmatpush1.bf16.msra.mxu0 %v10780_v12  ;;  %v10872_v12 = vld [vmem:[#allocation3 + $0xe4] ss:$16 sps:$4 sm:$0xff]  }
  0xb1   : > { %1303 = vmatpush1.bf16.msra.mxu1 %v10783_v13  ;;  %1263 = vmatprep.subr.bf16.mxu0 %v10788_v14  ;;  %v10875_v13 = vld [vmem:[#allocation3 + $0x2e4] ss:$16 sps:$4 sm:$0xff]   ;;  %v10870_v14 = vld [vmem:[#allocation3 + $0xe0] ss:$16 sps:$4 sm:$0xff]  }
  0xb2   : > { %1304 = vmatprep.subr.bf16.mxu1 %v10791_v15  ;;  %v10873_v15 = vld [vmem:[#allocation3 + $0x2e0] ss:$16 sps:$4 sm:$0xff]  }
  0xb4   : > { %1264 = vmatpush1.bf16.msra.mxu0 %v10786_v16  ;;  %v10878_v16 = vld [vmem:[#allocation3 + $0x104] ss:$16 sps:$4 sm:$0xff]  }
  0xb5   : > { %1305 = vmatpush1.bf16.msra.mxu1 %v10789_v17  ;;  %1265 = vmatprep.subr.bf16.mxu0 %v10794_v18  ;;  %v10881_v17 = vld [vmem:[#allocation3 + $0x304] ss:$16 sps:$4 sm:$0xff]   ;;  %v10876_v18 = vld [vmem:[#allocation3 + $0x100] ss:$16 sps:$4 sm:$0xff]  }
  0xb6   : > { %1306 = vmatprep.subr.bf16.mxu1 %v10797_v19  ;;  %v10879_v19 = vld [vmem:[#allocation3 + $0x300] ss:$16 sps:$4 sm:$0xff]  }
  0xb8   : > { %1266 = vmatpush1.bf16.msra.mxu0 %v10792_v20  ;;  %v10884_v20 = vld [vmem:[#allocation3 + $0x124] ss:$16 sps:$4 sm:$0xff]  }
  0xb9   : > { %1307 = vmatpush1.bf16.msra.mxu1 %v10795_v21  ;;  %1267 = vmatprep.subr.bf16.mxu0 %v10800_v22  ;;  %v10887_v21 = vld [vmem:[#allocation3 + $0x324] ss:$16 sps:$4 sm:$0xff]   ;;  %v10882_v22 = vld [vmem:[#allocation3 + $0x120] ss:$16 sps:$4 sm:$0xff]  }
  0xba   : > { %1308 = vmatprep.subr.bf16.mxu1 %v10803_v23  ;;  %v10885_v23 = vld [vmem:[#allocation3 + $0x320] ss:$16 sps:$4 sm:$0xff]  }
  0xbc   : > { %1268 = vmatpush1.bf16.msra.mxu0 %v10798_v24  ;;  %v10890_v24 = vld [vmem:[#allocation3 + $0x144] ss:$16 sps:$4 sm:$0xff]  }
  0xbd   : > { %1309 = vmatpush1.bf16.msra.mxu1 %v10801_v25  ;;  %1269 = vmatprep.subr.bf16.mxu0 %v10806_v26  ;;  %v10893_v25 = vld [vmem:[#allocation3 + $0x344] ss:$16 sps:$4 sm:$0xff]   ;;  %v10888_v26 = vld [vmem:[#allocation3 + $0x140] ss:$16 sps:$4 sm:$0xff]  }
  0xbe   : > { %1310 = vmatprep.subr.bf16.mxu1 %v10809_v27  ;;  %v10891_v27 = vld [vmem:[#allocation3 + $0x340] ss:$16 sps:$4 sm:$0xff]  }
  0xc0   : > { %1270 = vmatpush1.bf16.msra.mxu0 %v10804_v28  ;;  %v10896_v28 = vld [vmem:[#allocation3 + $0x164] ss:$16 sps:$4 sm:$0xff]  }
  0xc1   : > { %1311 = vmatpush1.bf16.msra.mxu1 %v10807_v29  ;;  %1271 = vmatprep.subr.bf16.mxu0 %v10812_v30  ;;  %v10899_v29 = vld [vmem:[#allocation3 + $0x364] ss:$16 sps:$4 sm:$0xff]   ;;  %v10894_v30 = vld [vmem:[#allocation3 + $0x160] ss:$16 sps:$4 sm:$0xff]  }
  0xc2   : > { %1312 = vmatprep.subr.bf16.mxu1 %v10815_v31  ;;  %v10897_v31 = vld [vmem:[#allocation3 + $0x360] ss:$16 sps:$4 sm:$0xff]  }
  0xc4   : > { %1272 = vmatpush1.bf16.msra.mxu0 %v10810_v32  ;;  %v10902_v32 = vld [vmem:[#allocation3 + $0x184] ss:$16 sps:$4 sm:$0xff]  }
  0xc5   : > { %1313 = vmatpush1.bf16.msra.mxu1 %v10813_v33  ;;  %1273 = vmatprep.subr.bf16.mxu0 %v10818_v34  ;;  %v10905_v33 = vld [vmem:[#allocation3 + $0x384] ss:$16 sps:$4 sm:$0xff]   ;;  %v10900_v34 = vld [vmem:[#allocation3 + $0x180] ss:$16 sps:$4 sm:$0xff]  }
  0xc6   : > { %1314 = vmatprep.subr.bf16.mxu1 %v10821_v35  ;;  %v10903_v35 = vld [vmem:[#allocation3 + $0x380] ss:$16 sps:$4 sm:$0xff]  }
  0xc8   : > { %1274 = vmatpush1.bf16.msra.mxu0 %v10816_v38  ;;  %v10908_v38 = vld [vmem:[#allocation3 + $0x1a4] ss:$16 sps:$4 sm:$0xff]  }
  0xc9   : > { %1315 = vmatpush1.bf16.msra.mxu1 %v10819_v39  ;;  %1275 = vmatprep.subr.bf16.mxu0 %v10824_v40  ;;  %v10911_v39 = vld [vmem:[#allocation3 + $0x3a4] ss:$16 sps:$4 sm:$0xff]   ;;  %v10906_v40 = vld [vmem:[#allocation3 + $0x1a0] ss:$16 sps:$4 sm:$0xff]  }
  0xca   : > { %1316 = vmatprep.subr.bf16.mxu1 %v10827_v41  ;;  %v10909_v41 = vld [vmem:[#allocation3 + $0x3a0] ss:$16 sps:$4 sm:$0xff]  }
  0xcc   : > { %1276 = vmatpush1.bf16.msra.mxu0 %v10822_v42  ;;  %v10914_v42 = vld [vmem:[#allocation3 + $0x1c4] ss:$16 sps:$4 sm:$0xff]  }
  0xcd   : > { %1317 = vmatpush1.bf16.msra.mxu1 %v10825_v43  ;;  %1967 = vmatprep.subr.bf16.mxu0 %v10830_v44  ;;  %v10917_v43 = vld [vmem:[#allocation3 + $0x3c4] ss:$16 sps:$4 sm:$0xff]   ;;  %v10912_v44 = vld [vmem:[#allocation3 + $0x1c0] ss:$16 sps:$4 sm:$0xff]  }
  0xce   : > { %2008 = vmatprep.subr.bf16.mxu1 %v10833_v45  ;;  %v10915_v45 = vld [vmem:[#allocation3 + $0x3c0] ss:$16 sps:$4 sm:$0xff]  }
  0xcf   : > { %1278 = vmatmul.mubr.bf16.vlgmr.msra.gmra.mrb[4].mxu0 %v12676_v36  ;;  %v10851_v36 = vld [vmem:[#allocation3 + $0x264] ss:$16 sps:$4 sm:$0xff]  }
  0xd0   : > { %1319 = vmatmul.mubr.bf16.vlgmr.msra.gmra.mrb[4].mxu1 %v12678_v37  ;;  %1968 = vmatpush1.bf16.msra.mxu0 %v10828_v46  ;;  %v10846_v37 = vld [vmem:[#allocation3 + $0x60] ss:$16 sps:$4 sm:$0xff]   ;;  %v10920_v46 = vld [vmem:[#allocation3 + $0x1e4] ss:$16 sps:$4 sm:$0xff]  }
  0xd1   : > { %2009 = vmatpush1.bf16.msra.mxu1 %v10831_v47  ;;  %1969 = vmatprep.subr.bf16.mxu0 %v10836_v49  ;;  %v10923_v47 = vld [vmem:[#allocation3 + $0x3e4] ss:$16 sps:$4 sm:$0xff]   ;;  %v10918_v49 = vld [vmem:[#allocation3 + $0x1e0] ss:$16 sps:$4 sm:$0xff]  }
  0xd2   : > { %2010 = vmatprep.subr.bf16.mxu1 %v10839_v50  ;;  %1999 = vmatprep.mubr.bf16.mxu0 %v12684_v54  ;;  %v10921_v50 = vld [vmem:[#allocation3 + $0x3e0] ss:$16 sps:$4 sm:$0xff]  }
  0xd3   : > { %2040 = vmatprep.mubr.bf16.mxu1 %v12688_v56 }
  0xd4   : > { %1970 = vmatpush1.bf16.msra.mxu0 %v10834_v58  ;;  %v10926_v58 = vld [vmem:[#allocation3 + $0xc] ss:$16 sps:$4 sm:$0xff]  }
  0xd5   : > { %2011 = vmatpush1.bf16.msra.mxu1 %v10837_v59  ;;  %1971 = vmatprep.subr.bf16.mxu0 %v10842_v60  ;;  %v10929_v59 = vld [vmem:[#allocation3 + $0x20c] ss:$16 sps:$4 sm:$0xff]   ;;  %v12370_v60 = vld [vmem:[#allocation2] sm:$0xff] }
  0xd6   : > { %2012 = vmatprep.subr.bf16.mxu1 %v10845_v61  ;;  %v12694_v61 = vpack.c.bf16 %v12370_v60, %v12370_v60  ;;  %v11008_v60 = vld [vmem:[#allocation3 + $0x1c8] ss:$16 sps:$4 sm:$0xff]  }
  0xd8   : > { %1972 = vmatpush1.bf16.msra.mxu0 %v10840_v48  ;;  %v12371_v48 = vld [vmem:[#allocation2 + $0x10] sm:$0xff] }
  0xd9   : > { %2013 = vmatpush1.bf16.msra.mxu1 %v10843_v52  ;;  %1973 = vmatprep.subr.bf16.mxu0 %v10848_v62  ;;  %v12696_v52 = vpack.c.bf16 %v12371_v48, %v12371_v48  ;;  %v10924_v62 = vld [vmem:[#allocation3 + $0x8] ss:$16 sps:$4 sm:$0xff]  }
  0xda   : > { %2014 = vmatprep.subr.bf16.mxu1 %v10851_v36  ;;  %v10927_v36 = vld [vmem:[#allocation3 + $0x208] ss:$16 sps:$4 sm:$0xff]  }
  0xdb   : > { %v11011_v48 = vld [vmem:[#allocation3 + $0x3c8] ss:$16 sps:$4 sm:$0xff]  }
  0xdc   : > { %1974 = vmatpush1.bf16.msra.mxu0 %v10846_v37  ;;  %v10932_v37 = vld [vmem:[#allocation3 + $0x2c] ss:$16 sps:$4 sm:$0xff]  }
  0xdd   : > { %2015 = vmatpush1.bf16.msra.mxu1 %v10849_v63  ;;  %1975 = vmatprep.subr.bf16.mxu0 %v10854_v0  ;;  %v10935_v63 = vld [vmem:[#allocation3 + $0x22c] ss:$16 sps:$4 sm:$0xff]   ;;  %v10930_v0 = vld [vmem:[#allocation3 + $0x28] ss:$16 sps:$4 sm:$0xff]  }
  0xde   : > { %2016 = vmatprep.subr.bf16.mxu1 %v10857_v1  ;;  %v10933_v1 = vld [vmem:[#allocation3 + $0x228] ss:$16 sps:$4 sm:$0xff]  }
  0xe0   : > { %1976 = vmatpush1.bf16.msra.mxu0 %v10852_v2  ;;  %v10938_v2 = vld [vmem:[#allocation3 + $0x4c] ss:$16 sps:$4 sm:$0xff]  }
  0xe1   : > { %2017 = vmatpush1.bf16.msra.mxu1 %v10855_v3  ;;  %1977 = vmatprep.subr.bf16.mxu0 %v10860_v4  ;;  %v10941_v3 = vld [vmem:[#allocation3 + $0x24c] ss:$16 sps:$4 sm:$0xff]   ;;  %v10936_v4 = vld [vmem:[#allocation3 + $0x48] ss:$16 sps:$4 sm:$0xff]  }
  0xe2   : > { %2018 = vmatprep.subr.bf16.mxu1 %v10863_v5  ;;  %v10939_v5 = vld [vmem:[#allocation3 + $0x248] ss:$16 sps:$4 sm:$0xff]  }
  0xe4   : > { %1978 = vmatpush1.bf16.msra.mxu0 %v10858_v6  ;;  %v10944_v6 = vld [vmem:[#allocation3 + $0x6c] ss:$16 sps:$4 sm:$0xff]  }
  0xe5   : > { %2019 = vmatpush1.bf16.msra.mxu1 %v10861_v7  ;;  %1979 = vmatprep.subr.bf16.mxu0 %v10866_v8  ;;  %v10947_v7 = vld [vmem:[#allocation3 + $0x26c] ss:$16 sps:$4 sm:$0xff]   ;;  %v10942_v8 = vld [vmem:[#allocation3 + $0x68] ss:$16 sps:$4 sm:$0xff]  }
  0xe6   : > { %2020 = vmatprep.subr.bf16.mxu1 %v10869_v9  ;;  %v10945_v9 = vld [vmem:[#allocation3 + $0x268] ss:$16 sps:$4 sm:$0xff]  }
  0xe8   : > { %1980 = vmatpush1.bf16.msra.mxu0 %v10864_v10  ;;  %v10950_v10 = vld [vmem:[#allocation3 + $0x8c] ss:$16 sps:$4 sm:$0xff]  }
  0xe9   : > { %2021 = vmatpush1.bf16.msra.mxu1 %v10867_v11  ;;  %1981 = vmatprep.subr.bf16.mxu0 %v10872_v12  ;;  %v10953_v11 = vld [vmem:[#allocation3 + $0x28c] ss:$16 sps:$4 sm:$0xff]   ;;  %v10948_v12 = vld [vmem:[#allocation3 + $0x88] ss:$16 sps:$4 sm:$0xff]  }
  0xea   : > { %2022 = vmatprep.subr.bf16.mxu1 %v10875_v13  ;;  %v10959_v13 = vld [vmem:[#allocation3 + $0x2ac] ss:$16 sps:$4 sm:$0xff]  }
  0xec   : > { %1982 = vmatpush1.bf16.msra.mxu0 %v10870_v14  ;;  %v10954_v14 = vld [vmem:[#allocation3 + $0xa8] ss:$16 sps:$4 sm:$0xff]  }
  0xed   : > { %2023 = vmatpush1.bf16.msra.mxu1 %v10873_v15  ;;  %1983 = vmatprep.subr.bf16.mxu0 %v10878_v16  ;;  %v10957_v15 = vld [vmem:[#allocation3 + $0x2a8] ss:$16 sps:$4 sm:$0xff]   ;;  %v10962_v16 = vld [vmem:[#allocation3 + $0xcc] ss:$16 sps:$4 sm:$0xff]  }
  0xee   : > { %2024 = vmatprep.subr.bf16.mxu1 %v10881_v17  ;;  %v10965_v17 = vld [vmem:[#allocation3 + $0x2cc] ss:$16 sps:$4 sm:$0xff]  }
  0xf0   : > { %1984 = vmatpush1.bf16.msra.mxu0 %v10876_v18  ;;  %v10960_v18 = vld [vmem:[#allocation3 + $0xc8] ss:$16 sps:$4 sm:$0xff]  }
  0xf1   : > { %2025 = vmatpush1.bf16.msra.mxu1 %v10879_v19  ;;  %1985 = vmatprep.subr.bf16.mxu0 %v10884_v20  ;;  %v10963_v19 = vld [vmem:[#allocation3 + $0x2c8] ss:$16 sps:$4 sm:$0xff]   ;;  %v10968_v20 = vld [vmem:[#allocation3 + $0xec] ss:$16 sps:$4 sm:$0xff]  }
  0xf2   : > { %2026 = vmatprep.subr.bf16.mxu1 %v10887_v21  ;;  %v10971_v21 = vld [vmem:[#allocation3 + $0x2ec] ss:$16 sps:$4 sm:$0xff]  }
  0xf4   : > { %1986 = vmatpush1.bf16.msra.mxu0 %v10882_v22  ;;  %v10966_v22 = vld [vmem:[#allocation3 + $0xe8] ss:$16 sps:$4 sm:$0xff]  }
  0xf5   : > { %2027 = vmatpush1.bf16.msra.mxu1 %v10885_v23  ;;  %1987 = vmatprep.subr.bf16.mxu0 %v10890_v24  ;;  %v10969_v23 = vld [vmem:[#allocation3 + $0x2e8] ss:$16 sps:$4 sm:$0xff]   ;;  %v10974_v24 = vld [vmem:[#allocation3 + $0x10c] ss:$16 sps:$4 sm:$0xff]  }
  0xf6   : > { %2028 = vmatprep.subr.bf16.mxu1 %v10893_v25  ;;  %v10977_v25 = vld [vmem:[#allocation3 + $0x30c] ss:$16 sps:$4 sm:$0xff]  }
  0xf8   : > { %1988 = vmatpush1.bf16.msra.mxu0 %v10888_v26  ;;  %v10972_v26 = vld [vmem:[#allocation3 + $0x108] ss:$16 sps:$4 sm:$0xff]  }
  0xf9   : > { %2029 = vmatpush1.bf16.msra.mxu1 %v10891_v27  ;;  %1989 = vmatprep.subr.bf16.mxu0 %v10896_v28  ;;  %v10975_v27 = vld [vmem:[#allocation3 + $0x308] ss:$16 sps:$4 sm:$0xff]   ;;  %v10980_v28 = vld [vmem:[#allocation3 + $0x12c] ss:$16 sps:$4 sm:$0xff]  }
  0xfa   : > { %2030 = vmatprep.subr.bf16.mxu1 %v10899_v29  ;;  %v10983_v29 = vld [vmem:[#allocation3 + $0x32c] ss:$16 sps:$4 sm:$0xff]  }
  0xfc   : > { %1990 = vmatpush1.bf16.msra.mxu0 %v10894_v30  ;;  %v10978_v30 = vld [vmem:[#allocation3 + $0x128] ss:$16 sps:$4 sm:$0xff]  }
  0xfd   : > { %2031 = vmatpush1.bf16.msra.mxu1 %v10897_v31  ;;  %1991 = vmatprep.subr.bf16.mxu0 %v10902_v32  ;;  %v10981_v31 = vld [vmem:[#allocation3 + $0x328] ss:$16 sps:$4 sm:$0xff]   ;;  %v10986_v32 = vld [vmem:[#allocation3 + $0x14c] ss:$16 sps:$4 sm:$0xff]  }
  0xfe   : > { %2032 = vmatprep.subr.bf16.mxu1 %v10905_v33  ;;  %v10989_v33 = vld [vmem:[#allocation3 + $0x34c] ss:$16 sps:$4 sm:$0xff]  }
 0x100   : > { %1992 = vmatpush1.bf16.msra.mxu0 %v10900_v34  ;;  %v10984_v34 = vld [vmem:[#allocation3 + $0x148] ss:$16 sps:$4 sm:$0xff]  }
 0x101   : > { %2033 = vmatpush1.bf16.msra.mxu1 %v10903_v35  ;;  %1993 = vmatprep.subr.bf16.mxu0 %v10908_v38  ;;  %v10987_v35 = vld [vmem:[#allocation3 + $0x348] ss:$16 sps:$4 sm:$0xff]   ;;  %v10992_v38 = vld [vmem:[#allocation3 + $0x16c] ss:$16 sps:$4 sm:$0xff]  }
 0x102   : > { %2034 = vmatprep.subr.bf16.mxu1 %v10911_v39  ;;  %v10995_v39 = vld [vmem:[#allocation3 + $0x36c] ss:$16 sps:$4 sm:$0xff]  }
 0x104   : > { %1994 = vmatpush1.bf16.msra.mxu0 %v10906_v40  ;;  %v10990_v40 = vld [vmem:[#allocation3 + $0x168] ss:$16 sps:$4 sm:$0xff]  }
 0x105   : > { %2035 = vmatpush1.bf16.msra.mxu1 %v10909_v41  ;;  %1995 = vmatprep.subr.bf16.mxu0 %v10914_v42  ;;  %v10993_v41 = vld [vmem:[#allocation3 + $0x368] ss:$16 sps:$4 sm:$0xff]   ;;  %v10998_v42 = vld [vmem:[#allocation3 + $0x18c] ss:$16 sps:$4 sm:$0xff]  }
 0x106   : > { %2036 = vmatprep.subr.bf16.mxu1 %v10917_v43  ;;  %v11001_v43 = vld [vmem:[#allocation3 + $0x38c] ss:$16 sps:$4 sm:$0xff]  }
 0x108   : > { %1996 = vmatpush1.bf16.msra.mxu0 %v10912_v44  ;;  %v10996_v44 = vld [vmem:[#allocation3 + $0x188] ss:$16 sps:$4 sm:$0xff]  }
 0x109   : > { %2037 = vmatpush1.bf16.msra.mxu1 %v10915_v45  ;;  %1997 = vmatprep.subr.bf16.mxu0 %v10920_v46  ;;  %v10999_v45 = vld [vmem:[#allocation3 + $0x388] ss:$16 sps:$4 sm:$0xff]   ;;  %v11004_v46 = vld [vmem:[#allocation3 + $0x1ac] ss:$16 sps:$4 sm:$0xff]  }
 0x10a   : > { %2038 = vmatprep.subr.bf16.mxu1 %v10923_v47  ;;  %v11007_v47 = vld [vmem:[#allocation3 + $0x3ac] ss:$16 sps:$4 sm:$0xff]  }
 0x10c   : > { %1998 = vmatpush1.bf16.msra.mxu0 %v10918_v49  ;;  %v11002_v49 = vld [vmem:[#allocation3 + $0x1a8] ss:$16 sps:$4 sm:$0xff]  }
 0x10d   : > { %2039 = vmatpush1.bf16.msra.mxu1 %v10921_v50  ;;  %2049 = vmatprep.subr.bf16.mxu0 %v10926_v58  ;;  %v11005_v50 = vld [vmem:[#allocation3 + $0x3a8] ss:$16 sps:$4 sm:$0xff]   ;;  %v11010_v58 = vld [vmem:[#allocation3 + $0x1cc] ss:$16 sps:$4 sm:$0xff]  }
 0x10e   : > { %2090 = vmatprep.subr.bf16.mxu1 %v10929_v59  ;;  %v11013_v59 = vld [vmem:[#allocation3 + $0x3cc] ss:$16 sps:$4 sm:$0xff]  }
 0x10f   : > { %2000 = vmatmul.mubr.bf16.vlgmr.msra.gmra.mrb[8].mxu0 %v12694_v61 }
 0x110   : > { %2041 = vmatmul.mubr.bf16.vlgmr.msra.gmra.mrb[8].mxu1 %v12696_v52  ;;  %2050 = vmatpush1.bf16.msra.mxu0 %v10924_v62  ;;  %v11016_v62 = vld [vmem:[#allocation3 + $0x1ec] ss:$16 sps:$4 sm:$0xff]  }
 0x111   : > { %2091 = vmatpush1.bf16.msra.mxu1 %v10927_v36  ;;  %2051 = vmatprep.subr.bf16.mxu0 %v10932_v37  ;;  %v11019_v36 = vld [vmem:[#allocation3 + $0x3ec] ss:$16 sps:$4 sm:$0xff]   ;;  %v11014_v37 = vld [vmem:[#allocation3 + $0x1e8] ss:$16 sps:$4 sm:$0xff]  }
 0x112   : > { %2092 = vmatprep.subr.bf16.mxu1 %v10935_v63  ;;  %2081 = vmatprep.mubr.bf16.mxu0 %v12684_v54  ;;  %v10951_v54 = vld [vmem:[#allocation3 + $0x288] ss:$16 sps:$4 sm:$0xff]  }
 0x113   : > { %2122 = vmatprep.mubr.bf16.mxu1 %v12688_v56  ;;  %v10956_v56 = vld [vmem:[#allocation3 + $0xac] ss:$16 sps:$4 sm:$0xff]   ;;  %v11017_v63 = vld [vmem:[#allocation3 + $0x3e8] ss:$16 sps:$4 sm:$0xff]  }
 0x114   : > { %2052 = vmatpush1.bf16.msra.mxu0 %v10930_v0  ;;  %v2132_v0 = vld [vmem:[#allocation2 + $0x8] sm:$0xfc] }
 0x115   : > { %2093 = vmatpush1.bf16.msra.mxu1 %v10933_v1  ;;  %2053 = vmatprep.subr.bf16.mxu0 %v10938_v2  ;;  %v2136_v1 = vld [vmem:[#allocation2 + $0x28] sm:$0x3]  ;;  %v2134_v2 = vld [vmem:[#allocation2 + $0x18] sm:$0xfc] }
 0x116   : > { %2094 = vmatprep.subr.bf16.mxu1 %v10941_v3  ;;  %v2138_v3 = vld [vmem:[#allocation2 + $0x38] sm:$0x3] }
 0x118   : > { %2054 = vmatpush1.bf16.msra.mxu0 %v10936_v4  ;;  %v11022_v4 = vld [vmem:[#allocation3 + $0x804] ss:$16 sps:$4 sm:$0xff]  }
 0x119   : > { %2095 = vmatpush1.bf16.msra.mxu1 %v10939_v5  ;;  %2055 = vmatprep.subr.bf16.mxu0 %v10944_v6  ;;  %v11025_v5 = vld [vmem:[#allocation3 + $0xa04] ss:$16 sps:$4 sm:$0xff]   ;;  %v2140_v6 = vpack.c.bf16 %v2136_v1, %v2132_v0  ;;  %v11080_v0 = vld [vmem:[#allocation3 + $0x940] ss:$16 sps:$4 sm:$0xff]  }
 0x11a   : > { %2096 = vmatprep.subr.bf16.mxu1 %v10947_v7  ;;  %v2142_v7 = vpack.c.bf16 %v2138_v3, %v2134_v2  ;;  %v11083_v1 = vld [vmem:[#allocation3 + $0xb40] ss:$16 sps:$4 sm:$0xff]   ;;  %v11088_v2 = vld [vmem:[#allocation3 + $0x964] ss:$16 sps:$4 sm:$0xff]  }
 0x11b   : > { %v11091_v3 = vld [vmem:[#allocation3 + $0xb64] ss:$16 sps:$4 sm:$0xff]  }
 0x11c   : > { %2056 = vmatpush1.bf16.msra.mxu0 %v10942_v8  ;;  %v11020_v8 = vld [vmem:[#allocation3 + $0x800] ss:$16 sps:$4 sm:$0xff]  }
 0x11d   : > { %2097 = vmatpush1.bf16.msra.mxu1 %v10945_v9  ;;  %2057 = vmatprep.subr.bf16.mxu0 %v10950_v10  ;;  %v11023_v9 = vld [vmem:[#allocation3 + $0xa00] ss:$16 sps:$4 sm:$0xff]   ;;  %v11028_v10 = vld [vmem:[#allocation3 + $0x824] ss:$16 sps:$4 sm:$0xff]  }
 0x11e   : > { %2098 = vmatprep.subr.bf16.mxu1 %v10953_v11  ;;  %v11031_v11 = vld [vmem:[#allocation3 + $0xa24] ss:$16 sps:$4 sm:$0xff]  }
 0x120   : > { %2058 = vmatpush1.bf16.msra.mxu0 %v10948_v12  ;;  %v12702_v12 = vrot.slane %v2140_v6, 1  ;;  %v11094_v6 = vld [vmem:[#allocation3 + $0x984] ss:$16 sps:$4 sm:$0xff]  }
 0x121   : > { %2099 = vmatpush1.bf16.msra.mxu1 %v10951_v54  ;;  %2059 = vmatprep.subr.bf16.mxu0 %v10956_v56  ;;  %v12704_v54 = vrot.slane %v2142_v7, 1  ;;  %v11026_v56 = vld [vmem:[#allocation3 + $0x820] ss:$16 sps:$4 sm:$0xff]   ;;  %v11097_v7 = vld [vmem:[#allocation3 + $0xb84] ss:$16 sps:$4 sm:$0xff]  }
 0x122   : > { %2100 = vmatprep.subr.bf16.mxu1 %v10959_v13  ;;  %v11029_v13 = vld [vmem:[#allocation3 + $0xa20] ss:$16 sps:$4 sm:$0xff]  }
 0x124   : > { %2060 = vmatpush1.bf16.msra.mxu0 %v10954_v14  ;;  %v11034_v14 = vld [vmem:[#allocation3 + $0x844] ss:$16 sps:$4 sm:$0xff]  }
 0x125   : > { %2101 = vmatpush1.bf16.msra.mxu1 %v10957_v15  ;;  %2061 = vmatprep.subr.bf16.mxu0 %v10962_v16  ;;  %v11037_v15 = vld [vmem:[#allocation3 + $0xa44] ss:$16 sps:$4 sm:$0xff]   ;;  %v11032_v16 = vld [vmem:[#allocation3 + $0x840] ss:$16 sps:$4 sm:$0xff]  }
 0x126   : > { %2102 = vmatprep.subr.bf16.mxu1 %v10965_v17  ;;  %v11035_v17 = vld [vmem:[#allocation3 + $0xa40] ss:$16 sps:$4 sm:$0xff]  }
 0x128   : > { %2062 = vmatpush1.bf16.msra.mxu0 %v10960_v18  ;;  %v11040_v18 = vld [vmem:[#allocation3 + $0x864] ss:$16 sps:$4 sm:$0xff]  }
 0x129   : > { %2103 = vmatpush1.bf16.msra.mxu1 %v10963_v19  ;;  %2063 = vmatprep.subr.bf16.mxu0 %v10968_v20  ;;  %v11041_v19 = vld [vmem:[#allocation3 + $0xa60] ss:$16 sps:$4 sm:$0xff]   ;;  %v11046_v20 = vld [vmem:[#allocation3 + $0x884] ss:$16 sps:$4 sm:$0xff]  }
 0x12a   : > { %2104 = vmatprep.subr.bf16.mxu1 %v10971_v21  ;;  %v11049_v21 = vld [vmem:[#allocation3 + $0xa84] ss:$16 sps:$4 sm:$0xff]  }
 0x12c   : > { %2064 = vmatpush1.bf16.msra.mxu0 %v10966_v22  ;;  %v11044_v22 = vld [vmem:[#allocation3 + $0x880] ss:$16 sps:$4 sm:$0xff]  }
 0x12d   : > { %2105 = vmatpush1.bf16.msra.mxu1 %v10969_v23  ;;  %2065 = vmatprep.subr.bf16.mxu0 %v10974_v24  ;;  %v11047_v23 = vld [vmem:[#allocation3 + $0xa80] ss:$16 sps:$4 sm:$0xff]   ;;  %v11052_v24 = vld [vmem:[#allocation3 + $0x8a4] ss:$16 sps:$4 sm:$0xff]  }
 0x12e   : > { %2106 = vmatprep.subr.bf16.mxu1 %v10977_v25  ;;  %v11055_v25 = vld [vmem:[#allocation3 + $0xaa4] ss:$16 sps:$4 sm:$0xff]  }
 0x130   : > { %2066 = vmatpush1.bf16.msra.mxu0 %v10972_v26  ;;  %v11050_v26 = vld [vmem:[#allocation3 + $0x8a0] ss:$16 sps:$4 sm:$0xff]  }
 0x131   : > { %2107 = vmatpush1.bf16.msra.mxu1 %v10975_v27  ;;  %2067 = vmatprep.subr.bf16.mxu0 %v10980_v28  ;;  %v11053_v27 = vld [vmem:[#allocation3 + $0xaa0] ss:$16 sps:$4 sm:$0xff]   ;;  %v11058_v28 = vld [vmem:[#allocation3 + $0x8c4] ss:$16 sps:$4 sm:$0xff]  }
 0x132   : > { %2108 = vmatprep.subr.bf16.mxu1 %v10983_v29  ;;  %v11061_v29 = vld [vmem:[#allocation3 + $0xac4] ss:$16 sps:$4 sm:$0xff]  }
 0x134   : > { %2068 = vmatpush1.bf16.msra.mxu0 %v10978_v30 }
 0x135   : > { %2109 = vmatpush1.bf16.msra.mxu1 %v10981_v31  ;;  %2069 = vmatprep.subr.bf16.mxu0 %v10986_v32  ;;  %v11056_v32 = vld [vmem:[#allocation3 + $0x8c0] ss:$16 sps:$4 sm:$0xff]  }
 0x136   : > { %2110 = vmatprep.subr.bf16.mxu1 %v10989_v33  ;;  %v11059_v33 = vld [vmem:[#allocation3 + $0xac0] ss:$16 sps:$4 sm:$0xff]  }
 0x138   : > { %2070 = vmatpush1.bf16.msra.mxu0 %v10984_v34 }
 0x139   : > { %2111 = vmatpush1.bf16.msra.mxu1 %v10987_v35  ;;  %2071 = vmatprep.subr.bf16.mxu0 %v10992_v38 }
 0x13a   : > { %2112 = vmatprep.subr.bf16.mxu1 %v10995_v39  ;;  %v11064_v39 = vld [vmem:[#allocation3 + $0x8e4] ss:$16 sps:$4 sm:$0xff]  }
 0x13c   : > { %2072 = vmatpush1.bf16.msra.mxu0 %v10990_v40  ;;  %v11067_v40 = vld [vmem:[#allocation3 + $0xae4] ss:$16 sps:$4 sm:$0xff]  }
 0x13d   : > { %2113 = vmatpush1.bf16.msra.mxu1 %v10993_v41  ;;  %2073 = vmatprep.subr.bf16.mxu0 %v10998_v42 }
 0x13e   : > { %2114 = vmatprep.subr.bf16.mxu1 %v11001_v43 }
 0x140   : > { %2074 = vmatpush1.bf16.msra.mxu0 %v10996_v44 }
 0x141   : > { %2115 = vmatpush1.bf16.msra.mxu1 %v10999_v45  ;;  %2075 = vmatprep.subr.bf16.mxu0 %v11004_v46  ;;  %v11062_v46 = vld [vmem:[#allocation3 + $0x8e0] ss:$16 sps:$4 sm:$0xff]  }
 0x142   : > { %2116 = vmatprep.subr.bf16.mxu1 %v11007_v47  ;;  %v11065_v47 = vld [vmem:[#allocation3 + $0xae0] ss:$16 sps:$4 sm:$0xff]  }
 0x144   : > { %2076 = vmatpush1.bf16.msra.mxu0 %v11002_v49  ;;  %v11070_v49 = vld [vmem:[#allocation3 + $0x904] ss:$16 sps:$4 sm:$0xff]  }
 0x145   : > { %2117 = vmatpush1.bf16.msra.mxu1 %v11005_v50  ;;  %2077 = vmatprep.subr.bf16.mxu0 %v11010_v58  ;;  %v11073_v50 = vld [vmem:[#allocation3 + $0xb04] ss:$16 sps:$4 sm:$0xff]   ;;  %v11068_v58 = vld [vmem:[#allocation3 + $0x900] ss:$16 sps:$4 sm:$0xff]  }
 0x146   : > { %2118 = vmatprep.subr.bf16.mxu1 %v11013_v59  ;;  %v11071_v59 = vld [vmem:[#allocation3 + $0xb00] ss:$16 sps:$4 sm:$0xff]  }
 0x148   : > { %2078 = vmatpush1.bf16.msra.mxu0 %v11008_v60  ;;  %v11076_v60 = vld [vmem:[#allocation3 + $0x924] ss:$16 sps:$4 sm:$0xff]  }
 0x149   : > { %2119 = vmatpush1.bf16.msra.mxu1 %v11011_v48  ;;  %2079 = vmatprep.subr.bf16.mxu0 %v11016_v62  ;;  %v11079_v48 = vld [vmem:[#allocation3 + $0xb24] ss:$16 sps:$4 sm:$0xff]   ;;  %v11074_v62 = vld [vmem:[#allocation3 + $0x920] ss:$16 sps:$4 sm:$0xff]  }
 0x14a   : > { %2120 = vmatprep.subr.bf16.mxu1 %v11019_v36  ;;  %v11077_v36 = vld [vmem:[#allocation3 + $0xb20] ss:$16 sps:$4 sm:$0xff]  }
 0x14c   : > { %2080 = vmatpush1.bf16.msra.mxu0 %v11014_v37  ;;  %v11082_v37 = vld [vmem:[#allocation3 + $0x944] ss:$16 sps:$4 sm:$0xff]  }
 0x14d   : > { %2121 = vmatpush1.bf16.msra.mxu1 %v11017_v63  ;;  %2924 = vmatprep.subr.bf16.mxu0 %v11022_v4  ;;  %v11085_v63 = vld [vmem:[#allocation3 + $0xb44] ss:$16 sps:$4 sm:$0xff]   ;;  %v11086_v4 = vld [vmem:[#allocation3 + $0x960] ss:$16 sps:$4 sm:$0xff]  }
 0x14e   : > { %2965 = vmatprep.subr.bf16.mxu1 %v11025_v5  ;;  %v11089_v5 = vld [vmem:[#allocation3 + $0xb60] ss:$16 sps:$4 sm:$0xff]  }
 0x14f   : > { %2082 = vmatmul.mubr.bf16.vlgmr.msra.gmra.mrb[12].mxu0 %v12694_v61  ;;  %v11043_v61 = vld [vmem:[#allocation3 + $0xa64] ss:$16 sps:$4 sm:$0xff]  }
 0x150   : > { %2123 = vmatmul.mubr.bf16.vlgmr.msra.gmra.mrb[12].mxu1 %v12696_v52  ;;  %2925 = vmatpush1.bf16.msra.mxu0 %v11020_v8  ;;  %v11038_v52 = vld [vmem:[#allocation3 + $0x860] ss:$16 sps:$4 sm:$0xff]  }
 0x151   : > { %2966 = vmatpush1.bf16.msra.mxu1 %v11023_v9  ;;  %2926 = vmatprep.subr.bf16.mxu0 %v11028_v10  ;;  %v11092_v8 = vld [vmem:[#allocation3 + $0x980] ss:$16 sps:$4 sm:$0xff]   ;;  %v11100_v10 = vld [vmem:[#allocation3 + $0x9a4] ss:$16 sps:$4 sm:$0xff]  }
 0x152   : > { %2967 = vmatprep.subr.bf16.mxu1 %v11031_v11  ;;  %2956 = vmatprep.mubr.bf16.mxu0 %v12702_v12  ;;  %v11095_v9 = vld [vmem:[#allocation3 + $0xb80] ss:$16 sps:$4 sm:$0xff]   ;;  %v11103_v11 = vld [vmem:[#allocation3 + $0xba4] ss:$16 sps:$4 sm:$0xff]  }
 0x153   : > { %2997 = vmatprep.mubr.bf16.mxu1 %v12704_v54 }
 0x154   : > { %2927 = vmatpush1.bf16.msra.mxu0 %v11026_v56  ;;  %v11098_v56 = vld [vmem:[#allocation3 + $0x9a0] ss:$16 sps:$4 sm:$0xff]  }
 0x155   : > { %2968 = vmatpush1.bf16.msra.mxu1 %v11029_v13  ;;  %2928 = vmatprep.subr.bf16.mxu0 %v11034_v14  ;;  %v11101_v13 = vld [vmem:[#allocation3 + $0xba0] ss:$16 sps:$4 sm:$0xff]   ;;  %v11106_v14 = vld [vmem:[#allocation3 + $0x9c4] ss:$16 sps:$4 sm:$0xff]  }
 0x156   : > { %2969 = vmatprep.subr.bf16.mxu1 %v11037_v15  ;;  %v11109_v15 = vld [vmem:[#allocation3 + $0xbc4] ss:$16 sps:$4 sm:$0xff]  }
 0x158   : > { %2929 = vmatpush1.bf16.msra.mxu0 %v11032_v16  ;;  %v11104_v16 = vld [vmem:[#allocation3 + $0x9c0] ss:$16 sps:$4 sm:$0xff]  }
 0x159   : > { %2970 = vmatpush1.bf16.msra.mxu1 %v11035_v17  ;;  %2930 = vmatprep.subr.bf16.mxu0 %v11040_v18  ;;  %v11107_v17 = vld [vmem:[#allocation3 + $0xbc0] ss:$16 sps:$4 sm:$0xff]  }
 0x15a   : > { %2971 = vmatprep.subr.bf16.mxu1 %v11043_v61  ;;  %v2131_v18 = vld [vmem:[#allocation2] sm:$0xfc]  ;;  %v2135_v61 = vld [vmem:[#allocation2 + $0x20] sm:$0x3] }
 0x15c   : > { %2931 = vmatpush1.bf16.msra.mxu0 %v11038_v52  ;;  %v2133_v52 = vld [vmem:[#allocation2 + $0x10] sm:$0xfc] }
 0x15d   : > { %2972 = vmatpush1.bf16.msra.mxu1 %v11041_v19  ;;  %2932 = vmatprep.subr.bf16.mxu0 %v11046_v20  ;;  %v2137_v19 = vld [vmem:[#allocation2 + $0x30] sm:$0x3]  ;;  %v11112_v20 = vld [vmem:[#allocation3 + $0x9e4] ss:$16 sps:$4 sm:$0xff]  }
 0x15e   : > { %2973 = vmatprep.subr.bf16.mxu1 %v11049_v21  ;;  %v11115_v21 = vld [vmem:[#allocation3 + $0xbe4] ss:$16 sps:$4 sm:$0xff]  }
 0x160   : > { %2933 = vmatpush1.bf16.msra.mxu0 %v11044_v22  ;;  %v11110_v22 = vld [vmem:[#allocation3 + $0x9e0] ss:$16 sps:$4 sm:$0xff]  }
 0x161   : > { %2974 = vmatpush1.bf16.msra.mxu1 %v11047_v23  ;;  %2934 = vmatprep.subr.bf16.mxu0 %v11052_v24  ;;  %v11113_v23 = vld [vmem:[#allocation3 + $0xbe0] ss:$16 sps:$4 sm:$0xff]   ;;  %v2139_v24 = vpack.c.bf16 %v2135_v61, %v2131_v18  ;;  %v11172_v18 = vld [vmem:[#allocation3 + $0x92c] ss:$16 sps:$4 sm:$0xff]  }
 0x162   : > { %2975 = vmatprep.subr.bf16.mxu1 %v11055_v25  ;;  %v1197_v30 = vpop.f32.mrb[0].mxu0  ;;  %v2141_v25 = vpack.c.bf16 %v2137_v19, %v2133_v52  ;;  %v11175_v61 = vld [vmem:[#allocation3 + $0xb2c] ss:$16 sps:$4 sm:$0xff]   ;;  %v11170_v52 = vld [vmem:[#allocation3 + $0x928] ss:$16 sps:$4 sm:$0xff]  }
 0x163   : > { %v1238_v31 = vpop.f32.mrb[0].mxu1  ;;  %v1199_v35 = vpop.f32.mrb[1].mxu0  ;;  %v11173_v19 = vld [vmem:[#allocation3 + $0xb28] ss:$16 sps:$4 sm:$0xff]  }
 0x164   : > { %v12710_v34 = vadd.f32 %v1238_v31, %v1197_v30  ;;  %v1240_v38 = vpop.f32.mrb[1].mxu1  ;;  %v1201_v42 = vpop.f32.mrb[2].mxu0  ;;  %2935 = vmatpush1.bf16.msra.mxu0 %v11050_v26  ;;  %v11118_v26 = vld [vmem:[#allocation3 + $0x80c] ss:$16 sps:$4 sm:$0xff]   ;;  %v12714_v30 = vrot.slane %v2139_v24, 1  ;;  %v12716_v31 = vrot.slane %v2141_v25, 1 }
 0x165   : > { %v12712_v41 = vadd.f32 %v1240_v38, %v1199_v35  ;;  %v1242_v43 = vpop.f32.mrb[2].mxu1  ;;  %2976 = vmatpush1.bf16.msra.mxu1 %v11053_v27  ;;  %v1202_v44 = vpop.f32.mrb[3].mxu0  ;;  %2936 = vmatprep.subr.bf16.mxu0 %v11058_v28  ;;  %v11121_v27 = vld [vmem:[#allocation3 + $0xa0c] ss:$16 sps:$4 sm:$0xff]   ;;  %v11116_v28 = vld [vmem:[#allocation3 + $0x808] ss:$16 sps:$4 sm:$0xff]  }
 0x166   : > { %v1243_v45 = vpop.f32.mrb[3].mxu1  ;;  %2977 = vmatprep.subr.bf16.mxu1 %v11061_v29  ;;  %v11119_v29 = vld [vmem:[#allocation3 + $0xa08] ss:$16 sps:$4 sm:$0xff]   ;;  %v11136_v44 = vld [vmem:[#allocation3 + $0x86c] ss:$16 sps:$4 sm:$0xff]  }
 0x167   : > { %v11122_v35 = vld [vmem:[#allocation3 + $0x828] ss:$16 sps:$4 sm:$0xff]   ;;  %v11139_v45 = vld [vmem:[#allocation3 + $0xa6c] ss:$16 sps:$4 sm:$0xff]  }
 0x168   : > { %2937 = vmatpush1.bf16.msra.mxu0 %v11056_v32  ;;  %v11124_v32 = vld [vmem:[#allocation3 + $0x82c] ss:$16 sps:$4 sm:$0xff]   ;;  %v11125_v38 = vld [vmem:[#allocation3 + $0xa28] ss:$16 sps:$4 sm:$0xff]  }
 0x169   : > { %2978 = vmatpush1.bf16.msra.mxu1 %v11059_v33  ;;  %2938 = vmatprep.subr.bf16.mxu0 %v11064_v39  ;;  %v11127_v33 = vld [vmem:[#allocation3 + $0xa2c] ss:$16 sps:$4 sm:$0xff]   ;;  %v11128_v42 = vld [vmem:[#allocation3 + $0x848] ss:$16 sps:$4 sm:$0xff]  }
 0x16a   : > { %2979 = vmatprep.subr.bf16.mxu1 %v11067_v40  ;;  %v11130_v39 = vld [vmem:[#allocation3 + $0x84c] ss:$16 sps:$4 sm:$0xff]   ;;  %v11131_v43 = vld [vmem:[#allocation3 + $0xa48] ss:$16 sps:$4 sm:$0xff]  }
 0x16b   : > { %v11133_v40 = vld [vmem:[#allocation3 + $0xa4c] ss:$16 sps:$4 sm:$0xff]  }
 0x16c   : > { %2939 = vmatpush1.bf16.msra.mxu0 %v11062_v46  ;;  %v11134_v46 = vld [vmem:[#allocation3 + $0x868] ss:$16 sps:$4 sm:$0xff]   ;;  %v11184_v24 = vld [vmem:[#allocation3 + $0x96c] ss:$16 sps:$4 sm:$0xff]  }
 0x16d   : > { %2980 = vmatpush1.bf16.msra.mxu1 %v11065_v47  ;;  %2940 = vmatprep.subr.bf16.mxu0 %v11070_v49  ;;  %v11137_v47 = vld [vmem:[#allocation3 + $0xa68] ss:$16 sps:$4 sm:$0xff]   ;;  %v11142_v49 = vld [vmem:[#allocation3 + $0x88c] ss:$16 sps:$4 sm:$0xff]  }
 0x16e   : > { %2981 = vmatprep.subr.bf16.mxu1 %v11073_v50  ;;  %v11145_v50 = vld [vmem:[#allocation3 + $0xa8c] ss:$16 sps:$4 sm:$0xff]  }
 0x16f   : > { %v11187_v25 = vld [vmem:[#allocation3 + $0xb6c] ss:$16 sps:$4 sm:$0xff]  }
 0x170   : > { %2941 = vmatpush1.bf16.msra.mxu0 %v11068_v58  ;;  %v11140_v58 = vld [vmem:[#allocation3 + $0x888] ss:$16 sps:$4 sm:$0xff]  }
 0x171   : > { %2982 = vmatpush1.bf16.msra.mxu1 %v11071_v59  ;;  %2942 = vmatprep.subr.bf16.mxu0 %v11076_v60  ;;  %v11143_v59 = vld [vmem:[#allocation3 + $0xa88] ss:$16 sps:$4 sm:$0xff]   ;;  %v11148_v60 = vld [vmem:[#allocation3 + $0x8ac] ss:$16 sps:$4 sm:$0xff]  }
 0x172   : > { %2983 = vmatprep.subr.bf16.mxu1 %v11079_v48  ;;  %v11149_v48 = vld [vmem:[#allocation3 + $0xaa8] ss:$16 sps:$4 sm:$0xff]  }
 0x174   : > { %2943 = vmatpush1.bf16.msra.mxu0 %v11074_v62  ;;  %v11154_v62 = vld [vmem:[#allocation3 + $0x8cc] ss:$16 sps:$4 sm:$0xff]  }
 0x175   : > { %2984 = vmatpush1.bf16.msra.mxu1 %v11077_v36  ;;  %2944 = vmatprep.subr.bf16.mxu0 %v11082_v37  ;;  %v11157_v36 = vld [vmem:[#allocation3 + $0xacc] ss:$16 sps:$4 sm:$0xff]  }
 0x176   : > { %2985 = vmatprep.subr.bf16.mxu1 %v11085_v63 }
 0x178   : > { %2945 = vmatpush1.bf16.msra.mxu0 %v11080_v0  ;;  %v11152_v0 = vld [vmem:[#allocation3 + $0x8c8] ss:$16 sps:$4 sm:$0xff]  }
 0x179   : > { %2986 = vmatpush1.bf16.msra.mxu1 %v11083_v1  ;;  %2946 = vmatprep.subr.bf16.mxu0 %v11088_v2  ;;  %v11155_v1 = vld [vmem:[#allocation3 + $0xac8] ss:$16 sps:$4 sm:$0xff]  }
 0x17a   : > { %2987 = vmatprep.subr.bf16.mxu1 %v11091_v3 }
 0x17c   : > { %2947 = vmatpush1.bf16.msra.mxu0 %v11086_v4 }
 0x17d   : > { %2988 = vmatpush1.bf16.msra.mxu1 %v11089_v5  ;;  %2948 = vmatprep.subr.bf16.mxu0 %v11094_v6  ;;  %v11160_v5 = vld [vmem:[#allocation3 + $0x8ec] ss:$16 sps:$4 sm:$0xff]  }
 0x17e   : > { %2989 = vmatprep.subr.bf16.mxu1 %v11097_v7  ;;  %v11163_v6 = vld [vmem:[#allocation3 + $0xaec] ss:$16 sps:$4 sm:$0xff]  }
 0x180   : > { %2949 = vmatpush1.bf16.msra.mxu0 %v11092_v8 }
 0x181   : > { %2990 = vmatpush1.bf16.msra.mxu1 %v11095_v9  ;;  %2950 = vmatprep.subr.bf16.mxu0 %v11100_v10 }
 0x182   : > { %2991 = vmatprep.subr.bf16.mxu1 %v11103_v11 }
 0x184   : > { %2951 = vmatpush1.bf16.msra.mxu0 %v11098_v56  ;;  %v11158_v56 = vld [vmem:[#allocation3 + $0x8e8] ss:$16 sps:$4 sm:$0xff]  }
 0x185   : > { %2992 = vmatpush1.bf16.msra.mxu1 %v11101_v13  ;;  %2952 = vmatprep.subr.bf16.mxu0 %v11106_v14  ;;  %v11161_v13 = vld [vmem:[#allocation3 + $0xae8] ss:$16 sps:$4 sm:$0xff]   ;;  %v11166_v14 = vld [vmem:[#allocation3 + $0x90c] ss:$16 sps:$4 sm:$0xff]  }
 0x186   : > { %2993 = vmatprep.subr.bf16.mxu1 %v11109_v15  ;;  %v11169_v15 = vld [vmem:[#allocation3 + $0xb0c] ss:$16 sps:$4 sm:$0xff]  }
 0x188   : > { %2953 = vmatpush1.bf16.msra.mxu0 %v11104_v16  ;;  %v11164_v16 = vld [vmem:[#allocation3 + $0x908] ss:$16 sps:$4 sm:$0xff]  }
 0x189   : > { %2994 = vmatpush1.bf16.msra.mxu1 %v11107_v17  ;;  %2954 = vmatprep.subr.bf16.mxu0 %v11112_v20  ;;  %v11167_v17 = vld [vmem:[#allocation3 + $0xb08] ss:$16 sps:$4 sm:$0xff]   ;;  %v11178_v20 = vld [vmem:[#allocation3 + $0x94c] ss:$16 sps:$4 sm:$0xff]  }
 0x18a   : > { %2995 = vmatprep.subr.bf16.mxu1 %v11115_v21  ;;  %v11181_v21 = vld [vmem:[#allocation3 + $0xb4c] ss:$16 sps:$4 sm:$0xff]  }
 0x18c   : > { %2955 = vmatpush1.bf16.msra.mxu0 %v11110_v22  ;;  %v11176_v22 = vld [vmem:[#allocation3 + $0x948] ss:$16 sps:$4 sm:$0xff]  }
 0x18d   : > { %2996 = vmatpush1.bf16.msra.mxu1 %v11113_v23  ;;  %3006 = vmatprep.subr.bf16.mxu0 %v11118_v26  ;;  %v11179_v23 = vld [vmem:[#allocation3 + $0xb48] ss:$16 sps:$4 sm:$0xff]  }
 0x18e   : > { %3047 = vmatprep.subr.bf16.mxu1 %v11121_v27  ;;  %v11182_v26 = vld [vmem:[#allocation3 + $0x968] ss:$16 sps:$4 sm:$0xff]  }
 0x18f   : > { %2957 = vmatmul.mubr.bf16.vlgmr.msra.gmra.mrb[16].mxu0 %v12714_v30  ;;  %v11185_v27 = vld [vmem:[#allocation3 + $0xb68] ss:$16 sps:$4 sm:$0xff]  }
 0x190   : > { %2998 = vmatmul.mubr.bf16.vlgmr.msra.gmra.mrb[16].mxu1 %v12716_v31  ;;  %3007 = vmatpush1.bf16.msra.mxu0 %v11116_v28  ;;  %v11190_v28 = vld [vmem:[#allocation3 + $0x98c] ss:$16 sps:$4 sm:$0xff]  }
 0x191   : > { %3048 = vmatpush1.bf16.msra.mxu1 %v11119_v29  ;;  %3008 = vmatprep.subr.bf16.mxu0 %v11124_v32  ;;  %v11193_v29 = vld [vmem:[#allocation3 + $0xb8c] ss:$16 sps:$4 sm:$0xff]   ;;  %v11188_v32 = vld [vmem:[#allocation3 + $0x988] ss:$16 sps:$4 sm:$0xff]  }
 0x192   : > { %3049 = vmatprep.subr.bf16.mxu1 %v11127_v33  ;;  %3038 = vmatprep.mubr.bf16.mxu0 %v12702_v12  ;;  %v11151_v12 = vld [vmem:[#allocation3 + $0xaac] ss:$16 sps:$4 sm:$0xff]   ;;  %v11191_v33 = vld [vmem:[#allocation3 + $0xb88] ss:$16 sps:$4 sm:$0xff]  }
 0x193   : > { %3079 = vmatprep.mubr.bf16.mxu1 %v12704_v54  ;;  %v11146_v54 = vld [vmem:[#allocation3 + $0x8a8] ss:$16 sps:$4 sm:$0xff]  }
 0x194   : > { %3009 = vmatpush1.bf16.msra.mxu0 %v11122_v35  ;;  %v11196_v35 = vld [vmem:[#allocation3 + $0x9ac] ss:$16 sps:$4 sm:$0xff]  }
 0x195   : > { %3050 = vmatpush1.bf16.msra.mxu1 %v11125_v38  ;;  %3010 = vmatprep.subr.bf16.mxu0 %v11130_v39  ;;  %v11199_v38 = vld [vmem:[#allocation3 + $0xbac] ss:$16 sps:$4 sm:$0xff]   ;;  %v11194_v39 = vld [vmem:[#allocation3 + $0x9a8] ss:$16 sps:$4 sm:$0xff]  }
 0x196   : > { %3051 = vmatprep.subr.bf16.mxu1 %v11133_v40  ;;  %v11197_v40 = vld [vmem:[#allocation3 + $0xba8] ss:$16 sps:$4 sm:$0xff]  }
 0x198   : > { %3011 = vmatpush1.bf16.msra.mxu0 %v11128_v42  ;;  %v11202_v42 = vld [vmem:[#allocation3 + $0x9cc] ss:$16 sps:$4 sm:$0xff]  }
 0x199   : > { %3052 = vmatpush1.bf16.msra.mxu1 %v11131_v43  ;;  %3012 = vmatprep.subr.bf16.mxu0 %v11136_v44  ;;  %v11205_v43 = vld [vmem:[#allocation3 + $0xbcc] ss:$16 sps:$4 sm:$0xff]   ;;  %v11200_v44 = vld [vmem:[#allocation3 + $0x9c8] ss:$16 sps:$4 sm:$0xff]  }
 0x19a   : > { %3053 = vmatprep.subr.bf16.mxu1 %v11139_v45  ;;  %v11203_v45 = vld [vmem:[#allocation3 + $0xbc8] ss:$16 sps:$4 sm:$0xff]  }
 0x19c   : > { %3013 = vmatpush1.bf16.msra.mxu0 %v11134_v46  ;;  %v11208_v46 = vld [vmem:[#allocation3 + $0x9ec] ss:$16 sps:$4 sm:$0xff]  }
 0x19d   : > { %3054 = vmatpush1.bf16.msra.mxu1 %v11137_v47  ;;  %3014 = vmatprep.subr.bf16.mxu0 %v11142_v49  ;;  %v11211_v47 = vld [vmem:[#allocation3 + $0xbec] ss:$16 sps:$4 sm:$0xff]   ;;  %v11206_v49 = vld [vmem:[#allocation3 + $0x9e8] ss:$16 sps:$4 sm:$0xff]  }
 0x19e   : > { %3055 = vmatprep.subr.bf16.mxu1 %v11145_v50  ;;  %v11209_v50 = vld [vmem:[#allocation3 + $0xbe8] ss:$16 sps:$4 sm:$0xff]  }
 0x1a0   : > { %3015 = vmatpush1.bf16.msra.mxu0 %v11140_v58 }
 0x1a1   : > { %3056 = vmatpush1.bf16.msra.mxu1 %v11143_v59  ;;  %3016 = vmatprep.subr.bf16.mxu0 %v11148_v60 }
 0x1a2   : > { %3057 = vmatprep.subr.bf16.mxu1 %v11151_v12  ;;  %v1279_v37 = vpop.f32.mrb[4].mxu0 }
 0x1a3   : > { %v1320_v63 = vpop.f32.mrb[4].mxu1  ;;  %v1281_v3 = vpop.f32.mrb[5].mxu0 }
 0x1a4   : > { %v12722_v2 = vadd.f32 %v1320_v63, %v1279_v37  ;;  %v1322_v4 = vpop.f32.mrb[5].mxu1  ;;  %v1283_v8 = vpop.f32.mrb[6].mxu0  ;;  %3017 = vmatpush1.bf16.msra.mxu0 %v11146_v54 }
 0x1a5   : > { %v12724_v7 = vadd.f32 %v1322_v4, %v1281_v3  ;;  %v1324_v9 = vpop.f32.mrb[6].mxu1  ;;  %3058 = vmatpush1.bf16.msra.mxu1 %v11149_v48  ;;  %v1284_v10 = vpop.f32.mrb[7].mxu0  ;;  %3018 = vmatprep.subr.bf16.mxu0 %v11154_v62 }
 0x1a6   : > { %v1325_v11 = vpop.f32.mrb[7].mxu1  ;;  %3059 = vmatprep.subr.bf16.mxu1 %v11157_v36 }
 0x1a8   : > { %3019 = vmatpush1.bf16.msra.mxu0 %v11152_v0 }
 0x1a9   : > { %3060 = vmatpush1.bf16.msra.mxu1 %v11155_v1  ;;  %3020 = vmatprep.subr.bf16.mxu0 %v11160_v5 }
 0x1aa   : > { %3061 = vmatprep.subr.bf16.mxu1 %v11163_v6 }
 0x1ac   : > { %3021 = vmatpush1.bf16.msra.mxu0 %v11158_v56 }
 0x1ad   : > { %3062 = vmatpush1.bf16.msra.mxu1 %v11161_v13  ;;  %3022 = vmatprep.subr.bf16.mxu0 %v11166_v14 }
 0x1ae   : > { %3063 = vmatprep.subr.bf16.mxu1 %v11169_v15 }
 0x1b0   : > { %3023 = vmatpush1.bf16.msra.mxu0 %v11164_v16 }
 0x1b1   : > { %3064 = vmatpush1.bf16.msra.mxu1 %v11167_v17  ;;  %3024 = vmatprep.subr.bf16.mxu0 %v11172_v18 }
 0x1b2   : > { %3065 = vmatprep.subr.bf16.mxu1 %v11175_v61 }
 0x1b4   : > { %3025 = vmatpush1.bf16.msra.mxu0 %v11170_v52 }
 0x1b5   : > { %3066 = vmatpush1.bf16.msra.mxu1 %v11173_v19  ;;  %3026 = vmatprep.subr.bf16.mxu0 %v11178_v20 }
 0x1b6   : > { %3067 = vmatprep.subr.bf16.mxu1 %v11181_v21  ;;  %v3093_v21 = vlaneseq }
 0x1b8   : > { %3027 = vmatpush1.bf16.msra.mxu0 %v11176_v22 }
 0x1b9   : > { %3068 = vmatpush1.bf16.msra.mxu1 %v11179_v23  ;;  %3028 = vmatprep.subr.bf16.mxu0 %v11184_v24  ;;  %v213_v24 = vld [vmem:[#allocation6] sm:$0xf] }
 0x1ba   : > { %3069 = vmatprep.subr.bf16.mxu1 %v11187_v25 }
 0x1bc   : > { %3029 = vmatpush1.bf16.msra.mxu0 %v11182_v26 }
 0x1bd   : > { %3070 = vmatpush1.bf16.msra.mxu1 %v11185_v27  ;;  %3030 = vmatprep.subr.bf16.mxu0 %v11190_v28 }
 0x1be   : > { %3071 = vmatprep.subr.bf16.mxu1 %v11193_v29 }
 0x1c0   : > { %3031 = vmatpush1.bf16.msra.mxu0 %v11188_v32 }
 0x1c1   : > { %3072 = vmatpush1.bf16.msra.mxu1 %v11191_v33  ;;  %3032 = vmatprep.subr.bf16.mxu0 %v11196_v35 }
 0x1c2   : > { %3073 = vmatprep.subr.bf16.mxu1 %v11199_v38 }
 0x1c4   : > { %3033 = vmatpush1.bf16.msra.mxu0 %v11194_v39 }
 0x1c5   : > { %3074 = vmatpush1.bf16.msra.mxu1 %v11197_v40  ;;  %3034 = vmatprep.subr.bf16.mxu0 %v11202_v42 }
 0x1c6   : > { %3075 = vmatprep.subr.bf16.mxu1 %v11205_v43 }
 0x1c8   : > { %3035 = vmatpush1.bf16.msra.mxu0 %v11200_v44 }
 0x1c9   : > { %3076 = vmatpush1.bf16.msra.mxu1 %v11203_v45  ;;  %3036 = vmatprep.subr.bf16.mxu0 %v11208_v46 }
 0x1ca   : > { %3077 = vmatprep.subr.bf16.mxu1 %v11211_v47 }
 0x1cc   : > { %3037 = vmatpush1.bf16.msra.mxu0 %v11206_v49 }
 0x1cd   : > { %3078 = vmatpush1.bf16.msra.mxu1 %v11209_v50 }
 0x1cf   : > { %3039 = vmatmul.mubr.bf16.vlgmr.msra.gmra.mrb[20].mxu0 %v12714_v30 }
 0x1d0   : > { %3080 = vmatmul.mubr.bf16.vlgmr.msra.gmra.mrb[20].mxu1 %v12716_v31 }
 0x1e2   : > { %v2001_v58 = vpop.f32.mrb[8].mxu0 }
 0x1e3   : > { %v2042_v59 = vpop.f32.mrb[8].mxu1  ;;  %v2002_v60 = vadd.f32 %v2001_v58, %v12710_v34  ;;  %v2003_v12 = vpop.f32.mrb[9].mxu0 }
 0x1e4   : > { %v2044_v54 = vpop.f32.mrb[9].mxu1  ;;  %v2004_v48 = vadd.f32 %v2003_v12, %v12712_v41  ;;  %v2005_v62 = vpop.f32.mrb[10].mxu0 }
 0x1e5   : > { %v2046_v36 = vpop.f32.mrb[10].mxu1  ;;  %v2043_v37 = vadd.f32 %v2042_v59, %v2002_v60  ;;  %v2006_v63 = vpop.f32.mrb[11].mxu0 }
 0x1e6   : > { %v2047_v0 = vpop.f32.mrb[11].mxu1  ;;  %v2045_v1 = vadd.f32 %v2044_v54, %v2004_v48 }
 0x222   : > { %v2083_v3 = vpop.f32.mrb[12].mxu0 }
 0x223   : > { %v2124_v4 = vpop.f32.mrb[12].mxu1  ;;  %v2084_v30 = vadd.f32 %v2083_v3, %v12722_v2  ;;  %v2085_v5 = vpop.f32.mrb[13].mxu0 }
 0x224   : > { %v2126_v31 = vpop.f32.mrb[13].mxu1  ;;  %v2086_v6 = vadd.f32 %v2085_v5, %v12724_v7  ;;  %v2087_v8 = vpop.f32.mrb[14].mxu0  ;;  %v3094_v7 = vshrl.u32 %v3093_v21, 7 }
 0x225   : > { %v2128_v34 = vpop.f32.mrb[14].mxu1  ;;  %v2125_v9 = vadd.f32 %v2124_v4, %v2084_v30  ;;  %v2088_v10 = vpop.f32.mrb[15].mxu0 }
 0x226   : > { %v2129_v11 = vpop.f32.mrb[15].mxu1  ;;  %v2127_v41 = vadd.f32 %v2126_v31, %v2086_v6  ;;  %v12732_v22 = vsub.s32 0, %v3094_v7  ;;  %v3099_v23 = vsub.s32 1, %v3094_v7  ;;  %v3103_v33 = vsub.s32 2, %v3094_v7 }
 0x227   : > { %v3107_v38 = vsub.s32 3, %v3094_v7 }
 0x228   : > { %v12735_v25 = vrot.slane %v213_v24, %v12732_v22  ;;  %v12737_v26 = vrot.slane %v213_v24, %v3099_v23  ;;  %v12751_v46 = vrot.slane %v213_v24, %v3103_v33 }
 0x229   : > { %v12754_v59 = vrot.slane %v213_v24, %v3107_v38 }
 0x262   : > { %v2958_v56 = vpop.f32.mrb[16].mxu0 }
 0x263   : > { %v2999_v13 = vpop.f32.mrb[16].mxu1  ;;  %v2960_v15 = vpop.f32.mrb[17].mxu0 }
 0x264   : > { %v3000_v14 = vadd.f32 %v2999_v13, %v2958_v56  ;;  %v3001_v16 = vpop.f32.mrb[17].mxu1  ;;  %v2962_v18 = vpop.f32.mrb[18].mxu0 }
 0x265   : > { %v3002_v17 = vadd.f32 %v3001_v16, %v2960_v15  ;;  %v3003_v61 = vpop.f32.mrb[18].mxu1  ;;  %v2963_v2 = vpop.f32.mrb[19].mxu0 }
 0x266   : > { %v3088_v52 = vadd.f32 %v3000_v14, %v2043_v37  ;;  %v3004_v19 = vpop.f32.mrb[19].mxu1 }
 0x267   : > { %v3089_v20 = vadd.f32 %v3002_v17, %v2045_v1 }
 0x268   : > { %v12740_v27 = vadd.f32 %v12735_v25, %v3088_v52 }
 0x269   : > { %v12743_v28 = vadd.f32 %v12737_v26, %v3089_v20 }
 0x26a   : > { %v3141_v29 = vmul.f32 %v12740_v27, %v12740_v27  ;;  %v3117_v35 = vrot.slane %v12740_v27, 4 }
 0x26b   : > { %v3142_v32 = vmul.f32 %v12743_v28, %v12743_v28  ;;  %v3123_v39 = vrot.slane %v12743_v28, 4 }
 0x26c   : > { %v3145_v43 = vrot.slane %v3141_v29, 4  ;;  %v3118_v50 = vadd.f32 %v3117_v35, %v12740_v27 }
 0x26d   : > { %v3151_v44 = vrot.slane %v3142_v32, 4  ;;  %v3124_v54 = vadd.f32 %v3123_v39, %v12743_v28 }
 0x26e   : > { %v3146_v63 = vadd.f32 %v3145_v43, %v3141_v29  ;;  %v3119_v3 = vrot.slane %v3118_v50, 2 }
 0x26f   : > { %v3152_v0 = vadd.f32 %v3151_v44, %v3142_v32  ;;  %v3125_v30 = vrot.slane %v3124_v54, 2 }
 0x270   : > { %v3147_v34 = vrot.slane %v3146_v63, 2  ;;  %v3120_v10 = vadd.f32 %v3119_v3, %v3118_v50 }
 0x271   : > { %v3126_v56 = vadd.f32 %v3125_v30, %v3124_v54  ;;  %v11212_v30 = vld [vmem:[#allocation3 + $0x400] ss:$16 sps:$4 sm:$0xff]  }
 0x272   : > { %v3148_v18 = vadd.f32 %v3147_v34, %v3146_v63  ;;  %v3121_v2 = vrot.slane %v3120_v10, 1  ;;  %v11223_v34 = vld [vmem:[#allocation3 + $0x624] ss:$16 sps:$4 sm:$0xff]  }
 0x273   : > { %v3127_v21 = vrot.slane %v3126_v56, 1 }
 0x274   : > { %v3149_v33 = vrot.slane %v3148_v18, 1  ;;  %v3122_v39 = vadd.f32 %v3121_v2, %v3120_v10  ;;  %v11233_v2 = vld [vmem:[#allocation3 + $0x660] ss:$16 sps:$4 sm:$0xff]  }
 0x275   : > { %v3128_v43 = vadd.f32 %v3127_v21, %v3126_v56  ;;  %v11236_v21 = vld [vmem:[#allocation3 + $0x480] ss:$16 sps:$4 sm:$0xff]  }
 0x2a2   : > { %v3040_v40 = vpop.f32.mrb[20].mxu0 }
 0x2a3   : > { %v3081_v42 = vpop.f32.mrb[20].mxu1  ;;  %v3042_v47 = vpop.f32.mrb[21].mxu0 }
 0x2a4   : > { %v3082_v45 = vadd.f32 %v3081_v42, %v3040_v40  ;;  %v3083_v49 = vpop.f32.mrb[21].mxu1  ;;  %v3044_v60 = vpop.f32.mrb[22].mxu0 }
 0x2a5   : > { %v3084_v58 = vadd.f32 %v3083_v49, %v3042_v47  ;;  %v3085_v12 = vpop.f32.mrb[22].mxu1  ;;  %v3045_v62 = vpop.f32.mrb[23].mxu0 }
 0x2a6   : > { %v3090_v48 = vadd.f32 %v3082_v45, %v2125_v9  ;;  %v3086_v36 = vpop.f32.mrb[23].mxu1  ;;  %v3153_v9 = vrot.slane %v3152_v0, 2 }
 0x2a7   : > { %v3091_v37 = vadd.f32 %v3084_v58, %v2127_v41  ;;  %v3150_v58 = vadd.f32 %v3149_v33, %v3148_v18 }
 0x2a8   : > { %v12758_v1 = vadd.f32 %v12751_v46, %v3090_v48  ;;  %v3154_v61 = vadd.f32 %v3153_v9, %v3152_v0  ;;  %v11218_v9 = vld [vmem:[#allocation3 + $0x420] ss:$16 sps:$4 sm:$0xff]  }
 0x2a9   : > { %v12761_v4 = vadd.f32 %v12754_v59, %v3091_v37 }
 0x2aa   : > { %v3143_v5 = vmul.f32 %v12758_v1, %v12758_v1  ;;  %v3129_v31 = vrot.slane %v12758_v1, 4  ;;  %v3155_v35 = vrot.slane %v3154_v61, 1 }
 0x2ab   : > { %v3144_v6 = vmul.f32 %v12761_v4, %v12761_v4  ;;  %v3135_v8 = vrot.slane %v12761_v4, 4 }
 0x2ac   : > { %v3130_v11 = vadd.f32 %v3129_v31, %v12758_v1  ;;  %v3157_v41 = vrot.slane %v3143_v5, 4  ;;  %v3156_v60 = vadd.f32 %v3155_v35, %v3154_v61  ;;  %v11215_v31 = vld [vmem:[#allocation3 + $0x600] ss:$16 sps:$4 sm:$0xff]   ;;  %v11235_v61 = vld [vmem:[#allocation3 + $0x664] ss:$16 sps:$4 sm:$0xff]  }
 0x2ad   : > { %v3136_v13 = vadd.f32 %v3135_v8, %v12761_v4  ;;  %v3163_v14 = vrot.slane %v3144_v6, 4  ;;  %v11220_v8 = vld [vmem:[#allocation3 + $0x424] ss:$16 sps:$4 sm:$0xff]  }
 0x2ae   : > { %v3131_v15 = vrot.slane %v3130_v11, 2  ;;  %v3158_v16 = vadd.f32 %v3157_v41, %v3143_v5  ;;  %v11214_v5 = vld [vmem:[#allocation3 + $0x404] ss:$16 sps:$4 sm:$0xff]  }
 0x2af   : > { %v3137_v17 = vrot.slane %v3136_v13, 2  ;;  %v3164_v52 = vadd.f32 %v3163_v14, %v3144_v6  ;;  %v11217_v6 = vld [vmem:[#allocation3 + $0x604] ss:$16 sps:$4 sm:$0xff]   ;;  %4232 = vmatprep.subr.bf16.mxu0 %v11214_v5  ;;  %v11224_v14 = vld [vmem:[#allocation3 + $0x440] ss:$16 sps:$4 sm:$0xff]  }
 0x2b0   : > { %v3132_v19 = vadd.f32 %v3131_v15, %v3130_v11  ;;  %v3159_v20 = vrot.slane %v3158_v16, 2  ;;  %4273 = vmatprep.subr.bf16.mxu1 %v11217_v6  ;;  %4233 = vmatpush1.bf16.msra.mxu0 %v11212_v30  ;;  %v11221_v11 = vld [vmem:[#allocation3 + $0x620] ss:$16 sps:$4 sm:$0xff]   ;;  %v11226_v41 = vld [vmem:[#allocation3 + $0x444] ss:$16 sps:$4 sm:$0xff]  }
 0x2b1   : > { %v3138_v7 = vadd.f32 %v3137_v17, %v3136_v13  ;;  %v3165_v23 = vrot.slane %v3164_v52, 2  ;;  %4274 = vmatpush1.bf16.msra.mxu1 %v11215_v31  ;;  %4234 = vmatprep.subr.bf16.mxu0 %v11220_v8  ;;  %v11229_v13 = vld [vmem:[#allocation3 + $0x644] ss:$16 sps:$4 sm:$0xff]   ;;  %v11275_v30 = vld [vmem:[#allocation3 + $0x740] ss:$16 sps:$4 sm:$0xff]  }
 0x2b2   : > { %v3133_v24 = vrot.slane %v3132_v19, 1  ;;  %v3160_v29 = vadd.f32 %v3159_v20, %v3158_v16  ;;  %4275 = vmatprep.subr.bf16.mxu1 %v11223_v34  ;;  %v11227_v16 = vld [vmem:[#allocation3 + $0x640] ss:$16 sps:$4 sm:$0xff]   ;;  %v11232_v17 = vld [vmem:[#allocation3 + $0x464] ss:$16 sps:$4 sm:$0xff]  }
 0x2b3   : > { %v3139_v32 = vrot.slane %v3138_v7, 1  ;;  %v3166_v38 = vadd.f32 %v3165_v23, %v3164_v52  ;;  %v11230_v52 = vld [vmem:[#allocation3 + $0x460] ss:$16 sps:$4 sm:$0xff]   ;;  %v11241_v20 = vld [vmem:[#allocation3 + $0x684] ss:$16 sps:$4 sm:$0xff]  }
 0x2b4   : > { %v3134_v40 = vadd.f32 %v3133_v24, %v3132_v19  ;;  %v3161_v42 = vrot.slane %v3160_v29, 1  ;;  %4235 = vmatpush1.bf16.msra.mxu0 %v11218_v9  ;;  %v11238_v19 = vld [vmem:[#allocation3 + $0x484] ss:$16 sps:$4 sm:$0xff]   ;;  %v11242_v24 = vld [vmem:[#allocation3 + $0x4a0] ss:$16 sps:$4 sm:$0xff]  }
 0x2b5   : > { %v3140_v44 = vadd.f32 %v3139_v32, %v3138_v7  ;;  %v3167_v45 = vrot.slane %v3166_v38, 1  ;;  %4276 = vmatpush1.bf16.msra.mxu1 %v11221_v11  ;;  %4236 = vmatprep.subr.bf16.mxu0 %v11226_v41  ;;  %v11239_v7 = vld [vmem:[#allocation3 + $0x680] ss:$16 sps:$4 sm:$0xff]   ;;  %v11244_v23 = vld [vmem:[#allocation3 + $0x4a4] ss:$16 sps:$4 sm:$0xff]  }
 0x2b6   : > { %v3169_v47 = vadd.f32 %v3134_v40, %v3122_v39  ;;  %v3162_v49 = vadd.f32 %v3161_v42, %v3160_v29  ;;  %4277 = vmatprep.subr.bf16.mxu1 %v11229_v13  ;;  %v11245_v29 = vld [vmem:[#allocation3 + $0x6a0] ss:$16 sps:$4 sm:$0xff]   ;;  %v11247_v32 = vld [vmem:[#allocation3 + $0x6a4] ss:$16 sps:$4 sm:$0xff]  }
 0x2b7   : > { %v3170_v50 = vadd.f32 %v3140_v44, %v3128_v43  ;;  %v3168_v12 = vadd.f32 %v3167_v45, %v3166_v38  ;;  %v11250_v38 = vld [vmem:[#allocation3 + $0x4c4] ss:$16 sps:$4 sm:$0xff]   ;;  %v11248_v40 = vld [vmem:[#allocation3 + $0x4c0] ss:$16 sps:$4 sm:$0xff]  }
 0x2b8   : > { %v3187_v48 = vadd.f32 %v3162_v49, %v3150_v58  ;;  %4237 = vmatpush1.bf16.msra.mxu0 %v11224_v14  ;;  %v11253_v39 = vld [vmem:[#allocation3 + $0x6c4] ss:$16 sps:$4 sm:$0xff]   ;;  %v11251_v42 = vld [vmem:[#allocation3 + $0x6c0] ss:$16 sps:$4 sm:$0xff]  }
 0x2b9   : > { %v3171_v54 = vadd.f32 %v3170_v50, %v3169_v47  ;;  %v3188_v62 = vadd.f32 %v3168_v12, %v3156_v60  ;;  %4278 = vmatpush1.bf16.msra.mxu1 %v11227_v16  ;;  %4238 = vmatprep.subr.bf16.mxu0 %v11232_v17  ;;  %v11256_v45 = vld [vmem:[#allocation3 + $0x4e4] ss:$16 sps:$4 sm:$0xff]   ;;  %v11254_v49 = vld [vmem:[#allocation3 + $0x4e0] ss:$16 sps:$4 sm:$0xff]  }
 0x2ba   : > { %4279 = vmatprep.subr.bf16.mxu1 %v11235_v61  ;;  %v11259_v47 = vld [vmem:[#allocation3 + $0x6e4] ss:$16 sps:$4 sm:$0xff]   ;;  %v11257_v50 = vld [vmem:[#allocation3 + $0x6e0] ss:$16 sps:$4 sm:$0xff]  }
 0x2bb   : > { %3172 = vrot.lane.b32.xlu0 %v3171_v54, %s12508_s17  ;;  %v3189_v36 = vadd.f32 %v3188_v62, %v3187_v48  ;;  %v11262_v58 = vld [vmem:[#allocation3 + $0x504] ss:$16 sps:$4 sm:$0xff]   ;;  %v11260_v12 = vld [vmem:[#allocation3 + $0x500] ss:$16 sps:$4 sm:$0xff]  }
 0x2bc   : > { %4239 = vmatpush1.bf16.msra.mxu0 %v11230_v52  ;;  %v11265_v60 = vld [vmem:[#allocation3 + $0x704] ss:$16 sps:$4 sm:$0xff]   ;;  %v11278_v6 = vld [vmem:[#allocation3 + $0x560] ss:$16 sps:$4 sm:$0xff]  }
 0x2bd   : > { %4280 = vmatpush1.bf16.msra.mxu1 %v11233_v2  ;;  %4240 = vmatprep.subr.bf16.mxu0 %v11238_v19  ;;  %v11268_v48 = vld [vmem:[#allocation3 + $0x524] ss:$16 sps:$4 sm:$0xff]   ;;  %v11281_v8 = vld [vmem:[#allocation3 + $0x760] ss:$16 sps:$4 sm:$0xff]  }
 0x2be   : > { %4281 = vmatprep.subr.bf16.mxu1 %v11241_v20  ;;  %v11271_v62 = vld [vmem:[#allocation3 + $0x724] ss:$16 sps:$4 sm:$0xff]   ;;  %v11287_v11 = vld [vmem:[#allocation3 + $0x780] ss:$16 sps:$4 sm:$0xff]   ;;  %v11310_v20 = vld [vmem:[#allocation3 + $0x40c] ss:$16 sps:$4 sm:$0xff]  }
 0x2bf   : > { %3190 = vrot.lane.b32.xlu0 %v3189_v36, %s12508_s17  ;;  %v11280_v5 = vld [vmem:[#allocation3 + $0x564] ss:$16 sps:$4 sm:$0xff]   ;;  %v11296_v17 = vld [vmem:[#allocation3 + $0x5c0] ss:$16 sps:$4 sm:$0xff]  }
 0x2c0   : > { %4241 = vmatpush1.bf16.msra.mxu0 %v11236_v21  ;;  %v11283_v31 = vld [vmem:[#allocation3 + $0x764] ss:$16 sps:$4 sm:$0xff]   ;;  %v11299_v61 = vld [vmem:[#allocation3 + $0x7c0] ss:$16 sps:$4 sm:$0xff]   ;;  %v11313_v21 = vld [vmem:[#allocation3 + $0x60c] ss:$16 sps:$4 sm:$0xff]  }
 0x2c1   : > { %4282 = vmatpush1.bf16.msra.mxu1 %v11239_v7  ;;  %4242 = vmatprep.subr.bf16.mxu0 %v11244_v23  ;;  %v11286_v34 = vld [vmem:[#allocation3 + $0x584] ss:$16 sps:$4 sm:$0xff]   ;;  %v11302_v2 = vld [vmem:[#allocation3 + $0x5e0] ss:$16 sps:$4 sm:$0xff]  }
 0x2c2   : > { %4283 = vmatprep.subr.bf16.mxu1 %v11247_v32  ;;  %v11289_v9 = vld [vmem:[#allocation3 + $0x784] ss:$16 sps:$4 sm:$0xff]   ;;  %v11305_v19 = vld [vmem:[#allocation3 + $0x7e0] ss:$16 sps:$4 sm:$0xff]  }
 0x2c3   : > { %v11292_v41 = vld [vmem:[#allocation3 + $0x5a4] ss:$16 sps:$4 sm:$0xff]  }
 0x2c4   : > { %4243 = vmatpush1.bf16.msra.mxu0 %v11242_v24  ;;  %v11295_v13 = vld [vmem:[#allocation3 + $0x7a4] ss:$16 sps:$4 sm:$0xff]  }
 0x2c5   : > { %4284 = vmatpush1.bf16.msra.mxu1 %v11245_v29  ;;  %4244 = vmatprep.subr.bf16.mxu0 %v11250_v38  ;;  %v11298_v14 = vld [vmem:[#allocation3 + $0x5c4] ss:$16 sps:$4 sm:$0xff]  }
 0x2c6   : > { %4285 = vmatprep.subr.bf16.mxu1 %v11253_v39  ;;  %v11301_v16 = vld [vmem:[#allocation3 + $0x7c4] ss:$16 sps:$4 sm:$0xff]  }
 0x2c7   : > { %v11307_v52 = vld [vmem:[#allocation3 + $0x7e4] ss:$16 sps:$4 sm:$0xff]  }
 0x2c8   : > { %4245 = vmatpush1.bf16.msra.mxu0 %v11248_v40 }
 0x2c9   : > { %4286 = vmatpush1.bf16.msra.mxu1 %v11251_v42  ;;  %4246 = vmatprep.subr.bf16.mxu0 %v11256_v45 }
 0x2ca   : > { %4287 = vmatprep.subr.bf16.mxu1 %v11259_v47 }
 0x2cc   : > { %4247 = vmatpush1.bf16.msra.mxu0 %v11254_v49 }
 0x2cd   : > { %4288 = vmatpush1.bf16.msra.mxu1 %v11257_v50  ;;  %4248 = vmatprep.subr.bf16.mxu0 %v11262_v58  ;;  %v3245_v50 = vrot.slane %v12670_v55, 1  ;;  %v3254_v55 = vrot.slane %v12665_v53, 1 }
 0x2ce   : > { %4289 = vmatprep.subr.bf16.mxu1 %v11265_v60  ;;  %v3248_v60 = vrot.slane %v12660_v51, 1 }
 0x2d0   : > { %4249 = vmatpush1.bf16.msra.mxu0 %v11260_v12 }
 0x2d1   : > { %4250 = vmatprep.subr.bf16.mxu0 %v11268_v48 }
 0x32d   : > { %v3173_v37 = vpop.permute.xlu0 %3172 }
 0x32e   : > { %v3176_v63 = vadd.f32 %v3173_v37, %v3171_v54  ;;  %v11263_v54 = vld [vmem:[#allocation3 + $0x700] ss:$16 sps:$4 sm:$0xff]  }
 0x32f   : > { %4290 = vmatpush1.bf16.msra.mxu1 %v11263_v54  ;;  %v11269_v37 = vld [vmem:[#allocation3 + $0x720] ss:$16 sps:$4 sm:$0xff]  }
 0x330   : > { %3177 = vrot.lane.b32.xlu1 %v3176_v63, %s12509_s19  ;;  %4291 = vmatprep.subr.bf16.mxu1 %v11271_v62  ;;  %v12374_v62 = vld [vmem:[#allocation2 + $0x10] sm:$0xff] }
 0x331   : > { %v3191_v0 = vpop.permute.xlu0 %3190 }
 0x332   : > { %v3192_v3 = vadd.f32 %v3191_v0, %v3189_v36  ;;  %v11266_v36 = vld [vmem:[#allocation3 + $0x520] ss:$16 sps:$4 sm:$0xff]   ;;  %v11277_v0 = vld [vmem:[#allocation3 + $0x744] ss:$16 sps:$4 sm:$0xff]  }
 0x333   : > { %4251 = vmatpush1.bf16.msra.mxu0 %v11266_v36  ;;  %4292 = vmatpush1.bf16.msra.mxu1 %v11269_v37  ;;  %v3250_v36 = vrot.slane %v12374_v62, 1  ;;  %v3251_v37 = vrot.slane %v12673_v57, 1 }
 0x334   : > { %3193 = vrot.lane.b32.xlu1 %v3192_v3, %s12509_s19  ;;  %4293 = vmatprep.subr.bf16.mxu1 %v11277_v0 }
 0x335   : > { %v12804_v57 = vsel %vm3243_vm0, %v3250_v36, %v3251_v37  ;;  %v11316_v36 = vld [vmem:[#allocation3 + $0x42c] ss:$16 sps:$4 sm:$0xff]  }
 0x336   : > { %v11319_v37 = vld [vmem:[#allocation3 + $0x62c] ss:$16 sps:$4 sm:$0xff]  }
 0x337   : > { %4294 = vmatpush1.bf16.msra.mxu1 %v11275_v30 }
 0x338   : > { %4295 = vmatprep.subr.bf16.mxu1 %v11283_v31 }
 0x33b   : > { %4296 = vmatpush1.bf16.msra.mxu1 %v11281_v8 }
 0x33c   : > { %4297 = vmatprep.subr.bf16.mxu1 %v11289_v9 }
 0x33f   : > { %4298 = vmatpush1.bf16.msra.mxu1 %v11287_v11 }
 0x340   : > { %4299 = vmatprep.subr.bf16.mxu1 %v11295_v13 }
 0x3a2   : > { %v3178_v10 = vpop.permute.xlu1 %3177 }
 0x3a3   : > { %v3179_v56 = vadd.f32 %v3178_v10, %v3176_v63  ;;  %v11274_v63 = vld [vmem:[#allocation3 + $0x544] ss:$16 sps:$4 sm:$0xff]   ;;  %v11284_v10 = vld [vmem:[#allocation3 + $0x580] ss:$16 sps:$4 sm:$0xff]  }
 0x3a4   : > { %4252 = vmatprep.subr.bf16.mxu0 %v11274_v63  ;;  %v12375_v63 = vld [vmem:[#allocation2 + $0x18] sm:$0xff] }
 0x3a5   : > { %3180 = vrot.lane.b32.xlu0 %v3179_v56, %s12510_s20 }
 0x3a6   : > { %v3194_v15 = vpop.permute.xlu1 %3193 }
 0x3a7   : > { %v3195_v18 = vadd.f32 %v3194_v15, %v3192_v3  ;;  %v11272_v3 = vld [vmem:[#allocation3 + $0x540] ss:$16 sps:$4 sm:$0xff]  }
 0x3a8   : > { %4253 = vmatpush1.bf16.msra.mxu0 %v11272_v3  ;;  %v11293_v15 = vld [vmem:[#allocation3 + $0x7a0] ss:$16 sps:$4 sm:$0xff]  }
 0x3a9   : > { %3196 = vrot.lane.b32.xlu1 %v3195_v18, %s12510_s20  ;;  %4254 = vmatprep.subr.bf16.mxu0 %v11280_v5 }
 0x3aa   : > { %4300 = vmatpush1.bf16.msra.mxu1 %v11293_v15 }
 0x3ab   : > { %4301 = vmatprep.subr.bf16.mxu1 %v11301_v16 }
 0x3ac   : > { %4255 = vmatpush1.bf16.msra.mxu0 %v11278_v6 }
 0x3ad   : > { %4256 = vmatprep.subr.bf16.mxu0 %v11286_v34 }
 0x3ae   : > { %4302 = vmatpush1.bf16.msra.mxu1 %v11299_v61 }
 0x3af   : > { %4303 = vmatprep.subr.bf16.mxu1 %v11307_v52 }
 0x3b0   : > { %4257 = vmatpush1.bf16.msra.mxu0 %v11284_v10 }
 0x3b1   : > { %4258 = vmatprep.subr.bf16.mxu0 %v11292_v41 }
 0x3b2   : > { %4304 = vmatpush1.bf16.msra.mxu1 %v11305_v19 }
 0x3b3   : > { %4355 = vmatprep.subr.bf16.mxu1 %v11313_v21 }
 0x417   : > { %v3181_v33 = vpop.permute.xlu0 %3180 }
 0x418   : > { %v12777_v35 = vadd.f32 %v3181_v33, %v3179_v56  ;;  %v11290_v56 = vld [vmem:[#allocation3 + $0x5a0] ss:$16 sps:$4 sm:$0xff]  }
 0x419   : > { %4259 = vmatpush1.bf16.msra.mxu0 %v11290_v56 }
 0x41a   : > { %3183 = vrot.lane.b32.xlu0 %v12777_v35, %s12511_s25  ;;  %4260 = vmatprep.subr.bf16.mxu0 %v11298_v14 }
 0x41b   : > { %v3197_v43 = vpop.permute.xlu1 %3196 }
 0x41c   : > { %v12781_v44 = vadd.f32 %v3197_v43, %v3195_v18  ;;  %v11304_v18 = vld [vmem:[#allocation3 + $0x5e4] ss:$16 sps:$4 sm:$0xff]  }
 0x41d   : > { %4261 = vmatpush1.bf16.msra.mxu0 %v11296_v17  ;;  %v12372_v43 = vld [vmem:[#allocation2] sm:$0xff] }
 0x41e   : > { %3199 = vrot.lane.b32.xlu1 %v12781_v44, %s12511_s25  ;;  %4262 = vmatprep.subr.bf16.mxu0 %v11304_v18  ;;  %v3244_v45 = vrot.slane %v12372_v43, 1 }
 0x421   : > { %4263 = vmatpush1.bf16.msra.mxu0 %v11302_v2 }
 0x422   : > { %4314 = vmatprep.subr.bf16.mxu0 %v11310_v20 }
 0x48c   : > { %v3184_v7 = vpop.permute.xlu0 %3183 }
 0x48d   : > { %v3185_v23 = vadd.f32 %v3184_v7, %v12777_v35  ;;  %v12373_v35 = vld [vmem:[#allocation2 + $0x8] sm:$0xff] }
 0x48e   : > { %v3247_v58 = vrot.slane %v12373_v35, 1 }
 0x48f   : > { %v3186_v24 = vmul.f32 0.001953125, %v3185_v23 }
 0x490   : > { %v3200_v29 = vpop.permute.xlu1 %3199 }
 0x491   : > { %v3201_v32 = vadd.f32 %v3200_v29, %v12781_v44  ;;  %v3203_v33 = vmul.f32 %v3186_v24, %v3186_v24  ;;  %v3210_v42 = vrot.slane %v3186_v24, %v12732_v22 }
 0x493   : > { %v3202_v38 = vmul.f32 0.001953125, %v3201_v32  ;;  %v3211_v49 = vsub.f32 %v12740_v27, %v3210_v42  ;;  %v3212_v44 = vsub.f32 %v12743_v28, %v3210_v42  ;;  %v3213_v12 = vsub.f32 %v12758_v1, %v3210_v42 }
 0x494   : > { %v3214_v54 = vsub.f32 %v12761_v4, %v3210_v42  ;;  %v3253_v27 = vrot.slane %v12375_v63, 1  ;;  %v12798_v28 = vsel %vm3243_vm0, %v3244_v45, %v3245_v50  ;;  %v12801_v1 = vsel %vm3243_vm0, %v3247_v58, %v3248_v60  ;;  %v11308_v58 = vld [vmem:[#allocation3 + $0x408] ss:$16 sps:$4 sm:$0xff]  }
 0x495   : > { %v3204_v39 = vsub.f32 %v3202_v38, %v3203_v33  ;;  %v11314_v63 = vld [vmem:[#allocation3 + $0x428] ss:$16 sps:$4 sm:$0xff]  }
 0x496   : > { %v12807_v31 = vsel %vm3243_vm0, %v3253_v27, %v3254_v55  ;;  %v11317_v27 = vld [vmem:[#allocation3 + $0x628] ss:$16 sps:$4 sm:$0xff]   ;;  %v11322_v55 = vld [vmem:[#allocation3 + $0x44c] ss:$16 sps:$4 sm:$0xff]  }
 0x497   : > { %v3205_v40 = vadd.f32 1e-05, %v3204_v39 }
 0x499   : > { %12364 = vrsqrt.f32 %v3205_v40 }
 0x4a3   : > { %v12365_v47 = vpop.eup %12364 }
 0x4a4   : > { %v3218_v48 = vrot.slane %v12365_v47, %v12732_v22 }
 0x4a6   : > { %v3219_v0 = vmul.f32 %v3218_v48, %v3211_v49  ;;  %v3220_v3 = vmul.f32 %v3218_v48, %v3212_v44  ;;  %v3221_v30 = vmul.f32 %v3218_v48, %v3213_v12  ;;  %v3222_v51 = vmul.f32 %v3218_v48, %v3214_v54  ;;  %v11311_v54 = vld [vmem:[#allocation3 + $0x608] ss:$16 sps:$4 sm:$0xff]  }
 0x4a8   : > { %vm3223_vm1 = vcmp.ge.f32.partialorder %v3219_v0, 0.0  ;;  %vm3224_vm2 = vcmp.ge.f32.partialorder %v3220_v3, 0.0  ;;  %vm3225_vm3 = vcmp.ge.f32.partialorder %v3221_v30, 0.0  ;;  %vm3226_vm4 = vcmp.ge.f32.partialorder %v3222_v51, 0.0 }
 0x4a9   : > { %v3227_v4 = vmul.f32 0.01, %v3219_v0  ;;  %v3228_v5 = vmul.f32 0.01, %v3220_v3  ;;  %v3229_v53 = vmul.f32 0.01, %v3221_v30 }
 0x4aa   : > { %v3230_v6 = vmul.f32 0.01, %v3222_v51 }
 0x4ab   : > { %v3231_v8 = vsel %vm3223_vm1, %v3219_v0, %v3227_v4  ;;  %v3232_v34 = vsel %vm3224_vm2, %v3220_v3, %v3228_v5  ;;  %v3233_v9 = vsel %vm3225_vm3, %v3221_v30, %v3229_v53  ;;  %v11325_v0 = vld [vmem:[#allocation3 + $0x64c] ss:$16 sps:$4 sm:$0xff]   ;;  %v11320_v3 = vld [vmem:[#allocation3 + $0x448] ss:$16 sps:$4 sm:$0xff]  }
 0x4ac   : > { %v3234_v10 = vsel %vm3226_vm4, %v3222_v51, %v3230_v6  ;;  %v3260_v11 = vadd.f32 %v12798_v28, %v3231_v8  ;;  %v3261_v41 = vadd.f32 %v12801_v1, %v3232_v34  ;;  %v3262_v56 = vadd.f32 %v12804_v57, %v3233_v9  ;;  %v11323_v30 = vld [vmem:[#allocation3 + $0x648] ss:$16 sps:$4 sm:$0xff]   ;;  %v11328_v51 = vld [vmem:[#allocation3 + $0x46c] ss:$16 sps:$4 sm:$0xff]  }
 0x4ad   : > { %v3263_v13 = vadd.f32 %v12807_v31, %v3234_v10  ;;  %v11331_v4 = vld [vmem:[#allocation3 + $0x66c] ss:$16 sps:$4 sm:$0xff]   ;;  %v11326_v5 = vld [vmem:[#allocation3 + $0x468] ss:$16 sps:$4 sm:$0xff]  }
 0x4ae   : > { %v3268_v14 = vrot.slane %v3260_v11, 7  ;;  %v3269_v15 = vrot.slane %v3261_v41, 7  ;;  %v3270_v16 = vrot.slane %v3262_v56, 7  ;;  %v11329_v53 = vld [vmem:[#allocation3 + $0x668] ss:$16 sps:$4 sm:$0xff]  }
 0x4af   : > { %v3271_v17 = vrot.slane %v3263_v13, 7  ;;  %v11334_v6 = vld [vmem:[#allocation3 + $0x48c] ss:$16 sps:$4 sm:$0xff]   ;;  %v11332_v34 = vld [vmem:[#allocation3 + $0x488] ss:$16 sps:$4 sm:$0xff]  }
 0x4b0   : > { %3280 = vst [vmem:[#allocation2 + $0x20] sm:$0x1] %v3268_v14  ;;  %3282 = vst [vmem:[#allocation2 + $0x30] sm:$0x1] %v3270_v16  ;;  %v11337_v8 = vld [vmem:[#allocation3 + $0x68c] ss:$16 sps:$4 sm:$0xff]  }
 0x4b1   : > { %3276 = vst [vmem:[#allocation2] sm:$0xfe] %v3268_v14  ;;  %3277 = vst [vmem:[#allocation2 + $0x8] sm:$0xfe] %v3269_v15  ;;  %v11335_v9 = vld [vmem:[#allocation3 + $0x688] ss:$16 sps:$4 sm:$0xff]  }
 0x4b2   : > { %3278 = vst [vmem:[#allocation2 + $0x10] sm:$0xfe] %v3270_v16  ;;  %3281 = vst [vmem:[#allocation2 + $0x28] sm:$0x1] %v3269_v15  ;;  %v11340_v10 = vld [vmem:[#allocation3 + $0x4ac] ss:$16 sps:$4 sm:$0xff]  }
 0x4b3   : > { %3279 = vst [vmem:[#allocation2 + $0x18] sm:$0xfe] %v3271_v17  ;;  %3283 = vst [vmem:[#allocation2 + $0x38] sm:$0x1] %v3271_v17  ;;  %v11343_v11 = vld [vmem:[#allocation3 + $0x6ac] ss:$16 sps:$4 sm:$0xff]  }
 0x4b4   : > { %v11338_v41 = vld [vmem:[#allocation3 + $0x4a8] ss:$16 sps:$4 sm:$0xff]   ;;  %v11346_v13 = vld [vmem:[#allocation3 + $0x4cc] ss:$16 sps:$4 sm:$0xff]  }
 0x4b5   : > { %v11341_v56 = vld [vmem:[#allocation3 + $0x6a8] ss:$16 sps:$4 sm:$0xff]   ;;  %v11349_v14 = vld [vmem:[#allocation3 + $0x6cc] ss:$16 sps:$4 sm:$0xff]  }
 0x4b6   : > { %v11344_v15 = vld [vmem:[#allocation3 + $0x4c8] ss:$16 sps:$4 sm:$0xff]   ;;  %v11352_v17 = vld [vmem:[#allocation3 + $0x4ec] ss:$16 sps:$4 sm:$0xff]  }
 0x4b7   : > { %v3424_v21 = vld [vmem:[#allocation2 + $0x20] sm:$0x1]  ;;  %v3426_v29 = vld [vmem:[#allocation2 + $0x30] sm:$0x1]  ;;  %v11347_v16 = vld [vmem:[#allocation3 + $0x6c8] ss:$16 sps:$4 sm:$0xff]  }
 0x4b8   : > { %v3421_v18 = vld [vmem:[#allocation2 + $0x8] sm:$0xfe]  ;;  %v3420_v52 = vld [vmem:[#allocation2] sm:$0xfe] }
 0x4b9   : > { %v3425_v61 = vld [vmem:[#allocation2 + $0x28] sm:$0x1]  ;;  %v3428_v23 = vpack.c.bf16 %v3424_v21, %v3420_v52  ;;  %v3422_v24 = vld [vmem:[#allocation2 + $0x10] sm:$0xfe] }
 0x4ba   : > { %v3429_v2 = vpack.c.bf16 %v3425_v61, %v3421_v18  ;;  %v3423_v19 = vld [vmem:[#allocation2 + $0x18] sm:$0xfe]  ;;  %v3427_v20 = vld [vmem:[#allocation2 + $0x38] sm:$0x1]  ;;  %v3430_v33 = vpack.c.bf16 %v3426_v29, %v3422_v24 }
 0x4bb   : > { %v3431_v7 = vpack.c.bf16 %v3427_v20, %v3423_v19  ;;  %v3563_v39 = vshll.u32 %v3428_v23, 16  ;;  %v3561_v49 = vshrl.u32 %v3428_v23, 16  ;;  %v11355_v18 = vld [vmem:[#allocation3 + $0x6ec] ss:$16 sps:$4 sm:$0xff]   ;;  %v11350_v61 = vld [vmem:[#allocation3 + $0x4e8] ss:$16 sps:$4 sm:$0xff]  }
 0x4bc   : > { %v3570_v32 = vshll.u32 %v3429_v2, 16  ;;  %v3568_v40 = vshrl.u32 %v3429_v2, 16  ;;  %v3577_v43 = vshll.u32 %v3430_v33, 16  ;;  %v3575_v60 = vshrl.u32 %v3430_v33, 16  ;;  %v11353_v52 = vld [vmem:[#allocation3 + $0x6e8] ss:$16 sps:$4 sm:$0xff]  }
 0x4bd   : > { %v3584_v38 = vshll.u32 %v3431_v7, 16  ;;  %v3582_v45 = vshrl.u32 %v3431_v7, 16  ;;  %v3565_v50 = vrot.slane %v3563_v39, 1  ;;  %v11358_v2 = vld [vmem:[#allocation3 + $0x50c] ss:$16 sps:$4 sm:$0xff]  }
 0x4be   : > { %v3572_v42 = vrot.slane %v3570_v32, 1  ;;  %v3579_v44 = vrot.slane %v3577_v43, 1  ;;  %v11361_v19 = vld [vmem:[#allocation3 + $0x70c] ss:$16 sps:$4 sm:$0xff]   ;;  %v11356_v20 = vld [vmem:[#allocation3 + $0x508] ss:$16 sps:$4 sm:$0xff]  }
 0x4bf   : > { %v3586_v47 = vrot.slane %v3584_v38, 1  ;;  %v12813_v48 = vor.u32 %v3565_v50, %v3561_v49  ;;  %v11359_v21 = vld [vmem:[#allocation3 + $0x708] ss:$16 sps:$4 sm:$0xff]   ;;  %v11364_v7 = vld [vmem:[#allocation3 + $0x52c] ss:$16 sps:$4 sm:$0xff]  }
 0x4c0   : > { %v3573_v35 = vor.u32 %v3572_v42, %v3568_v40  ;;  %v12815_v62 = vor.u32 %v3579_v44, %v3575_v60  ;;  %v11367_v23 = vld [vmem:[#allocation3 + $0x72c] ss:$16 sps:$4 sm:$0xff]   ;;  %v11362_v24 = vld [vmem:[#allocation3 + $0x528] ss:$16 sps:$4 sm:$0xff]  }
 0x4c1   : > { %v3587_v12 = vor.u32 %v3586_v47, %v3582_v45  ;;  %v11365_v29 = vld [vmem:[#allocation3 + $0x728] ss:$16 sps:$4 sm:$0xff]   ;;  %v11370_v32 = vld [vmem:[#allocation3 + $0x54c] ss:$16 sps:$4 sm:$0xff]  }
 0x4c2   : > { %4264 = vmatprep.mubr.bf16.mxu0 %v3573_v35  ;;  %v11373_v33 = vld [vmem:[#allocation3 + $0x74c] ss:$16 sps:$4 sm:$0xff]   ;;  %v11368_v38 = vld [vmem:[#allocation3 + $0x548] ss:$16 sps:$4 sm:$0xff]  }
 0x4c3   : > { %4305 = vmatprep.mubr.bf16.mxu1 %v3587_v12  ;;  %4265 = vmatmul.mubr.bf16.vlgmr.msra.gmra.mrb[24].mxu0 %v12813_v48  ;;  %v11371_v39 = vld [vmem:[#allocation3 + $0x748] ss:$16 sps:$4 sm:$0xff]   ;;  %v11376_v40 = vld [vmem:[#allocation3 + $0x56c] ss:$16 sps:$4 sm:$0xff]  }
 0x4c4   : > { %4306 = vmatmul.mubr.bf16.vlgmr.msra.gmra.mrb[24].mxu1 %v12815_v62  ;;  %4315 = vmatpush1.bf16.msra.mxu0 %v11308_v58  ;;  %v11379_v42 = vld [vmem:[#allocation3 + $0x76c] ss:$16 sps:$4 sm:$0xff]   ;;  %v11374_v43 = vld [vmem:[#allocation3 + $0x568] ss:$16 sps:$4 sm:$0xff]  }
 0x4c5   : > { %4356 = vmatpush1.bf16.msra.mxu1 %v11311_v54  ;;  %4346 = vmatprep.mubr.bf16.mxu0 %v3573_v35  ;;  %v11377_v45 = vld [vmem:[#allocation3 + $0x768] ss:$16 sps:$4 sm:$0xff]   ;;  %v11382_v47 = vld [vmem:[#allocation3 + $0x58c] ss:$16 sps:$4 sm:$0xff]  }
 0x4c6   : > { %4387 = vmatprep.mubr.bf16.mxu1 %v3587_v12  ;;  %4316 = vmatprep.subr.bf16.mxu0 %v11316_v36  ;;  %v11385_v49 = vld [vmem:[#allocation3 + $0x78c] ss:$16 sps:$4 sm:$0xff]   ;;  %v11380_v50 = vld [vmem:[#allocation3 + $0x588] ss:$16 sps:$4 sm:$0xff]  }
 0x4c7   : > { %4357 = vmatprep.subr.bf16.mxu1 %v11319_v37  ;;  %v11383_v35 = vld [vmem:[#allocation3 + $0x788] ss:$16 sps:$4 sm:$0xff]   ;;  %v11388_v58 = vld [vmem:[#allocation3 + $0x5ac] ss:$16 sps:$4 sm:$0xff]  }
 0x4c8   : > { %4317 = vmatpush1.bf16.msra.mxu0 %v11314_v63  ;;  %v11391_v60 = vld [vmem:[#allocation3 + $0x7ac] ss:$16 sps:$4 sm:$0xff]   ;;  %v11386_v44 = vld [vmem:[#allocation3 + $0x5a8] ss:$16 sps:$4 sm:$0xff]  }
 0x4c9   : > { %4358 = vmatpush1.bf16.msra.mxu1 %v11317_v27  ;;  %4318 = vmatprep.subr.bf16.mxu0 %v11322_v55  ;;  %v11389_v12 = vld [vmem:[#allocation3 + $0x7a8] ss:$16 sps:$4 sm:$0xff]   ;;  %v11394_v54 = vld [vmem:[#allocation3 + $0x5cc] ss:$16 sps:$4 sm:$0xff]  }
 0x4ca   : > { %4359 = vmatprep.subr.bf16.mxu1 %v11325_v0  ;;  %v11397_v36 = vld [vmem:[#allocation3 + $0x7cc] ss:$16 sps:$4 sm:$0xff]   ;;  %v11392_v37 = vld [vmem:[#allocation3 + $0x5c8] ss:$16 sps:$4 sm:$0xff]  }
 0x4cb   : > { %v11395_v63 = vld [vmem:[#allocation3 + $0x7c8] ss:$16 sps:$4 sm:$0xff]   ;;  %v11400_v27 = vld [vmem:[#allocation3 + $0x5ec] ss:$16 sps:$4 sm:$0xff]  }
 0x4cc   : > { %4319 = vmatpush1.bf16.msra.mxu0 %v11320_v3  ;;  %v11403_v55 = vld [vmem:[#allocation3 + $0x7ec] ss:$16 sps:$4 sm:$0xff]   ;;  %v11398_v0 = vld [vmem:[#allocation3 + $0x5e8] ss:$16 sps:$4 sm:$0xff]  }
 0x4cd   : > { %4360 = vmatpush1.bf16.msra.mxu1 %v11323_v30  ;;  %4320 = vmatprep.subr.bf16.mxu0 %v11328_v51  ;;  %v11401_v3 = vld [vmem:[#allocation3 + $0x7e8] ss:$16 sps:$4 sm:$0xff]   ;;  %v11406_v30 = vld [vmem:[#allocation3 + $0x4] ss:$16 sps:$4 sm:$0xff]  }
 0x4ce   : > { %4361 = vmatprep.subr.bf16.mxu1 %v11331_v4  ;;  %v11409_v51 = vld [vmem:[#allocation3 + $0x204] ss:$16 sps:$4 sm:$0xff]   ;;  %v11404_v4 = vld [vmem:[#allocation3] ss:$16 sps:$4 sm:$0xff]  }
 0x4d0   : > { %4321 = vmatpush1.bf16.msra.mxu0 %v11326_v5  ;;  %v3285_v5 = vld [vmem:[#allocation2 + $0x8] sm:$0xff] }
 0x4d1   : > { %4362 = vmatpush1.bf16.msra.mxu1 %v11329_v53  ;;  %4322 = vmatprep.subr.bf16.mxu0 %v11334_v6  ;;  %v11407_v53 = vld [vmem:[#allocation3 + $0x200] ss:$16 sps:$4 sm:$0xff]   ;;  %v3287_v6 = vld [vmem:[#allocation2 + $0x18] sm:$0xff] }
 0x4d2   : > { %4363 = vmatprep.subr.bf16.mxu1 %v11337_v8  ;;  %v11412_v8 = vld [vmem:[#allocation3 + $0x24] ss:$16 sps:$4 sm:$0xff]  }
 0x4d4   : > { %4323 = vmatpush1.bf16.msra.mxu0 %v11332_v34  ;;  %v12820_v34 = vpack.c.bf16 %v3285_v5, %v3285_v5  ;;  %v11482_v5 = vld [vmem:[#allocation3 + $0x1a0] ss:$16 sps:$4 sm:$0xff]  }
 0x4d5   : > { %4364 = vmatpush1.bf16.msra.mxu1 %v11335_v9  ;;  %4324 = vmatprep.subr.bf16.mxu0 %v11340_v10  ;;  %v11415_v9 = vld [vmem:[#allocation3 + $0x224] ss:$16 sps:$4 sm:$0xff]   ;;  %v12823_v10 = vpack.c.bf16 %v3287_v6, %v3287_v6 }
 0x4d6   : > { %4365 = vmatprep.subr.bf16.mxu1 %v11343_v11  ;;  %v11410_v11 = vld [vmem:[#allocation3 + $0x20] ss:$16 sps:$4 sm:$0xff]   ;;  %v11490_v6 = vld [vmem:[#allocation3 + $0x1c4] ss:$16 sps:$4 sm:$0xff]  }
 0x4d8   : > { %4325 = vmatpush1.bf16.msra.mxu0 %v11338_v41  ;;  %v11413_v41 = vld [vmem:[#allocation3 + $0x220] ss:$16 sps:$4 sm:$0xff]  }
 0x4d9   : > { %4366 = vmatpush1.bf16.msra.mxu1 %v11341_v56  ;;  %4326 = vmatprep.subr.bf16.mxu0 %v11346_v13  ;;  %v11418_v56 = vld [vmem:[#allocation3 + $0x44] ss:$16 sps:$4 sm:$0xff]  }
 0x4da   : > { %4367 = vmatprep.subr.bf16.mxu1 %v11349_v14  ;;  %v11421_v13 = vld [vmem:[#allocation3 + $0x244] ss:$16 sps:$4 sm:$0xff]   ;;  %v11419_v14 = vld [vmem:[#allocation3 + $0x240] ss:$16 sps:$4 sm:$0xff]  }
 0x4dc   : > { %4327 = vmatpush1.bf16.msra.mxu0 %v11344_v15  ;;  %v11427_v15 = vld [vmem:[#allocation3 + $0x264] ss:$16 sps:$4 sm:$0xff]  }
 0x4dd   : > { %4368 = vmatpush1.bf16.msra.mxu1 %v11347_v16  ;;  %4328 = vmatprep.subr.bf16.mxu0 %v11352_v17  ;;  %v11422_v16 = vld [vmem:[#allocation3 + $0x60] ss:$16 sps:$4 sm:$0xff]  }
 0x4de   : > { %4369 = vmatprep.subr.bf16.mxu1 %v11355_v18  ;;  %v11425_v17 = vld [vmem:[#allocation3 + $0x260] ss:$16 sps:$4 sm:$0xff]   ;;  %v11430_v18 = vld [vmem:[#allocation3 + $0x84] ss:$16 sps:$4 sm:$0xff]  }
 0x4e0   : > { %4329 = vmatpush1.bf16.msra.mxu0 %v11350_v61  ;;  %v11433_v61 = vld [vmem:[#allocation3 + $0x284] ss:$16 sps:$4 sm:$0xff]  }
 0x4e1   : > { %4370 = vmatpush1.bf16.msra.mxu1 %v11353_v52  ;;  %4330 = vmatprep.subr.bf16.mxu0 %v11358_v2  ;;  %v11428_v52 = vld [vmem:[#allocation3 + $0x80] ss:$16 sps:$4 sm:$0xff]  }
 0x4e2   : > { %4371 = vmatprep.subr.bf16.mxu1 %v11361_v19  ;;  %v11431_v2 = vld [vmem:[#allocation3 + $0x280] ss:$16 sps:$4 sm:$0xff]   ;;  %v11436_v19 = vld [vmem:[#allocation3 + $0xa4] ss:$16 sps:$4 sm:$0xff]  }
 0x4e4   : > { %4331 = vmatpush1.bf16.msra.mxu0 %v11356_v20  ;;  %v11439_v20 = vld [vmem:[#allocation3 + $0x2a4] ss:$16 sps:$4 sm:$0xff]  }
 0x4e5   : > { %4372 = vmatpush1.bf16.msra.mxu1 %v11359_v21  ;;  %4332 = vmatprep.subr.bf16.mxu0 %v11364_v7  ;;  %v11434_v21 = vld [vmem:[#allocation3 + $0xa0] ss:$16 sps:$4 sm:$0xff]  }
 0x4e6   : > { %4373 = vmatprep.subr.bf16.mxu1 %v11367_v23  ;;  %v11437_v7 = vld [vmem:[#allocation3 + $0x2a0] ss:$16 sps:$4 sm:$0xff]   ;;  %v11442_v23 = vld [vmem:[#allocation3 + $0xc4] ss:$16 sps:$4 sm:$0xff]  }
 0x4e8   : > { %4333 = vmatpush1.bf16.msra.mxu0 %v11362_v24  ;;  %v11445_v24 = vld [vmem:[#allocation3 + $0x2c4] ss:$16 sps:$4 sm:$0xff]  }
 0x4e9   : > { %4374 = vmatpush1.bf16.msra.mxu1 %v11365_v29  ;;  %4334 = vmatprep.subr.bf16.mxu0 %v11370_v32  ;;  %v11440_v29 = vld [vmem:[#allocation3 + $0xc0] ss:$16 sps:$4 sm:$0xff]  }
 0x4ea   : > { %4375 = vmatprep.subr.bf16.mxu1 %v11373_v33  ;;  %v11443_v32 = vld [vmem:[#allocation3 + $0x2c0] ss:$16 sps:$4 sm:$0xff]   ;;  %v11448_v33 = vld [vmem:[#allocation3 + $0xe4] ss:$16 sps:$4 sm:$0xff]  }
 0x4ec   : > { %4335 = vmatpush1.bf16.msra.mxu0 %v11368_v38  ;;  %v11451_v38 = vld [vmem:[#allocation3 + $0x2e4] ss:$16 sps:$4 sm:$0xff]  }
 0x4ed   : > { %4376 = vmatpush1.bf16.msra.mxu1 %v11371_v39  ;;  %4336 = vmatprep.subr.bf16.mxu0 %v11376_v40  ;;  %v11446_v39 = vld [vmem:[#allocation3 + $0xe0] ss:$16 sps:$4 sm:$0xff]  }
 0x4ee   : > { %4377 = vmatprep.subr.bf16.mxu1 %v11379_v42  ;;  %v11449_v40 = vld [vmem:[#allocation3 + $0x2e0] ss:$16 sps:$4 sm:$0xff]   ;;  %v11454_v42 = vld [vmem:[#allocation3 + $0x104] ss:$16 sps:$4 sm:$0xff]  }
 0x4f0   : > { %4337 = vmatpush1.bf16.msra.mxu0 %v11374_v43  ;;  %v11457_v43 = vld [vmem:[#allocation3 + $0x304] ss:$16 sps:$4 sm:$0xff]  }
 0x4f1   : > { %4378 = vmatpush1.bf16.msra.mxu1 %v11377_v45  ;;  %4338 = vmatprep.subr.bf16.mxu0 %v11382_v47  ;;  %v11452_v45 = vld [vmem:[#allocation3 + $0x100] ss:$16 sps:$4 sm:$0xff]  }
 0x4f2   : > { %4379 = vmatprep.subr.bf16.mxu1 %v11385_v49  ;;  %v11455_v47 = vld [vmem:[#allocation3 + $0x300] ss:$16 sps:$4 sm:$0xff]   ;;  %v11460_v49 = vld [vmem:[#allocation3 + $0x124] ss:$16 sps:$4 sm:$0xff]  }
 0x4f4   : > { %4339 = vmatpush1.bf16.msra.mxu0 %v11380_v50  ;;  %v11463_v50 = vld [vmem:[#allocation3 + $0x324] ss:$16 sps:$4 sm:$0xff]  }
 0x4f5   : > { %4380 = vmatpush1.bf16.msra.mxu1 %v11383_v35  ;;  %4340 = vmatprep.subr.bf16.mxu0 %v11388_v58  ;;  %v11458_v35 = vld [vmem:[#allocation3 + $0x120] ss:$16 sps:$4 sm:$0xff]  }
 0x4f6   : > { %4381 = vmatprep.subr.bf16.mxu1 %v11391_v60  ;;  %v11461_v58 = vld [vmem:[#allocation3 + $0x320] ss:$16 sps:$4 sm:$0xff]   ;;  %v11466_v60 = vld [vmem:[#allocation3 + $0x144] ss:$16 sps:$4 sm:$0xff]  }
 0x4f8   : > { %4341 = vmatpush1.bf16.msra.mxu0 %v11386_v44  ;;  %v11469_v44 = vld [vmem:[#allocation3 + $0x344] ss:$16 sps:$4 sm:$0xff]  }
 0x4f9   : > { %4382 = vmatpush1.bf16.msra.mxu1 %v11389_v12  ;;  %4342 = vmatprep.subr.bf16.mxu0 %v11394_v54  ;;  %v11464_v12 = vld [vmem:[#allocation3 + $0x140] ss:$16 sps:$4 sm:$0xff]  }
 0x4fa   : > { %4383 = vmatprep.subr.bf16.mxu1 %v11397_v36  ;;  %v11467_v54 = vld [vmem:[#allocation3 + $0x340] ss:$16 sps:$4 sm:$0xff]   ;;  %v11472_v36 = vld [vmem:[#allocation3 + $0x164] ss:$16 sps:$4 sm:$0xff]  }
 0x4fc   : > { %4343 = vmatpush1.bf16.msra.mxu0 %v11392_v37  ;;  %v11475_v37 = vld [vmem:[#allocation3 + $0x364] ss:$16 sps:$4 sm:$0xff]  }
 0x4fd   : > { %4384 = vmatpush1.bf16.msra.mxu1 %v11395_v63  ;;  %4344 = vmatprep.subr.bf16.mxu0 %v11400_v27  ;;  %v11470_v63 = vld [vmem:[#allocation3 + $0x160] ss:$16 sps:$4 sm:$0xff]  }
 0x4fe   : > { %4385 = vmatprep.subr.bf16.mxu1 %v11403_v55  ;;  %v11473_v27 = vld [vmem:[#allocation3 + $0x360] ss:$16 sps:$4 sm:$0xff]   ;;  %v11478_v55 = vld [vmem:[#allocation3 + $0x184] ss:$16 sps:$4 sm:$0xff]  }
 0x500   : > { %4345 = vmatpush1.bf16.msra.mxu0 %v11398_v0  ;;  %v11481_v0 = vld [vmem:[#allocation3 + $0x384] ss:$16 sps:$4 sm:$0xff]  }
 0x501   : > { %4386 = vmatpush1.bf16.msra.mxu1 %v11401_v3  ;;  %5036 = vmatprep.subr.bf16.mxu0 %v11406_v30  ;;  %v11476_v3 = vld [vmem:[#allocation3 + $0x180] ss:$16 sps:$4 sm:$0xff]  }
 0x502   : > { %5077 = vmatprep.subr.bf16.mxu1 %v11409_v51  ;;  %v11479_v30 = vld [vmem:[#allocation3 + $0x380] ss:$16 sps:$4 sm:$0xff]   ;;  %v11484_v51 = vld [vmem:[#allocation3 + $0x1a4] ss:$16 sps:$4 sm:$0xff]  }
 0x503   : > { %4347 = vmatmul.mubr.bf16.vlgmr.msra.gmra.mrb[28].mxu0 %v12813_v48  ;;  %v11416_v48 = vld [vmem:[#allocation3 + $0x40] ss:$16 sps:$4 sm:$0xff]  }
 0x504   : > { %4388 = vmatmul.mubr.bf16.vlgmr.msra.gmra.mrb[28].mxu1 %v12815_v62  ;;  %5037 = vmatpush1.bf16.msra.mxu0 %v11404_v4  ;;  %v11424_v62 = vld [vmem:[#allocation3 + $0x64] ss:$16 sps:$4 sm:$0xff]  }
 0x505   : > { %5068 = vmatprep.mubr.bf16.mxu0 %v12820_v34  ;;  %5078 = vmatpush1.bf16.msra.mxu1 %v11407_v53  ;;  %v11487_v4 = vld [vmem:[#allocation3 + $0x3a4] ss:$16 sps:$4 sm:$0xff]   ;;  %v11485_v53 = vld [vmem:[#allocation3 + $0x3a0] ss:$16 sps:$4 sm:$0xff]  }
 0x506   : > { %5109 = vmatprep.mubr.bf16.mxu1 %v12823_v10  ;;  %5038 = vmatprep.subr.bf16.mxu0 %v11412_v8  ;;  %v11493_v8 = vld [vmem:[#allocation3 + $0x3c4] ss:$16 sps:$4 sm:$0xff]  }
 0x507   : > { %5079 = vmatprep.subr.bf16.mxu1 %v11415_v9  ;;  %v11488_v9 = vld [vmem:[#allocation3 + $0x1c0] ss:$16 sps:$4 sm:$0xff]  }
 0x508   : > { %5039 = vmatpush1.bf16.msra.mxu0 %v11410_v11  ;;  %v11491_v11 = vld [vmem:[#allocation3 + $0x3c0] ss:$16 sps:$4 sm:$0xff]  }
 0x509   : > { %5080 = vmatpush1.bf16.msra.mxu1 %v11413_v41  ;;  %5040 = vmatprep.subr.bf16.mxu0 %v11418_v56  ;;  %v11496_v41 = vld [vmem:[#allocation3 + $0x1e4] ss:$16 sps:$4 sm:$0xff]  }
 0x50a   : > { %5081 = vmatprep.subr.bf16.mxu1 %v11421_v13  ;;  %v11499_v56 = vld [vmem:[#allocation3 + $0x3e4] ss:$16 sps:$4 sm:$0xff]   ;;  %v11494_v13 = vld [vmem:[#allocation3 + $0x1e0] ss:$16 sps:$4 sm:$0xff]  }
 0x50c   : > { %5041 = vmatpush1.bf16.msra.mxu0 %v11416_v48  ;;  %v11497_v48 = vld [vmem:[#allocation3 + $0x3e0] ss:$16 sps:$4 sm:$0xff]  }
 0x50d   : > { %5082 = vmatpush1.bf16.msra.mxu1 %v11419_v14  ;;  %5042 = vmatprep.subr.bf16.mxu0 %v11424_v62  ;;  %v11502_v14 = vld [vmem:[#allocation3 + $0xc] ss:$16 sps:$4 sm:$0xff]   ;;  %v3284_v62 = vld [vmem:[#allocation2] sm:$0xff] }
 0x50e   : > { %5083 = vmatprep.subr.bf16.mxu1 %v11427_v15  ;;  %v11505_v15 = vld [vmem:[#allocation3 + $0x20c] ss:$16 sps:$4 sm:$0xff]  }
 0x510   : > { %5043 = vmatpush1.bf16.msra.mxu0 %v11422_v16  ;;  %v3286_v16 = vld [vmem:[#allocation2 + $0x10] sm:$0xff] }
 0x511   : > { %5084 = vmatpush1.bf16.msra.mxu1 %v11425_v17  ;;  %5044 = vmatprep.subr.bf16.mxu0 %v11430_v18  ;;  %v11500_v17 = vld [vmem:[#allocation3 + $0x8] ss:$16 sps:$4 sm:$0xff]   ;;  %v12827_v18 = vpack.c.bf16 %v3284_v62, %v3284_v62  ;;  %v11580_v62 = vld [vmem:[#allocation3 + $0x1ac] ss:$16 sps:$4 sm:$0xff]  }
 0x512   : > { %5085 = vmatprep.subr.bf16.mxu1 %v11433_v61  ;;  %v11503_v61 = vld [vmem:[#allocation3 + $0x208] ss:$16 sps:$4 sm:$0xff]  }
 0x514   : > { %5045 = vmatpush1.bf16.msra.mxu0 %v11428_v52  ;;  %v12829_v52 = vpack.c.bf16 %v3286_v16, %v3286_v16  ;;  %v11578_v16 = vld [vmem:[#allocation3 + $0x1a8] ss:$16 sps:$4 sm:$0xff]  }
 0x515   : > { %5086 = vmatpush1.bf16.msra.mxu1 %v11431_v2  ;;  %5046 = vmatprep.subr.bf16.mxu0 %v11436_v19  ;;  %v11508_v2 = vld [vmem:[#allocation3 + $0x2c] ss:$16 sps:$4 sm:$0xff]  }
 0x516   : > { %5087 = vmatprep.subr.bf16.mxu1 %v11439_v20  ;;  %v11511_v19 = vld [vmem:[#allocation3 + $0x22c] ss:$16 sps:$4 sm:$0xff]   ;;  %v11506_v20 = vld [vmem:[#allocation3 + $0x28] ss:$16 sps:$4 sm:$0xff]  }
 0x518   : > { %5047 = vmatpush1.bf16.msra.mxu0 %v11434_v21  ;;  %v11509_v21 = vld [vmem:[#allocation3 + $0x228] ss:$16 sps:$4 sm:$0xff]  }
 0x519   : > { %5088 = vmatpush1.bf16.msra.mxu1 %v11437_v7  ;;  %5048 = vmatprep.subr.bf16.mxu0 %v11442_v23  ;;  %v11514_v7 = vld [vmem:[#allocation3 + $0x4c] ss:$16 sps:$4 sm:$0xff]  }
 0x51a   : > { %5089 = vmatprep.subr.bf16.mxu1 %v11445_v24  ;;  %v11517_v23 = vld [vmem:[#allocation3 + $0x24c] ss:$16 sps:$4 sm:$0xff]   ;;  %v11512_v24 = vld [vmem:[#allocation3 + $0x48] ss:$16 sps:$4 sm:$0xff]  }
 0x51c   : > { %5049 = vmatpush1.bf16.msra.mxu0 %v11440_v29  ;;  %v11515_v29 = vld [vmem:[#allocation3 + $0x248] ss:$16 sps:$4 sm:$0xff]  }
 0x51d   : > { %5090 = vmatpush1.bf16.msra.mxu1 %v11443_v32  ;;  %5050 = vmatprep.subr.bf16.mxu0 %v11448_v33  ;;  %v11520_v32 = vld [vmem:[#allocation3 + $0x6c] ss:$16 sps:$4 sm:$0xff]  }
 0x51e   : > { %5091 = vmatprep.subr.bf16.mxu1 %v11451_v38  ;;  %v11523_v33 = vld [vmem:[#allocation3 + $0x26c] ss:$16 sps:$4 sm:$0xff]   ;;  %v11518_v38 = vld [vmem:[#allocation3 + $0x68] ss:$16 sps:$4 sm:$0xff]  }
 0x520   : > { %5051 = vmatpush1.bf16.msra.mxu0 %v11446_v39  ;;  %v11526_v39 = vld [vmem:[#allocation3 + $0x8c] ss:$16 sps:$4 sm:$0xff]  }
 0x521   : > { %5092 = vmatpush1.bf16.msra.mxu1 %v11449_v40  ;;  %5052 = vmatprep.subr.bf16.mxu0 %v11454_v42  ;;  %v11529_v40 = vld [vmem:[#allocation3 + $0x28c] ss:$16 sps:$4 sm:$0xff]   ;;  %v11527_v42 = vld [vmem:[#allocation3 + $0x288] ss:$16 sps:$4 sm:$0xff]  }
 0x522   : > { %5093 = vmatprep.subr.bf16.mxu1 %v11457_v43  ;;  %v11532_v43 = vld [vmem:[#allocation3 + $0xac] ss:$16 sps:$4 sm:$0xff]  }
 0x524   : > { %5053 = vmatpush1.bf16.msra.mxu0 %v11452_v45  ;;  %v11535_v45 = vld [vmem:[#allocation3 + $0x2ac] ss:$16 sps:$4 sm:$0xff]  }
 0x525   : > { %5094 = vmatpush1.bf16.msra.mxu1 %v11455_v47  ;;  %5054 = vmatprep.subr.bf16.mxu0 %v11460_v49  ;;  %v11530_v47 = vld [vmem:[#allocation3 + $0xa8] ss:$16 sps:$4 sm:$0xff]  }
 0x526   : > { %5095 = vmatprep.subr.bf16.mxu1 %v11463_v50  ;;  %v11533_v49 = vld [vmem:[#allocation3 + $0x2a8] ss:$16 sps:$4 sm:$0xff]   ;;  %v11538_v50 = vld [vmem:[#allocation3 + $0xcc] ss:$16 sps:$4 sm:$0xff]  }
 0x528   : > { %5055 = vmatpush1.bf16.msra.mxu0 %v11458_v35  ;;  %v11541_v35 = vld [vmem:[#allocation3 + $0x2cc] ss:$16 sps:$4 sm:$0xff]  }
 0x529   : > { %5096 = vmatpush1.bf16.msra.mxu1 %v11461_v58  ;;  %5056 = vmatprep.subr.bf16.mxu0 %v11466_v60  ;;  %v11536_v58 = vld [vmem:[#allocation3 + $0xc8] ss:$16 sps:$4 sm:$0xff]  }
 0x52a   : > { %5097 = vmatprep.subr.bf16.mxu1 %v11469_v44  ;;  %v11539_v60 = vld [vmem:[#allocation3 + $0x2c8] ss:$16 sps:$4 sm:$0xff]   ;;  %v11544_v44 = vld [vmem:[#allocation3 + $0xec] ss:$16 sps:$4 sm:$0xff]  }
 0x52c   : > { %5057 = vmatpush1.bf16.msra.mxu0 %v11464_v12  ;;  %v11547_v12 = vld [vmem:[#allocation3 + $0x2ec] ss:$16 sps:$4 sm:$0xff]  }
 0x52d   : > { %5098 = vmatpush1.bf16.msra.mxu1 %v11467_v54  ;;  %5058 = vmatprep.subr.bf16.mxu0 %v11472_v36  ;;  %v11542_v54 = vld [vmem:[#allocation3 + $0xe8] ss:$16 sps:$4 sm:$0xff]  }
 0x52e   : > { %5099 = vmatprep.subr.bf16.mxu1 %v11475_v37  ;;  %v11545_v36 = vld [vmem:[#allocation3 + $0x2e8] ss:$16 sps:$4 sm:$0xff]   ;;  %v11550_v37 = vld [vmem:[#allocation3 + $0x10c] ss:$16 sps:$4 sm:$0xff]  }
 0x530   : > { %5059 = vmatpush1.bf16.msra.mxu0 %v11470_v63  ;;  %v11553_v63 = vld [vmem:[#allocation3 + $0x30c] ss:$16 sps:$4 sm:$0xff]  }
 0x531   : > { %5100 = vmatpush1.bf16.msra.mxu1 %v11473_v27  ;;  %5060 = vmatprep.subr.bf16.mxu0 %v11478_v55  ;;  %v11548_v27 = vld [vmem:[#allocation3 + $0x108] ss:$16 sps:$4 sm:$0xff]  }
 0x532   : > { %5101 = vmatprep.subr.bf16.mxu1 %v11481_v0  ;;  %v11551_v55 = vld [vmem:[#allocation3 + $0x308] ss:$16 sps:$4 sm:$0xff]   ;;  %v11556_v0 = vld [vmem:[#allocation3 + $0x12c] ss:$16 sps:$4 sm:$0xff]  }
 0x534   : > { %5061 = vmatpush1.bf16.msra.mxu0 %v11476_v3  ;;  %v11559_v3 = vld [vmem:[#allocation3 + $0x32c] ss:$16 sps:$4 sm:$0xff]  }
 0x535   : > { %5102 = vmatpush1.bf16.msra.mxu1 %v11479_v30  ;;  %5062 = vmatprep.subr.bf16.mxu0 %v11484_v51  ;;  %v11554_v30 = vld [vmem:[#allocation3 + $0x128] ss:$16 sps:$4 sm:$0xff]  }
 0x536   : > { %5103 = vmatprep.subr.bf16.mxu1 %v11487_v4  ;;  %v11557_v51 = vld [vmem:[#allocation3 + $0x328] ss:$16 sps:$4 sm:$0xff]   ;;  %v11562_v4 = vld [vmem:[#allocation3 + $0x14c] ss:$16 sps:$4 sm:$0xff]  }
 0x538   : > { %5063 = vmatpush1.bf16.msra.mxu0 %v11482_v5  ;;  %v11565_v5 = vld [vmem:[#allocation3 + $0x34c] ss:$16 sps:$4 sm:$0xff]  }
 0x539   : > { %5104 = vmatpush1.bf16.msra.mxu1 %v11485_v53  ;;  %5064 = vmatprep.subr.bf16.mxu0 %v11490_v6  ;;  %v11560_v53 = vld [vmem:[#allocation3 + $0x148] ss:$16 sps:$4 sm:$0xff]  }
 0x53a   : > { %5105 = vmatprep.subr.bf16.mxu1 %v11493_v8  ;;  %v11563_v6 = vld [vmem:[#allocation3 + $0x348] ss:$16 sps:$4 sm:$0xff]   ;;  %v11568_v8 = vld [vmem:[#allocation3 + $0x16c] ss:$16 sps:$4 sm:$0xff]  }
 0x53c   : > { %5065 = vmatpush1.bf16.msra.mxu0 %v11488_v9  ;;  %v11571_v9 = vld [vmem:[#allocation3 + $0x36c] ss:$16 sps:$4 sm:$0xff]  }
 0x53d   : > { %5106 = vmatpush1.bf16.msra.mxu1 %v11491_v11  ;;  %5066 = vmatprep.subr.bf16.mxu0 %v11496_v41  ;;  %v11566_v11 = vld [vmem:[#allocation3 + $0x168] ss:$16 sps:$4 sm:$0xff]  }
 0x53e   : > { %5107 = vmatprep.subr.bf16.mxu1 %v11499_v56  ;;  %v11569_v41 = vld [vmem:[#allocation3 + $0x368] ss:$16 sps:$4 sm:$0xff]   ;;  %v11574_v56 = vld [vmem:[#allocation3 + $0x18c] ss:$16 sps:$4 sm:$0xff]  }
 0x540   : > { %5067 = vmatpush1.bf16.msra.mxu0 %v11494_v13  ;;  %v11577_v13 = vld [vmem:[#allocation3 + $0x38c] ss:$16 sps:$4 sm:$0xff]  }
 0x541   : > { %5108 = vmatpush1.bf16.msra.mxu1 %v11497_v48  ;;  %5118 = vmatprep.subr.bf16.mxu0 %v11502_v14  ;;  %v11572_v48 = vld [vmem:[#allocation3 + $0x188] ss:$16 sps:$4 sm:$0xff]  }
 0x542   : > { %5159 = vmatprep.subr.bf16.mxu1 %v11505_v15  ;;  %v11575_v14 = vld [vmem:[#allocation3 + $0x388] ss:$16 sps:$4 sm:$0xff]   ;;  %v11583_v15 = vld [vmem:[#allocation3 + $0x3ac] ss:$16 sps:$4 sm:$0xff]  }
 0x543   : > { %5069 = vmatmul.mubr.bf16.vlgmr.msra.gmra.mrb[32].mxu0 %v12827_v18 }
 0x544   : > { %5110 = vmatmul.mubr.bf16.vlgmr.msra.gmra.mrb[32].mxu1 %v12829_v52  ;;  %5119 = vmatpush1.bf16.msra.mxu0 %v11500_v17  ;;  %v11581_v17 = vld [vmem:[#allocation3 + $0x3a8] ss:$16 sps:$4 sm:$0xff]  }
 0x545   : > { %5150 = vmatprep.mubr.bf16.mxu0 %v12820_v34  ;;  %5160 = vmatpush1.bf16.msra.mxu1 %v11503_v61  ;;  %v11521_v34 = vld [vmem:[#allocation3 + $0x268] ss:$16 sps:$4 sm:$0xff]   ;;  %v11586_v61 = vld [vmem:[#allocation3 + $0x1cc] ss:$16 sps:$4 sm:$0xff]  }
 0x546   : > { %5191 = vmatprep.mubr.bf16.mxu1 %v12823_v10  ;;  %5120 = vmatprep.subr.bf16.mxu0 %v11508_v2  ;;  %v11524_v10 = vld [vmem:[#allocation3 + $0x88] ss:$16 sps:$4 sm:$0xff]   ;;  %v11589_v2 = vld [vmem:[#allocation3 + $0x3cc] ss:$16 sps:$4 sm:$0xff]  }
 0x547   : > { %5161 = vmatprep.subr.bf16.mxu1 %v11511_v19  ;;  %v11584_v19 = vld [vmem:[#allocation3 + $0x1c8] ss:$16 sps:$4 sm:$0xff]  }
 0x548   : > { %5121 = vmatpush1.bf16.msra.mxu0 %v11506_v20  ;;  %v11587_v20 = vld [vmem:[#allocation3 + $0x3c8] ss:$16 sps:$4 sm:$0xff]  }
 0x549   : > { %5162 = vmatpush1.bf16.msra.mxu1 %v11509_v21  ;;  %5122 = vmatprep.subr.bf16.mxu0 %v11514_v7  ;;  %v11592_v21 = vld [vmem:[#allocation3 + $0x1ec] ss:$16 sps:$4 sm:$0xff]  }
 0x54a   : > { %5163 = vmatprep.subr.bf16.mxu1 %v11517_v23  ;;  %v11595_v7 = vld [vmem:[#allocation3 + $0x3ec] ss:$16 sps:$4 sm:$0xff]  }
 0x54b   : > { %v5201_v23 = vld [vmem:[#allocation2 + $0x8] sm:$0xfc] }
 0x54c   : > { %5123 = vmatpush1.bf16.msra.mxu0 %v11512_v24  ;;  %v11590_v24 = vld [vmem:[#allocation3 + $0x1e8] ss:$16 sps:$4 sm:$0xff]  }
 0x54d   : > { %5164 = vmatpush1.bf16.msra.mxu1 %v11515_v29  ;;  %5124 = vmatprep.subr.bf16.mxu0 %v11520_v32  ;;  %v5205_v29 = vld [vmem:[#allocation2 + $0x28] sm:$0x3]  ;;  %v5203_v32 = vld [vmem:[#allocation2 + $0x18] sm:$0xfc] }
 0x54e   : > { %5165 = vmatprep.subr.bf16.mxu1 %v11523_v33  ;;  %v11593_v33 = vld [vmem:[#allocation3 + $0x3e8] ss:$16 sps:$4 sm:$0xff]  }
 0x550   : > { %5125 = vmatpush1.bf16.msra.mxu0 %v11518_v38  ;;  %v11598_v38 = vld [vmem:[#allocation3 + $0x804] ss:$16 sps:$4 sm:$0xff]  }
 0x551   : > { %5166 = vmatpush1.bf16.msra.mxu1 %v11521_v34  ;;  %5126 = vmatprep.subr.bf16.mxu0 %v11526_v39  ;;  %v5207_v34 = vld [vmem:[#allocation2 + $0x38] sm:$0x3]  ;;  %v11601_v39 = vld [vmem:[#allocation3 + $0xa04] ss:$16 sps:$4 sm:$0xff]  }
 0x552   : > { %5167 = vmatprep.subr.bf16.mxu1 %v11529_v40  ;;  %v5209_v40 = vpack.c.bf16 %v5205_v29, %v5201_v23  ;;  %v11647_v23 = vld [vmem:[#allocation3 + $0xb00] ss:$16 sps:$4 sm:$0xff]   ;;  %v11655_v29 = vld [vmem:[#allocation3 + $0xb24] ss:$16 sps:$4 sm:$0xff]  }
 0x554   : > { %5127 = vmatpush1.bf16.msra.mxu0 %v11524_v10  ;;  %v11596_v10 = vld [vmem:[#allocation3 + $0x800] ss:$16 sps:$4 sm:$0xff]  }
 0x555   : > { %5168 = vmatpush1.bf16.msra.mxu1 %v11527_v42  ;;  %5128 = vmatprep.subr.bf16.mxu0 %v11532_v43  ;;  %v5211_v42 = vpack.c.bf16 %v5207_v34, %v5203_v32  ;;  %v11599_v43 = vld [vmem:[#allocation3 + $0xa00] ss:$16 sps:$4 sm:$0xff]   ;;  %v11661_v34 = vld [vmem:[#allocation3 + $0xb44] ss:$16 sps:$4 sm:$0xff]  }
 0x556   : > { %5169 = vmatprep.subr.bf16.mxu1 %v11535_v45  ;;  %v11604_v45 = vld [vmem:[#allocation3 + $0x824] ss:$16 sps:$4 sm:$0xff]   ;;  %v11650_v32 = vld [vmem:[#allocation3 + $0x920] ss:$16 sps:$4 sm:$0xff]  }
 0x558   : > { %5129 = vmatpush1.bf16.msra.mxu0 %v11530_v47  ;;  %v12836_v47 = vrot.slane %v5209_v40, 1  ;;  %v11659_v40 = vld [vmem:[#allocation3 + $0xb40] ss:$16 sps:$4 sm:$0xff]  }
 0x559   : > { %5170 = vmatpush1.bf16.msra.mxu1 %v11533_v49  ;;  %5130 = vmatprep.subr.bf16.mxu0 %v11538_v50  ;;  %v11607_v49 = vld [vmem:[#allocation3 + $0xa24] ss:$16 sps:$4 sm:$0xff]   ;;  %v12839_v50 = vrot.slane %v5211_v42, 1 }
 0x55a   : > { %5171 = vmatprep.subr.bf16.mxu1 %v11541_v35  ;;  %v11602_v35 = vld [vmem:[#allocation3 + $0x820] ss:$16 sps:$4 sm:$0xff]   ;;  %v11667_v42 = vld [vmem:[#allocation3 + $0xb64] ss:$16 sps:$4 sm:$0xff]  }
 0x55c   : > { %5131 = vmatpush1.bf16.msra.mxu0 %v11536_v58  ;;  %v11605_v58 = vld [vmem:[#allocation3 + $0xa20] ss:$16 sps:$4 sm:$0xff]  }
 0x55d   : > { %5172 = vmatpush1.bf16.msra.mxu1 %v11539_v60  ;;  %5132 = vmatprep.subr.bf16.mxu0 %v11544_v44  ;;  %v11610_v60 = vld [vmem:[#allocation3 + $0x844] ss:$16 sps:$4 sm:$0xff]  }
 0x55e   : > { %5173 = vmatprep.subr.bf16.mxu1 %v11547_v12  ;;  %v11613_v44 = vld [vmem:[#allocation3 + $0xa44] ss:$16 sps:$4 sm:$0xff]   ;;  %v11611_v12 = vld [vmem:[#allocation3 + $0xa40] ss:$16 sps:$4 sm:$0xff]  }
 0x560   : > { %5133 = vmatpush1.bf16.msra.mxu0 %v11542_v54  ;;  %v11619_v54 = vld [vmem:[#allocation3 + $0xa64] ss:$16 sps:$4 sm:$0xff]  }
 0x561   : > { %5174 = vmatpush1.bf16.msra.mxu1 %v11545_v36  ;;  %5134 = vmatprep.subr.bf16.mxu0 %v11550_v37  ;;  %v11614_v36 = vld [vmem:[#allocation3 + $0x860] ss:$16 sps:$4 sm:$0xff]  }
 0x562   : > { %5175 = vmatprep.subr.bf16.mxu1 %v11553_v63  ;;  %v11617_v37 = vld [vmem:[#allocation3 + $0xa60] ss:$16 sps:$4 sm:$0xff]   ;;  %v11622_v63 = vld [vmem:[#allocation3 + $0x884] ss:$16 sps:$4 sm:$0xff]  }
 0x564   : > { %5135 = vmatpush1.bf16.msra.mxu0 %v11548_v27  ;;  %v11625_v27 = vld [vmem:[#allocation3 + $0xa84] ss:$16 sps:$4 sm:$0xff]  }
 0x565   : > { %5176 = vmatpush1.bf16.msra.mxu1 %v11551_v55  ;;  %5136 = vmatprep.subr.bf16.mxu0 %v11556_v0  ;;  %v11620_v55 = vld [vmem:[#allocation3 + $0x880] ss:$16 sps:$4 sm:$0xff]  }
 0x566   : > { %5177 = vmatprep.subr.bf16.mxu1 %v11559_v3  ;;  %v11623_v0 = vld [vmem:[#allocation3 + $0xa80] ss:$16 sps:$4 sm:$0xff]   ;;  %v11628_v3 = vld [vmem:[#allocation3 + $0x8a4] ss:$16 sps:$4 sm:$0xff]  }
 0x568   : > { %5137 = vmatpush1.bf16.msra.mxu0 %v11554_v30  ;;  %v11631_v30 = vld [vmem:[#allocation3 + $0xaa4] ss:$16 sps:$4 sm:$0xff]  }
 0x569   : > { %5178 = vmatpush1.bf16.msra.mxu1 %v11557_v51  ;;  %5138 = vmatprep.subr.bf16.mxu0 %v11562_v4  ;;  %v11626_v51 = vld [vmem:[#allocation3 + $0x8a0] ss:$16 sps:$4 sm:$0xff]  }
 0x56a   : > { %5179 = vmatprep.subr.bf16.mxu1 %v11565_v5  ;;  %v11629_v4 = vld [vmem:[#allocation3 + $0xaa0] ss:$16 sps:$4 sm:$0xff]   ;;  %v11634_v5 = vld [vmem:[#allocation3 + $0x8c4] ss:$16 sps:$4 sm:$0xff]  }
 0x56c   : > { %5139 = vmatpush1.bf16.msra.mxu0 %v11560_v53 }
 0x56d   : > { %5180 = vmatpush1.bf16.msra.mxu1 %v11563_v6  ;;  %5140 = vmatprep.subr.bf16.mxu0 %v11568_v8  ;;  %v11637_v6 = vld [vmem:[#allocation3 + $0xac4] ss:$16 sps:$4 sm:$0xff]  }
 0x56e   : > { %5181 = vmatprep.subr.bf16.mxu1 %v11571_v9 }
 0x570   : > { %5141 = vmatpush1.bf16.msra.mxu0 %v11566_v11 }
 0x571   : > { %5182 = vmatpush1.bf16.msra.mxu1 %v11569_v41  ;;  %5142 = vmatprep.subr.bf16.mxu0 %v11574_v56 }
 0x572   : > { %5183 = vmatprep.subr.bf16.mxu1 %v11577_v13  ;;  %v11632_v13 = vld [vmem:[#allocation3 + $0x8c0] ss:$16 sps:$4 sm:$0xff]  }
 0x574   : > { %5143 = vmatpush1.bf16.msra.mxu0 %v11572_v48 }
 0x575   : > { %5184 = vmatpush1.bf16.msra.mxu1 %v11575_v14  ;;  %5144 = vmatprep.subr.bf16.mxu0 %v11580_v62 }
 0x576   : > { %5185 = vmatprep.subr.bf16.mxu1 %v11583_v15  ;;  %v11635_v15 = vld [vmem:[#allocation3 + $0xac0] ss:$16 sps:$4 sm:$0xff]  }
 0x578   : > { %5145 = vmatpush1.bf16.msra.mxu0 %v11578_v16  ;;  %v11640_v16 = vld [vmem:[#allocation3 + $0x8e4] ss:$16 sps:$4 sm:$0xff]  }
 0x579   : > { %5186 = vmatpush1.bf16.msra.mxu1 %v11581_v17  ;;  %5146 = vmatprep.subr.bf16.mxu0 %v11586_v61  ;;  %v11643_v61 = vld [vmem:[#allocation3 + $0xae4] ss:$16 sps:$4 sm:$0xff]  }
 0x57a   : > { %5187 = vmatprep.subr.bf16.mxu1 %v11589_v2  ;;  %v11638_v2 = vld [vmem:[#allocation3 + $0x8e0] ss:$16 sps:$4 sm:$0xff]  }
 0x57c   : > { %5147 = vmatpush1.bf16.msra.mxu0 %v11584_v19  ;;  %v11641_v19 = vld [vmem:[#allocation3 + $0xae0] ss:$16 sps:$4 sm:$0xff]  }
 0x57d   : > { %5188 = vmatpush1.bf16.msra.mxu1 %v11587_v20  ;;  %5148 = vmatprep.subr.bf16.mxu0 %v11592_v21  ;;  %v11646_v20 = vld [vmem:[#allocation3 + $0x904] ss:$16 sps:$4 sm:$0xff]  }
 0x57e   : > { %5189 = vmatprep.subr.bf16.mxu1 %v11595_v7  ;;  %v11649_v21 = vld [vmem:[#allocation3 + $0xb04] ss:$16 sps:$4 sm:$0xff]   ;;  %v11644_v7 = vld [vmem:[#allocation3 + $0x900] ss:$16 sps:$4 sm:$0xff]  }
 0x580   : > { %5149 = vmatpush1.bf16.msra.mxu0 %v11590_v24  ;;  %v11652_v24 = vld [vmem:[#allocation3 + $0x924] ss:$16 sps:$4 sm:$0xff]  }
 0x581   : > { %5190 = vmatpush1.bf16.msra.mxu1 %v11593_v33  ;;  %5992 = vmatprep.subr.bf16.mxu0 %v11598_v38  ;;  %v11653_v33 = vld [vmem:[#allocation3 + $0xb20] ss:$16 sps:$4 sm:$0xff]   ;;  %v11658_v38 = vld [vmem:[#allocation3 + $0x944] ss:$16 sps:$4 sm:$0xff]  }
 0x582   : > { %6033 = vmatprep.subr.bf16.mxu1 %v11601_v39  ;;  %v11656_v39 = vld [vmem:[#allocation3 + $0x940] ss:$16 sps:$4 sm:$0xff]  }
 0x583   : > { %5151 = vmatmul.mubr.bf16.vlgmr.msra.gmra.mrb[36].mxu0 %v12827_v18  ;;  %v11608_v18 = vld [vmem:[#allocation3 + $0x840] ss:$16 sps:$4 sm:$0xff]  }
 0x584   : > { %5192 = vmatmul.mubr.bf16.vlgmr.msra.gmra.mrb[36].mxu1 %v12829_v52  ;;  %5993 = vmatpush1.bf16.msra.mxu0 %v11596_v10  ;;  %v11616_v52 = vld [vmem:[#allocation3 + $0x864] ss:$16 sps:$4 sm:$0xff]  }
 0x585   : > { %6024 = vmatprep.mubr.bf16.mxu0 %v12836_v47  ;;  %6034 = vmatpush1.bf16.msra.mxu1 %v11599_v43  ;;  %v11664_v10 = vld [vmem:[#allocation3 + $0x964] ss:$16 sps:$4 sm:$0xff]   ;;  %v11662_v43 = vld [vmem:[#allocation3 + $0x960] ss:$16 sps:$4 sm:$0xff]  }
 0x586   : > { %6065 = vmatprep.mubr.bf16.mxu1 %v12839_v50  ;;  %5994 = vmatprep.subr.bf16.mxu0 %v11604_v45  ;;  %v11665_v45 = vld [vmem:[#allocation3 + $0xb60] ss:$16 sps:$4 sm:$0xff]  }
 0x587   : > { %6035 = vmatprep.subr.bf16.mxu1 %v11607_v49  ;;  %v11670_v49 = vld [vmem:[#allocation3 + $0x984] ss:$16 sps:$4 sm:$0xff]  }
 0x588   : > { %5995 = vmatpush1.bf16.msra.mxu0 %v11602_v35  ;;  %v11673_v35 = vld [vmem:[#allocation3 + $0xb84] ss:$16 sps:$4 sm:$0xff]  }
 0x589   : > { %6036 = vmatpush1.bf16.msra.mxu1 %v11605_v58  ;;  %5996 = vmatprep.subr.bf16.mxu0 %v11610_v60  ;;  %v11668_v58 = vld [vmem:[#allocation3 + $0x980] ss:$16 sps:$4 sm:$0xff]  }
 0x58a   : > { %6037 = vmatprep.subr.bf16.mxu1 %v11613_v44  ;;  %v11671_v60 = vld [vmem:[#allocation3 + $0xb80] ss:$16 sps:$4 sm:$0xff]   ;;  %v11676_v44 = vld [vmem:[#allocation3 + $0x9a4] ss:$16 sps:$4 sm:$0xff]  }
 0x58c   : > { %5997 = vmatpush1.bf16.msra.mxu0 %v11608_v18  ;;  %v11679_v18 = vld [vmem:[#allocation3 + $0xba4] ss:$16 sps:$4 sm:$0xff]  }
 0x58d   : > { %6038 = vmatpush1.bf16.msra.mxu1 %v11611_v12  ;;  %5998 = vmatprep.subr.bf16.mxu0 %v11616_v52  ;;  %v11674_v12 = vld [vmem:[#allocation3 + $0x9a0] ss:$16 sps:$4 sm:$0xff]  }
 0x58e   : > { %6039 = vmatprep.subr.bf16.mxu1 %v11619_v54  ;;  %v11677_v52 = vld [vmem:[#allocation3 + $0xba0] ss:$16 sps:$4 sm:$0xff]   ;;  %v11682_v54 = vld [vmem:[#allocation3 + $0x9c4] ss:$16 sps:$4 sm:$0xff]  }
 0x590   : > { %5999 = vmatpush1.bf16.msra.mxu0 %v11614_v36  ;;  %v11685_v36 = vld [vmem:[#allocation3 + $0xbc4] ss:$16 sps:$4 sm:$0xff]  }
 0x591   : > { %6040 = vmatpush1.bf16.msra.mxu1 %v11617_v37  ;;  %6000 = vmatprep.subr.bf16.mxu0 %v11622_v63  ;;  %v11680_v37 = vld [vmem:[#allocation3 + $0x9c0] ss:$16 sps:$4 sm:$0xff]  }
 0x592   : > { %6041 = vmatprep.subr.bf16.mxu1 %v11625_v27  ;;  %v11683_v63 = vld [vmem:[#allocation3 + $0xbc0] ss:$16 sps:$4 sm:$0xff]   ;;  %v11688_v27 = vld [vmem:[#allocation3 + $0x9e4] ss:$16 sps:$4 sm:$0xff]  }
 0x594   : > { %6001 = vmatpush1.bf16.msra.mxu0 %v11620_v55  ;;  %v11691_v55 = vld [vmem:[#allocation3 + $0xbe4] ss:$16 sps:$4 sm:$0xff]  }
 0x595   : > { %6042 = vmatpush1.bf16.msra.mxu1 %v11623_v0  ;;  %6002 = vmatprep.subr.bf16.mxu0 %v11628_v3  ;;  %v5200_v0 = vld [vmem:[#allocation2] sm:$0xfc]  ;;  %v5204_v3 = vld [vmem:[#allocation2 + $0x20] sm:$0x3] }
 0x596   : > { %v4266_v53 = vpop.f32.mrb[24].mxu0  ;;  %6043 = vmatprep.subr.bf16.mxu1 %v11631_v30  ;;  %v5202_v30 = vld [vmem:[#allocation2 + $0x10] sm:$0xfc] }
 0x597   : > { %v4307_v8 = vpop.f32.mrb[24].mxu1  ;;  %v4268_v9 = vpop.f32.mrb[25].mxu0 }
 0x598   : > { %v12843_v11 = vadd.f32 %v4307_v8, %v4266_v53  ;;  %v4309_v41 = vpop.f32.mrb[25].mxu1  ;;  %6003 = vmatpush1.bf16.msra.mxu0 %v11626_v51  ;;  %v4270_v56 = vpop.f32.mrb[26].mxu0  ;;  %v5206_v51 = vld [vmem:[#allocation2 + $0x30] sm:$0x3]  ;;  %v5208_v53 = vpack.c.bf16 %v5204_v3, %v5200_v0  ;;  %v11745_v0 = vld [vmem:[#allocation3 + $0xb0c] ss:$16 sps:$4 sm:$0xff]  }
 0x599   : > { %v12845_v48 = vadd.f32 %v4309_v41, %v4268_v9  ;;  %6044 = vmatpush1.bf16.msra.mxu1 %v11629_v4  ;;  %v4311_v14 = vpop.f32.mrb[26].mxu1  ;;  %v4271_v62 = vpop.f32.mrb[27].mxu0  ;;  %6004 = vmatprep.subr.bf16.mxu0 %v11634_v5  ;;  %v11686_v4 = vld [vmem:[#allocation3 + $0x9e0] ss:$16 sps:$4 sm:$0xff]   ;;  %v5210_v8 = vpack.c.bf16 %v5206_v51, %v5202_v30  ;;  %v11697_v9 = vld [vmem:[#allocation3 + $0xa0c] ss:$16 sps:$4 sm:$0xff]  }
 0x59a   : > { %v4312_v17 = vpop.f32.mrb[27].mxu1  ;;  %6045 = vmatprep.subr.bf16.mxu1 %v11637_v6  ;;  %v11689_v5 = vld [vmem:[#allocation3 + $0xbe0] ss:$16 sps:$4 sm:$0xff]   ;;  %v11694_v6 = vld [vmem:[#allocation3 + $0x80c] ss:$16 sps:$4 sm:$0xff]   ;;  %v12847_v56 = vrot.slane %v5208_v53, 1 }
 0x59b   : > { %v11692_v41 = vld [vmem:[#allocation3 + $0x808] ss:$16 sps:$4 sm:$0xff]   ;;  %v12849_v14 = vrot.slane %v5210_v8, 1  ;;  %v11700_v62 = vld [vmem:[#allocation3 + $0x82c] ss:$16 sps:$4 sm:$0xff]  }
 0x59c   : > { %6005 = vmatpush1.bf16.msra.mxu0 %v11632_v13  ;;  %v11695_v13 = vld [vmem:[#allocation3 + $0xa08] ss:$16 sps:$4 sm:$0xff]   ;;  %v11748_v51 = vld [vmem:[#allocation3 + $0x92c] ss:$16 sps:$4 sm:$0xff]  }
 0x59d   : > { %6046 = vmatpush1.bf16.msra.mxu1 %v11635_v15  ;;  %6006 = vmatprep.subr.bf16.mxu0 %v11640_v16  ;;  %v11703_v15 = vld [vmem:[#allocation3 + $0xa2c] ss:$16 sps:$4 sm:$0xff]   ;;  %v11698_v16 = vld [vmem:[#allocation3 + $0x828] ss:$16 sps:$4 sm:$0xff]  }
 0x59e   : > { %6047 = vmatprep.subr.bf16.mxu1 %v11643_v61  ;;  %v11701_v17 = vld [vmem:[#allocation3 + $0xa28] ss:$16 sps:$4 sm:$0xff]   ;;  %v11706_v61 = vld [vmem:[#allocation3 + $0x84c] ss:$16 sps:$4 sm:$0xff]  }
 0x59f   : > { %v11740_v3 = vld [vmem:[#allocation3 + $0x908] ss:$16 sps:$4 sm:$0xff]   ;;  %v11757_v8 = vld [vmem:[#allocation3 + $0xb4c] ss:$16 sps:$4 sm:$0xff]  }
 0x5a0   : > { %6007 = vmatpush1.bf16.msra.mxu0 %v11638_v2  ;;  %v11709_v2 = vld [vmem:[#allocation3 + $0xa4c] ss:$16 sps:$4 sm:$0xff]   ;;  %v11743_v30 = vld [vmem:[#allocation3 + $0xb08] ss:$16 sps:$4 sm:$0xff]  }
 0x5a1   : > { %6048 = vmatpush1.bf16.msra.mxu1 %v11641_v19  ;;  %6008 = vmatprep.subr.bf16.mxu0 %v11646_v20  ;;  %v11704_v19 = vld [vmem:[#allocation3 + $0x848] ss:$16 sps:$4 sm:$0xff]  }
 0x5a2   : > { %6049 = vmatprep.subr.bf16.mxu1 %v11649_v21  ;;  %v11707_v20 = vld [vmem:[#allocation3 + $0xa48] ss:$16 sps:$4 sm:$0xff]   ;;  %v11712_v21 = vld [vmem:[#allocation3 + $0x86c] ss:$16 sps:$4 sm:$0xff]  }
 0x5a3   : > { %v11749_v53 = vld [vmem:[#allocation3 + $0xb28] ss:$16 sps:$4 sm:$0xff]  }
 0x5a4   : > { %6009 = vmatpush1.bf16.msra.mxu0 %v11644_v7  ;;  %v11715_v7 = vld [vmem:[#allocation3 + $0xa6c] ss:$16 sps:$4 sm:$0xff]  }
 0x5a5   : > { %6050 = vmatpush1.bf16.msra.mxu1 %v11647_v23  ;;  %6010 = vmatprep.subr.bf16.mxu0 %v11652_v24  ;;  %v11710_v23 = vld [vmem:[#allocation3 + $0x868] ss:$16 sps:$4 sm:$0xff]   ;;  %v11718_v24 = vld [vmem:[#allocation3 + $0x88c] ss:$16 sps:$4 sm:$0xff]  }
 0x5a6   : > { %6051 = vmatprep.subr.bf16.mxu1 %v11655_v29  ;;  %v11721_v29 = vld [vmem:[#allocation3 + $0xa8c] ss:$16 sps:$4 sm:$0xff]  }
 0x5a8   : > { %6011 = vmatpush1.bf16.msra.mxu0 %v11650_v32  ;;  %v11719_v32 = vld [vmem:[#allocation3 + $0xa88] ss:$16 sps:$4 sm:$0xff]  }
 0x5a9   : > { %6052 = vmatpush1.bf16.msra.mxu1 %v11653_v33  ;;  %6012 = vmatprep.subr.bf16.mxu0 %v11658_v38  ;;  %v11724_v33 = vld [vmem:[#allocation3 + $0x8ac] ss:$16 sps:$4 sm:$0xff]  }
 0x5aa   : > { %6053 = vmatprep.subr.bf16.mxu1 %v11661_v34  ;;  %v11727_v38 = vld [vmem:[#allocation3 + $0xaac] ss:$16 sps:$4 sm:$0xff]   ;;  %v11722_v34 = vld [vmem:[#allocation3 + $0x8a8] ss:$16 sps:$4 sm:$0xff]  }
 0x5ac   : > { %6013 = vmatpush1.bf16.msra.mxu0 %v11656_v39  ;;  %v11725_v39 = vld [vmem:[#allocation3 + $0xaa8] ss:$16 sps:$4 sm:$0xff]  }
 0x5ad   : > { %6054 = vmatpush1.bf16.msra.mxu1 %v11659_v40  ;;  %6014 = vmatprep.subr.bf16.mxu0 %v11664_v10  ;;  %v11730_v40 = vld [vmem:[#allocation3 + $0x8cc] ss:$16 sps:$4 sm:$0xff]  }
 0x5ae   : > { %6055 = vmatprep.subr.bf16.mxu1 %v11667_v42  ;;  %v11733_v42 = vld [vmem:[#allocation3 + $0xacc] ss:$16 sps:$4 sm:$0xff]  }
 0x5b0   : > { %6015 = vmatpush1.bf16.msra.mxu0 %v11662_v43 }
 0x5b1   : > { %6056 = vmatpush1.bf16.msra.mxu1 %v11665_v45  ;;  %6016 = vmatprep.subr.bf16.mxu0 %v11670_v49 }
 0x5b2   : > { %6057 = vmatprep.subr.bf16.mxu1 %v11673_v35 }
 0x5b4   : > { %6017 = vmatpush1.bf16.msra.mxu0 %v11668_v58 }
 0x5b5   : > { %6058 = vmatpush1.bf16.msra.mxu1 %v11671_v60  ;;  %6018 = vmatprep.subr.bf16.mxu0 %v11676_v44  ;;  %v11728_v60 = vld [vmem:[#allocation3 + $0x8c8] ss:$16 sps:$4 sm:$0xff]  }
 0x5b6   : > { %6059 = vmatprep.subr.bf16.mxu1 %v11679_v18 }
 0x5b8   : > { %6019 = vmatpush1.bf16.msra.mxu0 %v11674_v12 }
 0x5b9   : > { %6060 = vmatpush1.bf16.msra.mxu1 %v11677_v52  ;;  %6020 = vmatprep.subr.bf16.mxu0 %v11682_v54  ;;  %v11731_v52 = vld [vmem:[#allocation3 + $0xac8] ss:$16 sps:$4 sm:$0xff]   ;;  %v11736_v54 = vld [vmem:[#allocation3 + $0x8ec] ss:$16 sps:$4 sm:$0xff]  }
 0x5ba   : > { %6061 = vmatprep.subr.bf16.mxu1 %v11685_v36 }
 0x5bc   : > { %6021 = vmatpush1.bf16.msra.mxu0 %v11680_v37  ;;  %v11739_v37 = vld [vmem:[#allocation3 + $0xaec] ss:$16 sps:$4 sm:$0xff]  }
 0x5bd   : > { %6062 = vmatpush1.bf16.msra.mxu1 %v11683_v63  ;;  %6022 = vmatprep.subr.bf16.mxu0 %v11688_v27  ;;  %v11734_v63 = vld [vmem:[#allocation3 + $0x8e8] ss:$16 sps:$4 sm:$0xff]  }
 0x5be   : > { %6063 = vmatprep.subr.bf16.mxu1 %v11691_v55  ;;  %v11737_v27 = vld [vmem:[#allocation3 + $0xae8] ss:$16 sps:$4 sm:$0xff]   ;;  %v11742_v55 = vld [vmem:[#allocation3 + $0x90c] ss:$16 sps:$4 sm:$0xff]  }
 0x5c0   : > { %6023 = vmatpush1.bf16.msra.mxu0 %v11686_v4  ;;  %v11751_v4 = vld [vmem:[#allocation3 + $0xb2c] ss:$16 sps:$4 sm:$0xff]  }
 0x5c1   : > { %6064 = vmatpush1.bf16.msra.mxu1 %v11689_v5  ;;  %6074 = vmatprep.subr.bf16.mxu0 %v11694_v6  ;;  %v11746_v5 = vld [vmem:[#allocation3 + $0x928] ss:$16 sps:$4 sm:$0xff]   ;;  %v11754_v6 = vld [vmem:[#allocation3 + $0x94c] ss:$16 sps:$4 sm:$0xff]  }
 0x5c2   : > { %6115 = vmatprep.subr.bf16.mxu1 %v11697_v9  ;;  %v11752_v9 = vld [vmem:[#allocation3 + $0x948] ss:$16 sps:$4 sm:$0xff]  }
 0x5c3   : > { %6025 = vmatmul.mubr.bf16.vlgmr.msra.gmra.mrb[40].mxu0 %v12847_v56 }
 0x5c4   : > { %6066 = vmatmul.mubr.bf16.vlgmr.msra.gmra.mrb[40].mxu1 %v12849_v14  ;;  %6075 = vmatpush1.bf16.msra.mxu0 %v11692_v41  ;;  %v11755_v41 = vld [vmem:[#allocation3 + $0xb48] ss:$16 sps:$4 sm:$0xff]  }
 0x5c5   : > { %6106 = vmatprep.mubr.bf16.mxu0 %v12836_v47  ;;  %6116 = vmatpush1.bf16.msra.mxu1 %v11695_v13  ;;  %v11713_v47 = vld [vmem:[#allocation3 + $0xa68] ss:$16 sps:$4 sm:$0xff]   ;;  %v11760_v13 = vld [vmem:[#allocation3 + $0x96c] ss:$16 sps:$4 sm:$0xff]  }
 0x5c6   : > { %6147 = vmatprep.mubr.bf16.mxu1 %v12839_v50  ;;  %6076 = vmatprep.subr.bf16.mxu0 %v11700_v62  ;;  %v11716_v50 = vld [vmem:[#allocation3 + $0x888] ss:$16 sps:$4 sm:$0xff]   ;;  %v11763_v62 = vld [vmem:[#allocation3 + $0xb6c] ss:$16 sps:$4 sm:$0xff]  }
 0x5c7   : > { %6117 = vmatprep.subr.bf16.mxu1 %v11703_v15  ;;  %v11758_v15 = vld [vmem:[#allocation3 + $0x968] ss:$16 sps:$4 sm:$0xff]  }
 0x5c8   : > { %6077 = vmatpush1.bf16.msra.mxu0 %v11698_v16  ;;  %v11761_v16 = vld [vmem:[#allocation3 + $0xb68] ss:$16 sps:$4 sm:$0xff]  }
 0x5c9   : > { %6118 = vmatpush1.bf16.msra.mxu1 %v11701_v17  ;;  %6078 = vmatprep.subr.bf16.mxu0 %v11706_v61  ;;  %v11766_v17 = vld [vmem:[#allocation3 + $0x98c] ss:$16 sps:$4 sm:$0xff]  }
 0x5ca   : > { %6119 = vmatprep.subr.bf16.mxu1 %v11709_v2  ;;  %v11769_v61 = vld [vmem:[#allocation3 + $0xb8c] ss:$16 sps:$4 sm:$0xff]   ;;  %v11764_v2 = vld [vmem:[#allocation3 + $0x988] ss:$16 sps:$4 sm:$0xff]  }
 0x5cc   : > { %6079 = vmatpush1.bf16.msra.mxu0 %v11704_v19  ;;  %v11767_v19 = vld [vmem:[#allocation3 + $0xb88] ss:$16 sps:$4 sm:$0xff]  }
 0x5cd   : > { %6120 = vmatpush1.bf16.msra.mxu1 %v11707_v20  ;;  %6080 = vmatprep.subr.bf16.mxu0 %v11712_v21  ;;  %v11772_v20 = vld [vmem:[#allocation3 + $0x9ac] ss:$16 sps:$4 sm:$0xff]  }
 0x5ce   : > { %6121 = vmatprep.subr.bf16.mxu1 %v11715_v7  ;;  %v11775_v21 = vld [vmem:[#allocation3 + $0xbac] ss:$16 sps:$4 sm:$0xff]   ;;  %v11770_v7 = vld [vmem:[#allocation3 + $0x9a8] ss:$16 sps:$4 sm:$0xff]  }
 0x5d0   : > { %6081 = vmatpush1.bf16.msra.mxu0 %v11710_v23  ;;  %v11773_v23 = vld [vmem:[#allocation3 + $0xba8] ss:$16 sps:$4 sm:$0xff]  }
 0x5d1   : > { %6122 = vmatpush1.bf16.msra.mxu1 %v11713_v47  ;;  %6082 = vmatprep.subr.bf16.mxu0 %v11718_v24  ;;  %v11778_v47 = vld [vmem:[#allocation3 + $0x9cc] ss:$16 sps:$4 sm:$0xff]  }
 0x5d2   : > { %6123 = vmatprep.subr.bf16.mxu1 %v11721_v29  ;;  %v11781_v24 = vld [vmem:[#allocation3 + $0xbcc] ss:$16 sps:$4 sm:$0xff]   ;;  %v11776_v29 = vld [vmem:[#allocation3 + $0x9c8] ss:$16 sps:$4 sm:$0xff]  }
 0x5d4   : > { %6083 = vmatpush1.bf16.msra.mxu0 %v11716_v50  ;;  %v11779_v50 = vld [vmem:[#allocation3 + $0xbc8] ss:$16 sps:$4 sm:$0xff]  }
 0x5d5   : > { %6124 = vmatpush1.bf16.msra.mxu1 %v11719_v32  ;;  %6084 = vmatprep.subr.bf16.mxu0 %v11724_v33  ;;  %v11784_v32 = vld [vmem:[#allocation3 + $0x9ec] ss:$16 sps:$4 sm:$0xff]  }
 0x5d6   : > { %v4348_v10 = vpop.f32.mrb[28].mxu0  ;;  %6125 = vmatprep.subr.bf16.mxu1 %v11727_v38  ;;  %v11787_v33 = vld [vmem:[#allocation3 + $0xbec] ss:$16 sps:$4 sm:$0xff]   ;;  %v11782_v38 = vld [vmem:[#allocation3 + $0x9e8] ss:$16 sps:$4 sm:$0xff]  }
 0x5d7   : > { %v4389_v43 = vpop.f32.mrb[28].mxu1  ;;  %v4350_v45 = vpop.f32.mrb[29].mxu0 }
 0x5d8   : > { %v12855_v49 = vadd.f32 %v4389_v43, %v4348_v10  ;;  %v4391_v35 = vpop.f32.mrb[29].mxu1  ;;  %v4352_v58 = vpop.f32.mrb[30].mxu0  ;;  %6085 = vmatpush1.bf16.msra.mxu0 %v11722_v34  ;;  %v11785_v34 = vld [vmem:[#allocation3 + $0xbe8] ss:$16 sps:$4 sm:$0xff]  }
 0x5d9   : > { %v12857_v44 = vadd.f32 %v4391_v35, %v4350_v45  ;;  %v4393_v18 = vpop.f32.mrb[30].mxu1  ;;  %6126 = vmatpush1.bf16.msra.mxu1 %v11725_v39  ;;  %v4353_v12 = vpop.f32.mrb[31].mxu0  ;;  %6086 = vmatprep.subr.bf16.mxu0 %v11730_v40 }
 0x5da   : > { %v4394_v36 = vpop.f32.mrb[31].mxu1  ;;  %6127 = vmatprep.subr.bf16.mxu1 %v11733_v42 }
 0x5dc   : > { %6087 = vmatpush1.bf16.msra.mxu0 %v11728_v60 }
 0x5dd   : > { %6128 = vmatpush1.bf16.msra.mxu1 %v11731_v52  ;;  %6088 = vmatprep.subr.bf16.mxu0 %v11736_v54 }
 0x5de   : > { %6129 = vmatprep.subr.bf16.mxu1 %v11739_v37 }
 0x5e0   : > { %6089 = vmatpush1.bf16.msra.mxu0 %v11734_v63 }
 0x5e1   : > { %6130 = vmatpush1.bf16.msra.mxu1 %v11737_v27  ;;  %6090 = vmatprep.subr.bf16.mxu0 %v11742_v55 }
 0x5e2   : > { %6131 = vmatprep.subr.bf16.mxu1 %v11745_v0 }
 0x5e4   : > { %6091 = vmatpush1.bf16.msra.mxu0 %v11740_v3 }
 0x5e5   : > { %6132 = vmatpush1.bf16.msra.mxu1 %v11743_v30  ;;  %6092 = vmatprep.subr.bf16.mxu0 %v11748_v51 }
 0x5e6   : > { %6133 = vmatprep.subr.bf16.mxu1 %v11751_v4 }
 0x5e8   : > { %6093 = vmatpush1.bf16.msra.mxu0 %v11746_v5 }
 0x5e9   : > { %6134 = vmatpush1.bf16.msra.mxu1 %v11749_v53  ;;  %6094 = vmatprep.subr.bf16.mxu0 %v11754_v6 }
 0x5ea   : > { %6135 = vmatprep.subr.bf16.mxu1 %v11757_v8 }
 0x5ec   : > { %6095 = vmatpush1.bf16.msra.mxu0 %v11752_v9 }
 0x5ed   : > { %6136 = vmatpush1.bf16.msra.mxu1 %v11755_v41  ;;  %6096 = vmatprep.subr.bf16.mxu0 %v11760_v13 }
 0x5ee   : > { %6137 = vmatprep.subr.bf16.mxu1 %v11763_v62 }
 0x5f0   : > { %6097 = vmatpush1.bf16.msra.mxu0 %v11758_v15 }
 0x5f1   : > { %6138 = vmatpush1.bf16.msra.mxu1 %v11761_v16  ;;  %6098 = vmatprep.subr.bf16.mxu0 %v11766_v17 }
 0x5f2   : > { %6139 = vmatprep.subr.bf16.mxu1 %v11769_v61 }
 0x5f4   : > { %6099 = vmatpush1.bf16.msra.mxu0 %v11764_v2 }
 0x5f5   : > { %6140 = vmatpush1.bf16.msra.mxu1 %v11767_v19  ;;  %6100 = vmatprep.subr.bf16.mxu0 %v11772_v20 }
 0x5f6   : > { %6141 = vmatprep.subr.bf16.mxu1 %v11775_v21 }
 0x5f8   : > { %6101 = vmatpush1.bf16.msra.mxu0 %v11770_v7 }
 0x5f9   : > { %6142 = vmatpush1.bf16.msra.mxu1 %v11773_v23  ;;  %6102 = vmatprep.subr.bf16.mxu0 %v11778_v47 }
 0x5fa   : > { %6143 = vmatprep.subr.bf16.mxu1 %v11781_v24 }
 0x5fc   : > { %6103 = vmatpush1.bf16.msra.mxu0 %v11776_v29 }
 0x5fd   : > { %6144 = vmatpush1.bf16.msra.mxu1 %v11779_v50  ;;  %6104 = vmatprep.subr.bf16.mxu0 %v11784_v32 }
 0x5fe   : > { %6145 = vmatprep.subr.bf16.mxu1 %v11787_v33 }
 0x600   : > { %6105 = vmatpush1.bf16.msra.mxu0 %v11782_v38 }
 0x601   : > { %6146 = vmatpush1.bf16.msra.mxu1 %v11785_v34 }
 0x603   : > { %6107 = vmatmul.mubr.bf16.vlgmr.msra.gmra.mrb[44].mxu0 %v12847_v56 }
 0x604   : > { %6148 = vmatmul.mubr.bf16.vlgmr.msra.gmra.mrb[44].mxu1 %v12849_v14 }
 0x616   : > { %v5070_v39 = vpop.f32.mrb[32].mxu0 }
 0x617   : > { %v5071_v40 = vadd.f32 %v5070_v39, %v12843_v11  ;;  %v5111_v10 = vpop.f32.mrb[32].mxu1  ;;  %v5072_v42 = vpop.f32.mrb[33].mxu0 }
 0x618   : > { %v5073_v43 = vadd.f32 %v5072_v42, %v12845_v48  ;;  %v5113_v45 = vpop.f32.mrb[33].mxu1  ;;  %v5074_v35 = vpop.f32.mrb[34].mxu0 }
 0x619   : > { %v5112_v58 = vadd.f32 %v5111_v10, %v5071_v40  ;;  %v5115_v60 = vpop.f32.mrb[34].mxu1  ;;  %v5075_v18 = vpop.f32.mrb[35].mxu0 }
 0x61a   : > { %v5114_v12 = vadd.f32 %v5113_v45, %v5073_v43  ;;  %v5116_v52 = vpop.f32.mrb[35].mxu1 }
 0x656   : > { %v5152_v54 = vpop.f32.mrb[36].mxu0 }
 0x657   : > { %v5153_v36 = vadd.f32 %v5152_v54, %v12855_v49  ;;  %v5193_v56 = vpop.f32.mrb[36].mxu1  ;;  %v5154_v37 = vpop.f32.mrb[37].mxu0 }
 0x658   : > { %v5155_v14 = vadd.f32 %v5154_v37, %v12857_v44  ;;  %v5195_v63 = vpop.f32.mrb[37].mxu1  ;;  %v5156_v11 = vpop.f32.mrb[38].mxu0 }
 0x659   : > { %v5194_v27 = vadd.f32 %v5193_v56, %v5153_v36  ;;  %v5197_v55 = vpop.f32.mrb[38].mxu1  ;;  %v5157_v0 = vpop.f32.mrb[39].mxu0 }
 0x65a   : > { %v5196_v48 = vadd.f32 %v5195_v63, %v5155_v14  ;;  %v5198_v3 = vpop.f32.mrb[39].mxu1 }
 0x696   : > { %v6026_v30 = vpop.f32.mrb[40].mxu0 }
 0x697   : > { %v6067_v51 = vpop.f32.mrb[40].mxu1  ;;  %v6028_v4 = vpop.f32.mrb[41].mxu0 }
 0x698   : > { %v6068_v5 = vadd.f32 %v6067_v51, %v6026_v30  ;;  %v6069_v53 = vpop.f32.mrb[41].mxu1  ;;  %v6030_v6 = vpop.f32.mrb[42].mxu0 }
 0x699   : > { %v6070_v8 = vadd.f32 %v6069_v53, %v6028_v4  ;;  %v6071_v9 = vpop.f32.mrb[42].mxu1  ;;  %v6031_v49 = vpop.f32.mrb[43].mxu0 }
 0x69a   : > { %v6156_v41 = vadd.f32 %v6068_v5, %v5112_v58  ;;  %v6072_v13 = vpop.f32.mrb[43].mxu1 }
 0x69b   : > { %v6157_v62 = vadd.f32 %v6070_v8, %v5114_v12 }
 0x69c   : > { %v12866_v44 = vadd.f32 %v6156_v41, %v12735_v25 }
 0x69d   : > { %v12869_v15 = vadd.f32 %v6157_v62, %v12737_v26 }
 0x69e   : > { %v6188_v16 = vmul.f32 %v12866_v44, %v12866_v44  ;;  %v6164_v61 = vrot.slane %v12866_v44, 4 }
 0x69f   : > { %v6189_v17 = vmul.f32 %v12869_v15, %v12869_v15  ;;  %v6170_v2 = vrot.slane %v12869_v15, 4 }
 0x6a0   : > { %v6192_v20 = vrot.slane %v6188_v16, 4  ;;  %v6165_v50 = vadd.f32 %v6164_v61, %v12866_v44 }
 0x6a1   : > { %v6198_v23 = vrot.slane %v6189_v17, 4  ;;  %v6171_v34 = vadd.f32 %v6170_v2, %v12869_v15 }
 0x6a2   : > { %v6193_v10 = vadd.f32 %v6192_v20, %v6188_v16  ;;  %v6166_v35 = vrot.slane %v6165_v50, 2 }
 0x6a3   : > { %v6199_v43 = vadd.f32 %v6198_v23, %v6189_v17  ;;  %v6172_v60 = vrot.slane %v6171_v34, 2 }
 0x6a4   : > { %v6194_v52 = vrot.slane %v6193_v10, 2  ;;  %v6167_v37 = vadd.f32 %v6166_v35, %v6165_v50 }
 0x6a5   : > { %v6200_v56 = vrot.slane %v6199_v43, 2  ;;  %v6173_v11 = vadd.f32 %v6172_v60, %v6171_v34  ;;  %v11788_v60 = vld [vmem:[#allocation3 + $0x400] ss:$16 sps:$4 sm:$0xff]  }
 0x6a6   : > { %v6168_v5 = vrot.slane %v6167_v37, 1 }
 0x6a7   : > { %v6201_v51 = vadd.f32 %v6200_v56, %v6199_v43  ;;  %v6174_v8 = vrot.slane %v6173_v11, 1  ;;  %v11794_v56 = vld [vmem:[#allocation3 + $0x420] ss:$16 sps:$4 sm:$0xff]  }
 0x6a8   : > { %v6169_v2 = vadd.f32 %v6168_v5, %v6167_v37  ;;  %v11797_v37 = vld [vmem:[#allocation3 + $0x620] ss:$16 sps:$4 sm:$0xff]  }
 0x6a9   : > { %v6202_v17 = vrot.slane %v6201_v51, 1  ;;  %v11809_v5 = vld [vmem:[#allocation3 + $0x660] ss:$16 sps:$4 sm:$0xff]  }
 0x6d6   : > { %v6108_v19 = vpop.f32.mrb[44].mxu0 }
 0x6d7   : > { %v6149_v21 = vpop.f32.mrb[44].mxu1  ;;  %v6110_v7 = vpop.f32.mrb[45].mxu0 }
 0x6d8   : > { %v6150_v47 = vadd.f32 %v6149_v21, %v6108_v19  ;;  %v6151_v24 = vpop.f32.mrb[45].mxu1  ;;  %v6112_v29 = vpop.f32.mrb[46].mxu0  ;;  %v6175_v21 = vadd.f32 %v6174_v8, %v6173_v11  ;;  %v11815_v8 = vld [vmem:[#allocation3 + $0x680] ss:$16 sps:$4 sm:$0xff]  }
 0x6d9   : > { %v6152_v32 = vadd.f32 %v6151_v24, %v6110_v7  ;;  %v6153_v33 = vpop.f32.mrb[46].mxu1  ;;  %v6113_v38 = vpop.f32.mrb[47].mxu0 }
 0x6da   : > { %v6158_v39 = vadd.f32 %v6150_v47, %v5194_v27  ;;  %v6154_v40 = vpop.f32.mrb[47].mxu1 }
 0x6db   : > { %v6159_v42 = vadd.f32 %v6152_v32, %v5196_v48  ;;  %v6195_v48 = vadd.f32 %v6194_v52, %v6193_v10  ;;  %v6203_v32 = vadd.f32 %v6202_v17, %v6201_v51  ;;  %v11793_v52 = vld [vmem:[#allocation3 + $0x604] ss:$16 sps:$4 sm:$0xff]   ;;  %v11818_v17 = vld [vmem:[#allocation3 + $0x4a0] ss:$16 sps:$4 sm:$0xff]  }
 0x6dc   : > { %v12880_v45 = vadd.f32 %v6158_v39, %v12751_v46  ;;  %7293 = vmatprep.subr.bf16.mxu1 %v11793_v52  ;;  %v11811_v51 = vld [vmem:[#allocation3 + $0x664] ss:$16 sps:$4 sm:$0xff]   ;;  %v11857_v52 = vld [vmem:[#allocation3 + $0x760] ss:$16 sps:$4 sm:$0xff]  }
 0x6dd   : > { %v12883_v58 = vadd.f32 %v6159_v42, %v12754_v59  ;;  %v6196_v13 = vrot.slane %v6195_v48, 1 }
 0x6de   : > { %v6176_v18 = vrot.slane %v12880_v45, 4  ;;  %v6190_v12 = vmul.f32 %v12880_v45, %v12880_v45 }
 0x6df   : > { %v6182_v54 = vrot.slane %v12883_v58, 4  ;;  %v6191_v36 = vmul.f32 %v12883_v58, %v12883_v58  ;;  %v6197_v24 = vadd.f32 %v6196_v13, %v6195_v48  ;;  %v11803_v48 = vld [vmem:[#allocation3 + $0x640] ss:$16 sps:$4 sm:$0xff]   ;;  %v11820_v13 = vld [vmem:[#allocation3 + $0x4a4] ss:$16 sps:$4 sm:$0xff]  }
 0x6e0   : > { %v6177_v14 = vadd.f32 %v6176_v18, %v12880_v45  ;;  %v6204_v63 = vrot.slane %v6190_v12, 4  ;;  %v11790_v18 = vld [vmem:[#allocation3 + $0x404] ss:$16 sps:$4 sm:$0xff]  }
 0x6e1   : > { %v6183_v27 = vadd.f32 %v6182_v54, %v12883_v58  ;;  %v6210_v55 = vrot.slane %v6191_v36, 4  ;;  %v11796_v54 = vld [vmem:[#allocation3 + $0x424] ss:$16 sps:$4 sm:$0xff]   ;;  %7252 = vmatprep.subr.bf16.mxu0 %v11790_v18  ;;  %v11854_v18 = vld [vmem:[#allocation3 + $0x560] ss:$16 sps:$4 sm:$0xff]  }
 0x6e2   : > { %v6178_v0 = vrot.slane %v6177_v14, 2  ;;  %v6205_v3 = vadd.f32 %v6204_v63, %v6190_v12  ;;  %v11791_v12 = vld [vmem:[#allocation3 + $0x600] ss:$16 sps:$4 sm:$0xff]   ;;  %7253 = vmatpush1.bf16.msra.mxu0 %v11788_v60  ;;  %v11805_v63 = vld [vmem:[#allocation3 + $0x644] ss:$16 sps:$4 sm:$0xff]  }
 0x6e3   : > { %v6184_v30 = vrot.slane %v6183_v27, 2  ;;  %v6211_v4 = vadd.f32 %v6210_v55, %v6191_v36  ;;  %v11799_v36 = vld [vmem:[#allocation3 + $0x624] ss:$16 sps:$4 sm:$0xff]   ;;  %7294 = vmatpush1.bf16.msra.mxu1 %v11791_v12  ;;  %7254 = vmatprep.subr.bf16.mxu0 %v11796_v54  ;;  %v11800_v55 = vld [vmem:[#allocation3 + $0x440] ss:$16 sps:$4 sm:$0xff]  }
 0x6e4   : > { %v6179_v53 = vadd.f32 %v6178_v0, %v6177_v14  ;;  %v6206_v6 = vrot.slane %v6205_v3, 2  ;;  %v11802_v14 = vld [vmem:[#allocation3 + $0x444] ss:$16 sps:$4 sm:$0xff]   ;;  %7295 = vmatprep.subr.bf16.mxu1 %v11799_v36  ;;  %v11851_v60 = vld [vmem:[#allocation3 + $0x740] ss:$16 sps:$4 sm:$0xff]  }
 0x6e5   : > { %v6185_v9 = vadd.f32 %v6184_v30, %v6183_v27  ;;  %v6212_v49 = vrot.slane %v6211_v4, 2  ;;  %v11856_v12 = vld [vmem:[#allocation3 + $0x564] ss:$16 sps:$4 sm:$0xff]  }
 0x6e6   : > { %v6180_v41 = vrot.slane %v6179_v53, 1  ;;  %v6207_v62 = vadd.f32 %v6206_v6, %v6205_v3  ;;  %7255 = vmatpush1.bf16.msra.mxu0 %v11794_v56  ;;  %v11808_v3 = vld [vmem:[#allocation3 + $0x464] ss:$16 sps:$4 sm:$0xff]  }
 0x6e7   : > { %v6186_v16 = vrot.slane %v6185_v9, 1  ;;  %v6213_v61 = vadd.f32 %v6212_v49, %v6211_v4  ;;  %7296 = vmatpush1.bf16.msra.mxu1 %v11797_v37  ;;  %7256 = vmatprep.subr.bf16.mxu0 %v11802_v14  ;;  %v11806_v4 = vld [vmem:[#allocation3 + $0x460] ss:$16 sps:$4 sm:$0xff]   ;;  %v11814_v6 = vld [vmem:[#allocation3 + $0x484] ss:$16 sps:$4 sm:$0xff]  }
 0x6e8   : > { %v6181_v19 = vadd.f32 %v6180_v41, %v6179_v53  ;;  %v6208_v20 = vrot.slane %v6207_v62, 1  ;;  %7297 = vmatprep.subr.bf16.mxu1 %v11805_v63  ;;  %v11812_v53 = vld [vmem:[#allocation3 + $0x480] ss:$16 sps:$4 sm:$0xff]   ;;  %v11859_v54 = vld [vmem:[#allocation3 + $0x764] ss:$16 sps:$4 sm:$0xff]  }
 0x6e9   : > { %v6187_v7 = vadd.f32 %v6186_v16, %v6185_v9  ;;  %v6214_v23 = vrot.slane %v6213_v61, 1  ;;  %v11817_v9 = vld [vmem:[#allocation3 + $0x684] ss:$16 sps:$4 sm:$0xff]   ;;  %v11860_v37 = vld [vmem:[#allocation3 + $0x580] ss:$16 sps:$4 sm:$0xff]  }
 0x6ea   : > { %v6216_v47 = vadd.f32 %v6181_v19, %v6169_v2  ;;  %v6209_v29 = vadd.f32 %v6208_v20, %v6207_v62  ;;  %7257 = vmatpush1.bf16.msra.mxu0 %v11800_v55  ;;  %v11823_v62 = vld [vmem:[#allocation3 + $0x6a4] ss:$16 sps:$4 sm:$0xff]   ;;  %v11863_v14 = vld [vmem:[#allocation3 + $0x780] ss:$16 sps:$4 sm:$0xff]  }
 0x6eb   : > { %v6217_v50 = vadd.f32 %v6187_v7, %v6175_v21  ;;  %v6215_v33 = vadd.f32 %v6214_v23, %v6213_v61  ;;  %7298 = vmatpush1.bf16.msra.mxu1 %v11803_v48  ;;  %7258 = vmatprep.subr.bf16.mxu0 %v11808_v3  ;;  %v11821_v61 = vld [vmem:[#allocation3 + $0x6a0] ss:$16 sps:$4 sm:$0xff]   ;;  %v11826_v19 = vld [vmem:[#allocation3 + $0x4c4] ss:$16 sps:$4 sm:$0xff]  }
 0x6ec   : > { %v6232_v38 = vadd.f32 %v6209_v29, %v6197_v24  ;;  %7299 = vmatprep.subr.bf16.mxu1 %v11811_v51  ;;  %v11829_v20 = vld [vmem:[#allocation3 + $0x6c4] ss:$16 sps:$4 sm:$0xff]   ;;  %v11824_v21 = vld [vmem:[#allocation3 + $0x4c0] ss:$16 sps:$4 sm:$0xff]  }
 0x6ed   : > { %v6218_v34 = vadd.f32 %v6217_v50, %v6216_v47  ;;  %v6233_v39 = vadd.f32 %v6215_v33, %v6203_v32  ;;  %v11827_v7 = vld [vmem:[#allocation3 + $0x6c0] ss:$16 sps:$4 sm:$0xff]   ;;  %v11832_v23 = vld [vmem:[#allocation3 + $0x4e4] ss:$16 sps:$4 sm:$0xff]  }
 0x6ee   : > { %7259 = vmatpush1.bf16.msra.mxu0 %v11806_v4  ;;  %v11835_v47 = vld [vmem:[#allocation3 + $0x6e4] ss:$16 sps:$4 sm:$0xff]   ;;  %v11830_v24 = vld [vmem:[#allocation3 + $0x4e0] ss:$16 sps:$4 sm:$0xff]  }
 0x6ef   : > { %6219 = vrot.lane.b32.xlu0 %v6218_v34, %s12508_s17  ;;  %v6234_v40 = vadd.f32 %v6233_v39, %v6232_v38  ;;  %7300 = vmatpush1.bf16.msra.mxu1 %v11809_v5  ;;  %v11833_v29 = vld [vmem:[#allocation3 + $0x6e0] ss:$16 sps:$4 sm:$0xff]   ;;  %v11838_v50 = vld [vmem:[#allocation3 + $0x504] ss:$16 sps:$4 sm:$0xff]  }
 0x6f0   : > { %7260 = vmatprep.subr.bf16.mxu0 %v11814_v6  ;;  %7301 = vmatprep.subr.bf16.mxu1 %v11817_v9  ;;  %v11841_v32 = vld [vmem:[#allocation3 + $0x704] ss:$16 sps:$4 sm:$0xff]   ;;  %v11836_v33 = vld [vmem:[#allocation3 + $0x500] ss:$16 sps:$4 sm:$0xff]   ;;  %v11886_v6 = vld [vmem:[#allocation3 + $0x40c] ss:$16 sps:$4 sm:$0xff]  }
 0x6f1   : > { %6235 = vrot.lane.b32.xlu1 %v6234_v40, %s12508_s17  ;;  %v11839_v38 = vld [vmem:[#allocation3 + $0x700] ss:$16 sps:$4 sm:$0xff]   ;;  %v11847_v39 = vld [vmem:[#allocation3 + $0x724] ss:$16 sps:$4 sm:$0xff]  }
 0x6f2   : > { %7261 = vmatpush1.bf16.msra.mxu0 %v11812_v53  ;;  %v11862_v36 = vld [vmem:[#allocation3 + $0x584] ss:$16 sps:$4 sm:$0xff]   ;;  %v11869_v55 = vld [vmem:[#allocation3 + $0x7a0] ss:$16 sps:$4 sm:$0xff]  }
 0x6f3   : > { %7302 = vmatpush1.bf16.msra.mxu1 %v11815_v8  ;;  %7262 = vmatprep.subr.bf16.mxu0 %v11820_v13  ;;  %v11865_v56 = vld [vmem:[#allocation3 + $0x784] ss:$16 sps:$4 sm:$0xff]   ;;  %v11872_v3 = vld [vmem:[#allocation3 + $0x5c0] ss:$16 sps:$4 sm:$0xff]   ;;  %v11889_v8 = vld [vmem:[#allocation3 + $0x60c] ss:$16 sps:$4 sm:$0xff]  }
 0x6f4   : > { %7303 = vmatprep.subr.bf16.mxu1 %v11823_v62  ;;  %v11868_v63 = vld [vmem:[#allocation3 + $0x5a4] ss:$16 sps:$4 sm:$0xff]   ;;  %v11878_v5 = vld [vmem:[#allocation3 + $0x5e0] ss:$16 sps:$4 sm:$0xff]  }
 0x6f5   : > { %v11877_v48 = vld [vmem:[#allocation3 + $0x7c4] ss:$16 sps:$4 sm:$0xff]   ;;  %v11881_v53 = vld [vmem:[#allocation3 + $0x7e0] ss:$16 sps:$4 sm:$0xff]  }
 0x6f6   : > { %7263 = vmatpush1.bf16.msra.mxu0 %v11818_v17  ;;  %v11880_v51 = vld [vmem:[#allocation3 + $0x5e4] ss:$16 sps:$4 sm:$0xff]  }
 0x6f7   : > { %7304 = vmatpush1.bf16.msra.mxu1 %v11821_v61  ;;  %7264 = vmatprep.subr.bf16.mxu0 %v11826_v19  ;;  %v11883_v4 = vld [vmem:[#allocation3 + $0x7e4] ss:$16 sps:$4 sm:$0xff]  }
 0x6f8   : > { %7305 = vmatprep.subr.bf16.mxu1 %v11829_v20 }
 0x6fa   : > { %7265 = vmatpush1.bf16.msra.mxu0 %v11824_v21 }
 0x6fb   : > { %7306 = vmatpush1.bf16.msra.mxu1 %v11827_v7  ;;  %7266 = vmatprep.subr.bf16.mxu0 %v11832_v23 }
 0x6fc   : > { %7307 = vmatprep.subr.bf16.mxu1 %v11835_v47 }
 0x6fe   : > { %7267 = vmatpush1.bf16.msra.mxu0 %v11830_v24 }
 0x6ff   : > { %7308 = vmatpush1.bf16.msra.mxu1 %v11833_v29  ;;  %7268 = vmatprep.subr.bf16.mxu0 %v11838_v50 }
 0x700   : > { %7309 = vmatprep.subr.bf16.mxu1 %v11841_v32 }
 0x702   : > { %7269 = vmatpush1.bf16.msra.mxu0 %v11836_v33 }
 0x703   : > { %7310 = vmatpush1.bf16.msra.mxu1 %v11839_v38 }
 0x704   : > { %7311 = vmatprep.subr.bf16.mxu1 %v11847_v39 }
 0x761   : > { %v6220_v10 = vpop.permute.xlu0 %6219 }
 0x762   : > { %v6221_v42 = vadd.f32 %v6220_v10, %v6218_v34  ;;  %v11844_v34 = vld [vmem:[#allocation3 + $0x524] ss:$16 sps:$4 sm:$0xff]   ;;  %v11845_v10 = vld [vmem:[#allocation3 + $0x720] ss:$16 sps:$4 sm:$0xff]  }
 0x763   : > { %v6236_v43 = vpop.permute.xlu1 %6235  ;;  %7270 = vmatprep.subr.bf16.mxu0 %v11844_v34  ;;  %7312 = vmatpush1.bf16.msra.mxu1 %v11845_v10 }
 0x764   : > { %v6237_v35 = vadd.f32 %v6236_v43, %v6234_v40  ;;  %6222 = vrot.lane.b32.xlu0 %v6221_v42, %s12509_s19  ;;  %v11842_v40 = vld [vmem:[#allocation3 + $0x520] ss:$16 sps:$4 sm:$0xff]   ;;  %v11853_v43 = vld [vmem:[#allocation3 + $0x744] ss:$16 sps:$4 sm:$0xff]  }
 0x765   : > { %7271 = vmatpush1.bf16.msra.mxu0 %v11842_v40  ;;  %7313 = vmatprep.subr.bf16.mxu1 %v11853_v43 }
 0x766   : > { %6238 = vrot.lane.b32.xlu1 %v6237_v35, %s12509_s19 }
 0x767   : > { %7314 = vmatpush1.bf16.msra.mxu1 %v11851_v60 }
 0x768   : > { %7315 = vmatprep.subr.bf16.mxu1 %v11859_v54 }
 0x76b   : > { %7316 = vmatpush1.bf16.msra.mxu1 %v11857_v52 }
 0x76c   : > { %7317 = vmatprep.subr.bf16.mxu1 %v11865_v56 }
 0x76f   : > { %7318 = vmatpush1.bf16.msra.mxu1 %v11863_v14 }
 0x7d6   : > { %v6223_v11 = vpop.permute.xlu0 %6222 }
 0x7d7   : > { %v6224_v27 = vadd.f32 %v6223_v11, %v6221_v42  ;;  %v11850_v42 = vld [vmem:[#allocation3 + $0x544] ss:$16 sps:$4 sm:$0xff]  }
 0x7d8   : > { %v6239_v0 = vpop.permute.xlu1 %6238  ;;  %7272 = vmatprep.subr.bf16.mxu0 %v11850_v42  ;;  %v11871_v11 = vld [vmem:[#allocation3 + $0x7a4] ss:$16 sps:$4 sm:$0xff]  }
 0x7d9   : > { %v6240_v30 = vadd.f32 %v6239_v0, %v6237_v35  ;;  %6225 = vrot.lane.b32.xlu0 %v6224_v27, %s12510_s20  ;;  %v11848_v35 = vld [vmem:[#allocation3 + $0x540] ss:$16 sps:$4 sm:$0xff]   ;;  %v11874_v0 = vld [vmem:[#allocation3 + $0x5c4] ss:$16 sps:$4 sm:$0xff]   ;;  %7319 = vmatprep.subr.bf16.mxu1 %v11871_v11 }
 0x7da   : > { %7273 = vmatpush1.bf16.msra.mxu0 %v11848_v35  ;;  %7320 = vmatpush1.bf16.msra.mxu1 %v11869_v55 }
 0x7db   : > { %6241 = vrot.lane.b32.xlu1 %v6240_v30, %s12510_s20  ;;  %7274 = vmatprep.subr.bf16.mxu0 %v11856_v12 }
 0x7dc   : > { %7321 = vmatprep.subr.bf16.mxu1 %v11877_v48 }
 0x7de   : > { %7275 = vmatpush1.bf16.msra.mxu0 %v11854_v18 }
 0x7df   : > { %7276 = vmatprep.subr.bf16.mxu0 %v11862_v36 }
 0x7e2   : > { %7277 = vmatpush1.bf16.msra.mxu0 %v11860_v37 }
 0x7e3   : > { %7278 = vmatprep.subr.bf16.mxu0 %v11868_v63 }
 0x84b   : > { %v6226_v49 = vpop.permute.xlu0 %6225 }
 0x84c   : > { %v12899_v41 = vadd.f32 %v6226_v49, %v6224_v27  ;;  %v11866_v27 = vld [vmem:[#allocation3 + $0x5a0] ss:$16 sps:$4 sm:$0xff]  }
 0x84d   : > { %v6242_v16 = vpop.permute.xlu1 %6241  ;;  %7279 = vmatpush1.bf16.msra.mxu0 %v11866_v27 }
 0x84e   : > { %v12901_v2 = vadd.f32 %v6242_v16, %v6240_v30  ;;  %6228 = vrot.lane.b32.xlu0 %v12899_v41, %s12511_s25  ;;  %7280 = vmatprep.subr.bf16.mxu0 %v11874_v0  ;;  %v11875_v30 = vld [vmem:[#allocation3 + $0x7c0] ss:$16 sps:$4 sm:$0xff]  }
 0x84f   : > { %7322 = vmatpush1.bf16.msra.mxu1 %v11875_v30 }
 0x850   : > { %6244 = vrot.lane.b32.xlu1 %v12901_v2, %s12511_s25  ;;  %7323 = vmatprep.subr.bf16.mxu1 %v11883_v4 }
 0x851   : > { %7281 = vmatpush1.bf16.msra.mxu0 %v11872_v3 }
 0x852   : > { %7282 = vmatprep.subr.bf16.mxu0 %v11880_v51 }
 0x853   : > { %7324 = vmatpush1.bf16.msra.mxu1 %v11881_v53 }
 0x854   : > { %7375 = vmatprep.subr.bf16.mxu1 %v11889_v8 }
 0x855   : > { %7283 = vmatpush1.bf16.msra.mxu0 %v11878_v5 }
 0x856   : > { %7334 = vmatprep.subr.bf16.mxu0 %v11886_v6 }
 0x8c0   : > { %v6229_v9 = vpop.permute.xlu0 %6228 }
 0x8c1   : > { %v6230_v49 = vadd.f32 %v6229_v9, %v12899_v41  ;;  %v11884_v9 = vld [vmem:[#allocation3 + $0x408] ss:$16 sps:$4 sm:$0xff]  }
 0x8c2   : > { %v6245_v13 = vpop.permute.xlu1 %6244 }
 0x8c3   : > { %v6231_v62 = vmul.f32 0.001953125, %v6230_v49  ;;  %v6246_v16 = vadd.f32 %v6245_v13, %v12901_v2 }
 0x8c5   : > { %v6248_v17 = vmul.f32 %v6231_v62, %v6231_v62  ;;  %v6247_v61 = vmul.f32 0.001953125, %v6246_v16  ;;  %v6255_v21 = vrot.slane %v6231_v62, %v12732_v22  ;;  %v11887_v16 = vld [vmem:[#allocation3 + $0x608] ss:$16 sps:$4 sm:$0xff]  }
 0x8c7   : > { %v6249_v19 = vsub.f32 %v6247_v61, %v6248_v17  ;;  %v6256_v23 = vsub.f32 %v12866_v44, %v6255_v21  ;;  %v6257_v47 = vsub.f32 %v12869_v15, %v6255_v21  ;;  %v6258_v24 = vsub.f32 %v12880_v45, %v6255_v21 }
 0x8c8   : > { %v6259_v41 = vsub.f32 %v12883_v58, %v6255_v21  ;;  %v11890_v21 = vld [vmem:[#allocation3 + $0x428] ss:$16 sps:$4 sm:$0xff]  }
 0x8c9   : > { %v6250_v20 = vadd.f32 1e-05, %v6249_v19  ;;  %v11892_v19 = vld [vmem:[#allocation3 + $0x42c] ss:$16 sps:$4 sm:$0xff]  }
 0x8cb   : > { %12366 = vrsqrt.f32 %v6250_v20  ;;  %v11895_v20 = vld [vmem:[#allocation3 + $0x62c] ss:$16 sps:$4 sm:$0xff]  }
 0x8d5   : > { %v12367_v7 = vpop.eup %12366 }
 0x8d6   : > { %v6263_v29 = vrot.slane %v12367_v7, %v12732_v22  ;;  %v11893_v7 = vld [vmem:[#allocation3 + $0x628] ss:$16 sps:$4 sm:$0xff]  }
 0x8d8   : > { %v6264_v50 = vmul.f32 %v6263_v29, %v6256_v23  ;;  %v6265_v2 = vmul.f32 %v6263_v29, %v6257_v47  ;;  %v6266_v32 = vmul.f32 %v6263_v29, %v6258_v24  ;;  %v6267_v33 = vmul.f32 %v6263_v29, %v6259_v41  ;;  %v11898_v23 = vld [vmem:[#allocation3 + $0x44c] ss:$16 sps:$4 sm:$0xff]   ;;  %v11896_v24 = vld [vmem:[#allocation3 + $0x448] ss:$16 sps:$4 sm:$0xff]  }
 0x8d9   : > { %v11901_v47 = vld [vmem:[#allocation3 + $0x64c] ss:$16 sps:$4 sm:$0xff]   ;;  %v11899_v41 = vld [vmem:[#allocation3 + $0x648] ss:$16 sps:$4 sm:$0xff]  }
 0x8da   : > { %vm6268_vm5 = vcmp.ge.f32.partialorder %v6264_v50, 0.0  ;;  %vm6269_vm6 = vcmp.ge.f32.partialorder %v6265_v2, 0.0  ;;  %vm6270_vm7 = vcmp.ge.f32.partialorder %v6266_v32, 0.0  ;;  %vm6271_vm8 = vcmp.ge.f32.partialorder %v6267_v33, 0.0  ;;  %v11904_v29 = vld [vmem:[#allocation3 + $0x46c] ss:$16 sps:$4 sm:$0xff]  }
 0x8db   : > { %v6272_v38 = vmul.f32 0.01, %v6264_v50  ;;  %v6273_v34 = vmul.f32 0.01, %v6265_v2  ;;  %v6274_v39 = vmul.f32 0.01, %v6266_v32 }
 0x8dc   : > { %v6275_v44 = vmul.f32 0.01, %v6267_v33 }
 0x8dd   : > { %v6276_v40 = vsel %vm6268_vm5, %v6264_v50, %v6272_v38  ;;  %v6277_v15 = vsel %vm6269_vm6, %v6265_v2, %v6273_v34  ;;  %v6278_v10 = vsel %vm6270_vm7, %v6266_v32, %v6274_v39  ;;  %v11907_v50 = vld [vmem:[#allocation3 + $0x66c] ss:$16 sps:$4 sm:$0xff]   ;;  %v11902_v2 = vld [vmem:[#allocation3 + $0x468] ss:$16 sps:$4 sm:$0xff]  }
 0x8de   : > { %v6279_v45 = vsel %vm6271_vm8, %v6267_v33, %v6275_v44  ;;  %v6280_v58 = vadd.f32 %v6276_v40, %v12798_v28  ;;  %v6281_v42 = vadd.f32 %v6277_v15, %v12801_v1  ;;  %v6282_v43 = vadd.f32 %v6278_v10, %v12804_v57  ;;  %v11905_v32 = vld [vmem:[#allocation3 + $0x668] ss:$16 sps:$4 sm:$0xff]   ;;  %v11910_v33 = vld [vmem:[#allocation3 + $0x48c] ss:$16 sps:$4 sm:$0xff]  }
 0x8df   : > { %v6283_v35 = vadd.f32 %v6279_v45, %v12807_v31  ;;  %v11913_v38 = vld [vmem:[#allocation3 + $0x68c] ss:$16 sps:$4 sm:$0xff]   ;;  %v11908_v34 = vld [vmem:[#allocation3 + $0x488] ss:$16 sps:$4 sm:$0xff]  }
 0x8e0   : > { %v6288_v60 = vrot.slane %v6280_v58, 7  ;;  %v6289_v18 = vrot.slane %v6281_v42, 7  ;;  %v6290_v12 = vrot.slane %v6282_v43, 7  ;;  %v11911_v39 = vld [vmem:[#allocation3 + $0x688] ss:$16 sps:$4 sm:$0xff]  }
 0x8e1   : > { %v6291_v52 = vrot.slane %v6283_v35, 7  ;;  %v11916_v44 = vld [vmem:[#allocation3 + $0x4ac] ss:$16 sps:$4 sm:$0xff]   ;;  %v11914_v15 = vld [vmem:[#allocation3 + $0x4a8] ss:$16 sps:$4 sm:$0xff]  }
 0x8e2   : > { %6296 = vst [vmem:[#allocation2] sm:$0xfe] %v6288_v60  ;;  %6297 = vst [vmem:[#allocation2 + $0x8] sm:$0xfe] %v6289_v18  ;;  %v11919_v40 = vld [vmem:[#allocation3 + $0x6ac] ss:$16 sps:$4 sm:$0xff]  }
 0x8e3   : > { %6298 = vst [vmem:[#allocation2 + $0x10] sm:$0xfe] %v6290_v12  ;;  %6300 = vst [vmem:[#allocation2 + $0x20] sm:$0x1] %v6288_v60  ;;  %v11917_v10 = vld [vmem:[#allocation3 + $0x6a8] ss:$16 sps:$4 sm:$0xff]  }
 0x8e4   : > { %6301 = vst [vmem:[#allocation2 + $0x28] sm:$0x1] %v6289_v18  ;;  %6302 = vst [vmem:[#allocation2 + $0x30] sm:$0x1] %v6290_v12  ;;  %v11922_v45 = vld [vmem:[#allocation3 + $0x4cc] ss:$16 sps:$4 sm:$0xff]  }
 0x8e5   : > { %6299 = vst [vmem:[#allocation2 + $0x18] sm:$0xfe] %v6291_v52  ;;  %6303 = vst [vmem:[#allocation2 + $0x38] sm:$0x1] %v6291_v52  ;;  %v11925_v58 = vld [vmem:[#allocation3 + $0x6cc] ss:$16 sps:$4 sm:$0xff]  }
 0x8e6   : > { %v11920_v42 = vld [vmem:[#allocation3 + $0x4c8] ss:$16 sps:$4 sm:$0xff]   ;;  %v11928_v35 = vld [vmem:[#allocation3 + $0x4ec] ss:$16 sps:$4 sm:$0xff]  }
 0x8e7   : > { %v11923_v43 = vld [vmem:[#allocation3 + $0x6c8] ss:$16 sps:$4 sm:$0xff]   ;;  %v11931_v60 = vld [vmem:[#allocation3 + $0x6ec] ss:$16 sps:$4 sm:$0xff]  }
 0x8e8   : > { %v11926_v18 = vld [vmem:[#allocation3 + $0x4e8] ss:$16 sps:$4 sm:$0xff]   ;;  %v11934_v52 = vld [vmem:[#allocation3 + $0x50c] ss:$16 sps:$4 sm:$0xff]  }
 0x8e9   : > { %v6441_v54 = vld [vmem:[#allocation2 + $0x8] sm:$0xfe]  ;;  %v6440_v36 = vld [vmem:[#allocation2] sm:$0xfe] }
 0x8ea   : > { %v6444_v37 = vld [vmem:[#allocation2 + $0x20] sm:$0x1]  ;;  %v6442_v63 = vld [vmem:[#allocation2 + $0x10] sm:$0xfe]  ;;  %v11929_v12 = vld [vmem:[#allocation3 + $0x6e8] ss:$16 sps:$4 sm:$0xff]  }
 0x8eb   : > { %v6445_v28 = vld [vmem:[#allocation2 + $0x28] sm:$0x1]  ;;  %v6448_v14 = vpack.c.bf16 %v6444_v37, %v6440_v36  ;;  %v6446_v11 = vld [vmem:[#allocation2 + $0x30] sm:$0x1] }
 0x8ec   : > { %v6449_v1 = vpack.c.bf16 %v6445_v28, %v6441_v54  ;;  %v6443_v56 = vld [vmem:[#allocation2 + $0x18] sm:$0xfe]  ;;  %v6447_v57 = vld [vmem:[#allocation2 + $0x38] sm:$0x1]  ;;  %v6450_v55 = vpack.c.bf16 %v6446_v11, %v6442_v63 }
 0x8ed   : > { %v6451_v31 = vpack.c.bf16 %v6447_v57, %v6443_v56  ;;  %v6583_v48 = vshll.u32 %v6448_v14, 16  ;;  %v6581_v53 = vshrl.u32 %v6448_v14, 16  ;;  %v11937_v54 = vld [vmem:[#allocation3 + $0x70c] ss:$16 sps:$4 sm:$0xff]   ;;  %v11932_v28 = vld [vmem:[#allocation3 + $0x508] ss:$16 sps:$4 sm:$0xff]  }
 0x8ee   : > { %v6590_v27 = vshll.u32 %v6449_v1, 16  ;;  %v6588_v3 = vshrl.u32 %v6449_v1, 16  ;;  %v6597_v51 = vshll.u32 %v6450_v55, 16  ;;  %v6595_v49 = vshrl.u32 %v6450_v55, 16  ;;  %v11935_v36 = vld [vmem:[#allocation3 + $0x708] ss:$16 sps:$4 sm:$0xff]  }
 0x8ef   : > { %v6604_v0 = vshll.u32 %v6451_v31, 16  ;;  %v6602_v4 = vshrl.u32 %v6451_v31, 16  ;;  %v6585_v6 = vrot.slane %v6583_v48, 1  ;;  %v11940_v1 = vld [vmem:[#allocation3 + $0x52c] ss:$16 sps:$4 sm:$0xff]  }
 0x8f0   : > { %v6592_v30 = vrot.slane %v6590_v27, 1  ;;  %v6599_v13 = vrot.slane %v6597_v51, 1  ;;  %v11943_v56 = vld [vmem:[#allocation3 + $0x72c] ss:$16 sps:$4 sm:$0xff]   ;;  %v11938_v57 = vld [vmem:[#allocation3 + $0x528] ss:$16 sps:$4 sm:$0xff]  }
 0x8f1   : > { %v6606_v5 = vrot.slane %v6604_v0, 1  ;;  %v12919_v17 = vor.u32 %v6585_v6, %v6581_v53  ;;  %v11941_v37 = vld [vmem:[#allocation3 + $0x728] ss:$16 sps:$4 sm:$0xff]   ;;  %v11946_v31 = vld [vmem:[#allocation3 + $0x54c] ss:$16 sps:$4 sm:$0xff]  }
 0x8f2   : > { %v6593_v8 = vor.u32 %v6592_v30, %v6588_v3  ;;  %v12921_v61 = vor.u32 %v6599_v13, %v6595_v49  ;;  %v11949_v14 = vld [vmem:[#allocation3 + $0x74c] ss:$16 sps:$4 sm:$0xff]   ;;  %v11944_v63 = vld [vmem:[#allocation3 + $0x548] ss:$16 sps:$4 sm:$0xff]  }
 0x8f3   : > { %v6607_v62 = vor.u32 %v6606_v5, %v6602_v4  ;;  %v11947_v11 = vld [vmem:[#allocation3 + $0x748] ss:$16 sps:$4 sm:$0xff]   ;;  %v11952_v27 = vld [vmem:[#allocation3 + $0x56c] ss:$16 sps:$4 sm:$0xff]  }
 0x8f4   : > { %7284 = vmatprep.mubr.bf16.mxu0 %v6593_v8  ;;  %v11955_v55 = vld [vmem:[#allocation3 + $0x76c] ss:$16 sps:$4 sm:$0xff]   ;;  %v11950_v0 = vld [vmem:[#allocation3 + $0x568] ss:$16 sps:$4 sm:$0xff]  }
 0x8f5   : > { %7325 = vmatprep.mubr.bf16.mxu1 %v6607_v62  ;;  %7285 = vmatmul.mubr.bf16.vlgmr.msra.gmra.mrb[48].mxu0 %v12919_v17  ;;  %v11953_v48 = vld [vmem:[#allocation3 + $0x768] ss:$16 sps:$4 sm:$0xff]   ;;  %v11958_v3 = vld [vmem:[#allocation3 + $0x58c] ss:$16 sps:$4 sm:$0xff]  }
 0x8f6   : > { %7326 = vmatmul.mubr.bf16.vlgmr.msra.gmra.mrb[48].mxu1 %v12921_v61  ;;  %7335 = vmatpush1.bf16.msra.mxu0 %v11884_v9  ;;  %v11961_v30 = vld [vmem:[#allocation3 + $0x78c] ss:$16 sps:$4 sm:$0xff]   ;;  %v11956_v51 = vld [vmem:[#allocation3 + $0x588] ss:$16 sps:$4 sm:$0xff]  }
 0x8f7   : > { %7376 = vmatpush1.bf16.msra.mxu1 %v11887_v16  ;;  %7366 = vmatprep.mubr.bf16.mxu0 %v6593_v8  ;;  %v11959_v4 = vld [vmem:[#allocation3 + $0x788] ss:$16 sps:$4 sm:$0xff]   ;;  %v11964_v5 = vld [vmem:[#allocation3 + $0x5ac] ss:$16 sps:$4 sm:$0xff]  }
 0x8f8   : > { %7407 = vmatprep.mubr.bf16.mxu1 %v6607_v62  ;;  %7336 = vmatprep.subr.bf16.mxu0 %v11892_v19  ;;  %v11967_v53 = vld [vmem:[#allocation3 + $0x7ac] ss:$16 sps:$4 sm:$0xff]   ;;  %v11962_v6 = vld [vmem:[#allocation3 + $0x5a8] ss:$16 sps:$4 sm:$0xff]  }
 0x8f9   : > { %7377 = vmatprep.subr.bf16.mxu1 %v11895_v20  ;;  %v11965_v8 = vld [vmem:[#allocation3 + $0x7a8] ss:$16 sps:$4 sm:$0xff]   ;;  %v11970_v9 = vld [vmem:[#allocation3 + $0x5cc] ss:$16 sps:$4 sm:$0xff]  }
 0x8fa   : > { %7337 = vmatpush1.bf16.msra.mxu0 %v11890_v21  ;;  %v11973_v49 = vld [vmem:[#allocation3 + $0x7cc] ss:$16 sps:$4 sm:$0xff]   ;;  %v11968_v13 = vld [vmem:[#allocation3 + $0x5c8] ss:$16 sps:$4 sm:$0xff]  }
 0x8fb   : > { %7378 = vmatpush1.bf16.msra.mxu1 %v11893_v7  ;;  %7338 = vmatprep.subr.bf16.mxu0 %v11898_v23  ;;  %v11971_v62 = vld [vmem:[#allocation3 + $0x7c8] ss:$16 sps:$4 sm:$0xff]   ;;  %v11976_v16 = vld [vmem:[#allocation3 + $0x5ec] ss:$16 sps:$4 sm:$0xff]   ;;  %v11982_v7 = vld [vmem:[#allocation3 + $0x4] ss:$16 sps:$4 sm:$0xff]  }
 0x8fc   : > { %7379 = vmatprep.subr.bf16.mxu1 %v11901_v47  ;;  %v11979_v19 = vld [vmem:[#allocation3 + $0x7ec] ss:$16 sps:$4 sm:$0xff]   ;;  %v11974_v20 = vld [vmem:[#allocation3 + $0x5e8] ss:$16 sps:$4 sm:$0xff]   ;;  %v11985_v23 = vld [vmem:[#allocation3 + $0x204] ss:$16 sps:$4 sm:$0xff]  }
 0x8fd   : > { %v11977_v21 = vld [vmem:[#allocation3 + $0x7e8] ss:$16 sps:$4 sm:$0xff]   ;;  %v11980_v47 = vld [vmem:[#allocation3] ss:$16 sps:$4 sm:$0xff]  }
 0x8fe   : > { %7339 = vmatpush1.bf16.msra.mxu0 %v11896_v24  ;;  %v6305_v24 = vld [vmem:[#allocation2 + $0x8] sm:$0xff] }
 0x8ff   : > { %7380 = vmatpush1.bf16.msra.mxu1 %v11899_v41  ;;  %7340 = vmatprep.subr.bf16.mxu0 %v11904_v29  ;;  %v11983_v41 = vld [vmem:[#allocation3 + $0x200] ss:$16 sps:$4 sm:$0xff]   ;;  %v6307_v29 = vld [vmem:[#allocation2 + $0x18] sm:$0xff] }
 0x900   : > { %7381 = vmatprep.subr.bf16.mxu1 %v11907_v50  ;;  %v11988_v50 = vld [vmem:[#allocation3 + $0x24] ss:$16 sps:$4 sm:$0xff]  }
 0x902   : > { %7341 = vmatpush1.bf16.msra.mxu0 %v11902_v2  ;;  %v12926_v2 = vpack.c.bf16 %v6305_v24, %v6305_v24  ;;  %v12064_v24 = vld [vmem:[#allocation3 + $0x1c0] ss:$16 sps:$4 sm:$0xff]  }
 0x903   : > { %7382 = vmatpush1.bf16.msra.mxu1 %v11905_v32  ;;  %7342 = vmatprep.subr.bf16.mxu0 %v11910_v33  ;;  %v11991_v32 = vld [vmem:[#allocation3 + $0x224] ss:$16 sps:$4 sm:$0xff]   ;;  %v12929_v33 = vpack.c.bf16 %v6307_v29, %v6307_v29 }
 0x904   : > { %7383 = vmatprep.subr.bf16.mxu1 %v11913_v38  ;;  %v11986_v38 = vld [vmem:[#allocation3 + $0x20] ss:$16 sps:$4 sm:$0xff]   ;;  %v12072_v29 = vld [vmem:[#allocation3 + $0x1e4] ss:$16 sps:$4 sm:$0xff]  }
 0x906   : > { %7343 = vmatpush1.bf16.msra.mxu0 %v11908_v34  ;;  %v11989_v34 = vld [vmem:[#allocation3 + $0x220] ss:$16 sps:$4 sm:$0xff]  }
 0x907   : > { %7384 = vmatpush1.bf16.msra.mxu1 %v11911_v39  ;;  %7344 = vmatprep.subr.bf16.mxu0 %v11916_v44  ;;  %v11994_v39 = vld [vmem:[#allocation3 + $0x44] ss:$16 sps:$4 sm:$0xff]  }
 0x908   : > { %7385 = vmatprep.subr.bf16.mxu1 %v11919_v40  ;;  %v11997_v44 = vld [vmem:[#allocation3 + $0x244] ss:$16 sps:$4 sm:$0xff]   ;;  %v11995_v40 = vld [vmem:[#allocation3 + $0x240] ss:$16 sps:$4 sm:$0xff]  }
 0x90a   : > { %7345 = vmatpush1.bf16.msra.mxu0 %v11914_v15  ;;  %v12003_v15 = vld [vmem:[#allocation3 + $0x264] ss:$16 sps:$4 sm:$0xff]  }
 0x90b   : > { %7386 = vmatpush1.bf16.msra.mxu1 %v11917_v10  ;;  %7346 = vmatprep.subr.bf16.mxu0 %v11922_v45  ;;  %v11998_v10 = vld [vmem:[#allocation3 + $0x60] ss:$16 sps:$4 sm:$0xff]  }
 0x90c   : > { %7387 = vmatprep.subr.bf16.mxu1 %v11925_v58  ;;  %v12001_v45 = vld [vmem:[#allocation3 + $0x260] ss:$16 sps:$4 sm:$0xff]   ;;  %v12006_v58 = vld [vmem:[#allocation3 + $0x84] ss:$16 sps:$4 sm:$0xff]  }
 0x90e   : > { %7347 = vmatpush1.bf16.msra.mxu0 %v11920_v42  ;;  %v12009_v42 = vld [vmem:[#allocation3 + $0x284] ss:$16 sps:$4 sm:$0xff]  }
 0x90f   : > { %7388 = vmatpush1.bf16.msra.mxu1 %v11923_v43  ;;  %7348 = vmatprep.subr.bf16.mxu0 %v11928_v35  ;;  %v12004_v43 = vld [vmem:[#allocation3 + $0x80] ss:$16 sps:$4 sm:$0xff]  }
 0x910   : > { %7389 = vmatprep.subr.bf16.mxu1 %v11931_v60  ;;  %v12007_v35 = vld [vmem:[#allocation3 + $0x280] ss:$16 sps:$4 sm:$0xff]   ;;  %v12012_v60 = vld [vmem:[#allocation3 + $0xa4] ss:$16 sps:$4 sm:$0xff]  }
 0x912   : > { %7349 = vmatpush1.bf16.msra.mxu0 %v11926_v18  ;;  %v12015_v18 = vld [vmem:[#allocation3 + $0x2a4] ss:$16 sps:$4 sm:$0xff]  }
 0x913   : > { %7390 = vmatpush1.bf16.msra.mxu1 %v11929_v12  ;;  %7350 = vmatprep.subr.bf16.mxu0 %v11934_v52  ;;  %v12010_v12 = vld [vmem:[#allocation3 + $0xa0] ss:$16 sps:$4 sm:$0xff]  }
 0x914   : > { %7391 = vmatprep.subr.bf16.mxu1 %v11937_v54  ;;  %v12013_v52 = vld [vmem:[#allocation3 + $0x2a0] ss:$16 sps:$4 sm:$0xff]   ;;  %v12018_v54 = vld [vmem:[#allocation3 + $0xc4] ss:$16 sps:$4 sm:$0xff]  }
 0x916   : > { %7351 = vmatpush1.bf16.msra.mxu0 %v11932_v28  ;;  %v12021_v28 = vld [vmem:[#allocation3 + $0x2c4] ss:$16 sps:$4 sm:$0xff]  }
 0x917   : > { %7392 = vmatpush1.bf16.msra.mxu1 %v11935_v36  ;;  %7352 = vmatprep.subr.bf16.mxu0 %v11940_v1  ;;  %v12016_v36 = vld [vmem:[#allocation3 + $0xc0] ss:$16 sps:$4 sm:$0xff]  }
 0x918   : > { %7393 = vmatprep.subr.bf16.mxu1 %v11943_v56  ;;  %v12019_v1 = vld [vmem:[#allocation3 + $0x2c0] ss:$16 sps:$4 sm:$0xff]   ;;  %v12024_v56 = vld [vmem:[#allocation3 + $0xe4] ss:$16 sps:$4 sm:$0xff]  }
 0x91a   : > { %7353 = vmatpush1.bf16.msra.mxu0 %v11938_v57  ;;  %v12027_v57 = vld [vmem:[#allocation3 + $0x2e4] ss:$16 sps:$4 sm:$0xff]  }
 0x91b   : > { %7394 = vmatpush1.bf16.msra.mxu1 %v11941_v37  ;;  %7354 = vmatprep.subr.bf16.mxu0 %v11946_v31  ;;  %v12022_v37 = vld [vmem:[#allocation3 + $0xe0] ss:$16 sps:$4 sm:$0xff]  }
 0x91c   : > { %7395 = vmatprep.subr.bf16.mxu1 %v11949_v14  ;;  %v12025_v31 = vld [vmem:[#allocation3 + $0x2e0] ss:$16 sps:$4 sm:$0xff]   ;;  %v12030_v14 = vld [vmem:[#allocation3 + $0x104] ss:$16 sps:$4 sm:$0xff]  }
 0x91e   : > { %7355 = vmatpush1.bf16.msra.mxu0 %v11944_v63  ;;  %v12033_v63 = vld [vmem:[#allocation3 + $0x304] ss:$16 sps:$4 sm:$0xff]  }
 0x91f   : > { %7396 = vmatpush1.bf16.msra.mxu1 %v11947_v11  ;;  %7356 = vmatprep.subr.bf16.mxu0 %v11952_v27  ;;  %v12028_v11 = vld [vmem:[#allocation3 + $0x100] ss:$16 sps:$4 sm:$0xff]  }
 0x920   : > { %7397 = vmatprep.subr.bf16.mxu1 %v11955_v55  ;;  %v12031_v27 = vld [vmem:[#allocation3 + $0x300] ss:$16 sps:$4 sm:$0xff]   ;;  %v12036_v55 = vld [vmem:[#allocation3 + $0x124] ss:$16 sps:$4 sm:$0xff]  }
 0x922   : > { %7357 = vmatpush1.bf16.msra.mxu0 %v11950_v0  ;;  %v12039_v0 = vld [vmem:[#allocation3 + $0x324] ss:$16 sps:$4 sm:$0xff]  }
 0x923   : > { %7398 = vmatpush1.bf16.msra.mxu1 %v11953_v48  ;;  %7358 = vmatprep.subr.bf16.mxu0 %v11958_v3  ;;  %v12034_v48 = vld [vmem:[#allocation3 + $0x120] ss:$16 sps:$4 sm:$0xff]  }
 0x924   : > { %7399 = vmatprep.subr.bf16.mxu1 %v11961_v30  ;;  %v12037_v3 = vld [vmem:[#allocation3 + $0x320] ss:$16 sps:$4 sm:$0xff]   ;;  %v12042_v30 = vld [vmem:[#allocation3 + $0x144] ss:$16 sps:$4 sm:$0xff]  }
 0x926   : > { %7359 = vmatpush1.bf16.msra.mxu0 %v11956_v51  ;;  %v12045_v51 = vld [vmem:[#allocation3 + $0x344] ss:$16 sps:$4 sm:$0xff]  }
 0x927   : > { %7400 = vmatpush1.bf16.msra.mxu1 %v11959_v4  ;;  %7360 = vmatprep.subr.bf16.mxu0 %v11964_v5  ;;  %v12040_v4 = vld [vmem:[#allocation3 + $0x140] ss:$16 sps:$4 sm:$0xff]  }
 0x928   : > { %7401 = vmatprep.subr.bf16.mxu1 %v11967_v53  ;;  %v12043_v5 = vld [vmem:[#allocation3 + $0x340] ss:$16 sps:$4 sm:$0xff]   ;;  %v12048_v53 = vld [vmem:[#allocation3 + $0x164] ss:$16 sps:$4 sm:$0xff]  }
 0x92a   : > { %7361 = vmatpush1.bf16.msra.mxu0 %v11962_v6  ;;  %v12051_v6 = vld [vmem:[#allocation3 + $0x364] ss:$16 sps:$4 sm:$0xff]  }
 0x92b   : > { %7402 = vmatpush1.bf16.msra.mxu1 %v11965_v8  ;;  %7362 = vmatprep.subr.bf16.mxu0 %v11970_v9  ;;  %v12046_v8 = vld [vmem:[#allocation3 + $0x160] ss:$16 sps:$4 sm:$0xff]  }
 0x92c   : > { %7403 = vmatprep.subr.bf16.mxu1 %v11973_v49  ;;  %v12049_v9 = vld [vmem:[#allocation3 + $0x360] ss:$16 sps:$4 sm:$0xff]   ;;  %v12054_v49 = vld [vmem:[#allocation3 + $0x184] ss:$16 sps:$4 sm:$0xff]  }
 0x92e   : > { %7363 = vmatpush1.bf16.msra.mxu0 %v11968_v13  ;;  %v12057_v13 = vld [vmem:[#allocation3 + $0x384] ss:$16 sps:$4 sm:$0xff]  }
 0x92f   : > { %7404 = vmatpush1.bf16.msra.mxu1 %v11971_v62  ;;  %7364 = vmatprep.subr.bf16.mxu0 %v11976_v16  ;;  %v12052_v62 = vld [vmem:[#allocation3 + $0x180] ss:$16 sps:$4 sm:$0xff]  }
 0x930   : > { %7405 = vmatprep.subr.bf16.mxu1 %v11979_v19  ;;  %v12055_v16 = vld [vmem:[#allocation3 + $0x380] ss:$16 sps:$4 sm:$0xff]   ;;  %v12060_v19 = vld [vmem:[#allocation3 + $0x1a4] ss:$16 sps:$4 sm:$0xff]  }
 0x932   : > { %7365 = vmatpush1.bf16.msra.mxu0 %v11974_v20  ;;  %v12063_v20 = vld [vmem:[#allocation3 + $0x3a4] ss:$16 sps:$4 sm:$0xff]  }
 0x933   : > { %7406 = vmatpush1.bf16.msra.mxu1 %v11977_v21  ;;  %8056 = vmatprep.subr.bf16.mxu0 %v11982_v7  ;;  %v12058_v21 = vld [vmem:[#allocation3 + $0x1a0] ss:$16 sps:$4 sm:$0xff]  }
 0x934   : > { %8097 = vmatprep.subr.bf16.mxu1 %v11985_v23  ;;  %v12061_v7 = vld [vmem:[#allocation3 + $0x3a0] ss:$16 sps:$4 sm:$0xff]   ;;  %v12066_v23 = vld [vmem:[#allocation3 + $0x1c4] ss:$16 sps:$4 sm:$0xff]  }
 0x935   : > { %7367 = vmatmul.mubr.bf16.vlgmr.msra.gmra.mrb[52].mxu0 %v12919_v17  ;;  %v11992_v17 = vld [vmem:[#allocation3 + $0x40] ss:$16 sps:$4 sm:$0xff]  }
 0x936   : > { %7408 = vmatmul.mubr.bf16.vlgmr.msra.gmra.mrb[52].mxu1 %v12921_v61  ;;  %8057 = vmatpush1.bf16.msra.mxu0 %v11980_v47  ;;  %v12000_v61 = vld [vmem:[#allocation3 + $0x64] ss:$16 sps:$4 sm:$0xff]  }
 0x937   : > { %8088 = vmatprep.mubr.bf16.mxu0 %v12926_v2  ;;  %8098 = vmatpush1.bf16.msra.mxu1 %v11983_v41  ;;  %v12069_v47 = vld [vmem:[#allocation3 + $0x3c4] ss:$16 sps:$4 sm:$0xff]   ;;  %v12067_v41 = vld [vmem:[#allocation3 + $0x3c0] ss:$16 sps:$4 sm:$0xff]  }
 0x938   : > { %8129 = vmatprep.mubr.bf16.mxu1 %v12929_v33  ;;  %8058 = vmatprep.subr.bf16.mxu0 %v11988_v50  ;;  %v12075_v50 = vld [vmem:[#allocation3 + $0x3e4] ss:$16 sps:$4 sm:$0xff]  }
 0x939   : > { %8099 = vmatprep.subr.bf16.mxu1 %v11991_v32  ;;  %v12070_v32 = vld [vmem:[#allocation3 + $0x1e0] ss:$16 sps:$4 sm:$0xff]  }
 0x93a   : > { %8059 = vmatpush1.bf16.msra.mxu0 %v11986_v38  ;;  %v12073_v38 = vld [vmem:[#allocation3 + $0x3e0] ss:$16 sps:$4 sm:$0xff]  }
 0x93b   : > { %8100 = vmatpush1.bf16.msra.mxu1 %v11989_v34  ;;  %8060 = vmatprep.subr.bf16.mxu0 %v11994_v39  ;;  %v12078_v34 = vld [vmem:[#allocation3 + $0xc] ss:$16 sps:$4 sm:$0xff]   ;;  %v6304_v39 = vld [vmem:[#allocation2] sm:$0xff] }
 0x93c   : > { %8101 = vmatprep.subr.bf16.mxu1 %v11997_v44  ;;  %v12081_v44 = vld [vmem:[#allocation3 + $0x20c] ss:$16 sps:$4 sm:$0xff]  }
 0x93e   : > { %8061 = vmatpush1.bf16.msra.mxu0 %v11992_v17  ;;  %v6306_v17 = vld [vmem:[#allocation2 + $0x10] sm:$0xff] }
 0x93f   : > { %8102 = vmatpush1.bf16.msra.mxu1 %v11995_v40  ;;  %8062 = vmatprep.subr.bf16.mxu0 %v12000_v61  ;;  %v12076_v40 = vld [vmem:[#allocation3 + $0x8] ss:$16 sps:$4 sm:$0xff]   ;;  %v12933_v61 = vpack.c.bf16 %v6304_v39, %v6304_v39  ;;  %v12162_v39 = vld [vmem:[#allocation3 + $0x1cc] ss:$16 sps:$4 sm:$0xff]  }
 0x940   : > { %8103 = vmatprep.subr.bf16.mxu1 %v12003_v15  ;;  %v12079_v15 = vld [vmem:[#allocation3 + $0x208] ss:$16 sps:$4 sm:$0xff]  }
 0x942   : > { %8063 = vmatpush1.bf16.msra.mxu0 %v11998_v10  ;;  %v12935_v10 = vpack.c.bf16 %v6306_v17, %v6306_v17  ;;  %v12160_v17 = vld [vmem:[#allocation3 + $0x1c8] ss:$16 sps:$4 sm:$0xff]  }
 0x943   : > { %8104 = vmatpush1.bf16.msra.mxu1 %v12001_v45  ;;  %8064 = vmatprep.subr.bf16.mxu0 %v12006_v58  ;;  %v12084_v45 = vld [vmem:[#allocation3 + $0x2c] ss:$16 sps:$4 sm:$0xff]  }
 0x944   : > { %8105 = vmatprep.subr.bf16.mxu1 %v12009_v42  ;;  %v12087_v58 = vld [vmem:[#allocation3 + $0x22c] ss:$16 sps:$4 sm:$0xff]   ;;  %v12082_v42 = vld [vmem:[#allocation3 + $0x28] ss:$16 sps:$4 sm:$0xff]  }
 0x946   : > { %8065 = vmatpush1.bf16.msra.mxu0 %v12004_v43  ;;  %v12085_v43 = vld [vmem:[#allocation3 + $0x228] ss:$16 sps:$4 sm:$0xff]  }
 0x947   : > { %8106 = vmatpush1.bf16.msra.mxu1 %v12007_v35  ;;  %8066 = vmatprep.subr.bf16.mxu0 %v12012_v60  ;;  %v12090_v35 = vld [vmem:[#allocation3 + $0x4c] ss:$16 sps:$4 sm:$0xff]  }
 0x948   : > { %8107 = vmatprep.subr.bf16.mxu1 %v12015_v18  ;;  %v12093_v60 = vld [vmem:[#allocation3 + $0x24c] ss:$16 sps:$4 sm:$0xff]   ;;  %v12088_v18 = vld [vmem:[#allocation3 + $0x48] ss:$16 sps:$4 sm:$0xff]  }
 0x94a   : > { %8067 = vmatpush1.bf16.msra.mxu0 %v12010_v12  ;;  %v12091_v12 = vld [vmem:[#allocation3 + $0x248] ss:$16 sps:$4 sm:$0xff]  }
 0x94b   : > { %8108 = vmatpush1.bf16.msra.mxu1 %v12013_v52  ;;  %8068 = vmatprep.subr.bf16.mxu0 %v12018_v54  ;;  %v12096_v52 = vld [vmem:[#allocation3 + $0x6c] ss:$16 sps:$4 sm:$0xff]  }
 0x94c   : > { %8109 = vmatprep.subr.bf16.mxu1 %v12021_v28  ;;  %v12099_v54 = vld [vmem:[#allocation3 + $0x26c] ss:$16 sps:$4 sm:$0xff]   ;;  %v12094_v28 = vld [vmem:[#allocation3 + $0x68] ss:$16 sps:$4 sm:$0xff]  }
 0x94e   : > { %8069 = vmatpush1.bf16.msra.mxu0 %v12016_v36  ;;  %v12102_v36 = vld [vmem:[#allocation3 + $0x8c] ss:$16 sps:$4 sm:$0xff]  }
 0x94f   : > { %8110 = vmatpush1.bf16.msra.mxu1 %v12019_v1  ;;  %8070 = vmatprep.subr.bf16.mxu0 %v12024_v56  ;;  %v12105_v1 = vld [vmem:[#allocation3 + $0x28c] ss:$16 sps:$4 sm:$0xff]   ;;  %v12103_v56 = vld [vmem:[#allocation3 + $0x288] ss:$16 sps:$4 sm:$0xff]  }
 0x950   : > { %8111 = vmatprep.subr.bf16.mxu1 %v12027_v57  ;;  %v12108_v57 = vld [vmem:[#allocation3 + $0xac] ss:$16 sps:$4 sm:$0xff]  }
 0x952   : > { %8071 = vmatpush1.bf16.msra.mxu0 %v12022_v37  ;;  %v12111_v37 = vld [vmem:[#allocation3 + $0x2ac] ss:$16 sps:$4 sm:$0xff]  }
 0x953   : > { %8112 = vmatpush1.bf16.msra.mxu1 %v12025_v31  ;;  %8072 = vmatprep.subr.bf16.mxu0 %v12030_v14  ;;  %v12106_v31 = vld [vmem:[#allocation3 + $0xa8] ss:$16 sps:$4 sm:$0xff]  }
 0x954   : > { %8113 = vmatprep.subr.bf16.mxu1 %v12033_v63  ;;  %v12109_v14 = vld [vmem:[#allocation3 + $0x2a8] ss:$16 sps:$4 sm:$0xff]   ;;  %v12114_v63 = vld [vmem:[#allocation3 + $0xcc] ss:$16 sps:$4 sm:$0xff]  }
 0x956   : > { %8073 = vmatpush1.bf16.msra.mxu0 %v12028_v11  ;;  %v12117_v11 = vld [vmem:[#allocation3 + $0x2cc] ss:$16 sps:$4 sm:$0xff]  }
 0x957   : > { %8114 = vmatpush1.bf16.msra.mxu1 %v12031_v27  ;;  %8074 = vmatprep.subr.bf16.mxu0 %v12036_v55  ;;  %v12112_v27 = vld [vmem:[#allocation3 + $0xc8] ss:$16 sps:$4 sm:$0xff]  }
 0x958   : > { %8115 = vmatprep.subr.bf16.mxu1 %v12039_v0  ;;  %v12115_v55 = vld [vmem:[#allocation3 + $0x2c8] ss:$16 sps:$4 sm:$0xff]   ;;  %v12120_v0 = vld [vmem:[#allocation3 + $0xec] ss:$16 sps:$4 sm:$0xff]  }
 0x95a   : > { %8075 = vmatpush1.bf16.msra.mxu0 %v12034_v48  ;;  %v12123_v48 = vld [vmem:[#allocation3 + $0x2ec] ss:$16 sps:$4 sm:$0xff]  }
 0x95b   : > { %8116 = vmatpush1.bf16.msra.mxu1 %v12037_v3  ;;  %8076 = vmatprep.subr.bf16.mxu0 %v12042_v30  ;;  %v12118_v3 = vld [vmem:[#allocation3 + $0xe8] ss:$16 sps:$4 sm:$0xff]  }
 0x95c   : > { %8117 = vmatprep.subr.bf16.mxu1 %v12045_v51  ;;  %v12121_v30 = vld [vmem:[#allocation3 + $0x2e8] ss:$16 sps:$4 sm:$0xff]   ;;  %v12126_v51 = vld [vmem:[#allocation3 + $0x10c] ss:$16 sps:$4 sm:$0xff]  }
 0x95e   : > { %8077 = vmatpush1.bf16.msra.mxu0 %v12040_v4  ;;  %v12129_v4 = vld [vmem:[#allocation3 + $0x30c] ss:$16 sps:$4 sm:$0xff]  }
 0x95f   : > { %8118 = vmatpush1.bf16.msra.mxu1 %v12043_v5  ;;  %8078 = vmatprep.subr.bf16.mxu0 %v12048_v53  ;;  %v12124_v5 = vld [vmem:[#allocation3 + $0x108] ss:$16 sps:$4 sm:$0xff]  }
 0x960   : > { %8119 = vmatprep.subr.bf16.mxu1 %v12051_v6  ;;  %v12127_v53 = vld [vmem:[#allocation3 + $0x308] ss:$16 sps:$4 sm:$0xff]   ;;  %v12132_v6 = vld [vmem:[#allocation3 + $0x12c] ss:$16 sps:$4 sm:$0xff]  }
 0x962   : > { %8079 = vmatpush1.bf16.msra.mxu0 %v12046_v8  ;;  %v12135_v8 = vld [vmem:[#allocation3 + $0x32c] ss:$16 sps:$4 sm:$0xff]  }
 0x963   : > { %8120 = vmatpush1.bf16.msra.mxu1 %v12049_v9  ;;  %8080 = vmatprep.subr.bf16.mxu0 %v12054_v49  ;;  %v12130_v9 = vld [vmem:[#allocation3 + $0x128] ss:$16 sps:$4 sm:$0xff]  }
 0x964   : > { %8121 = vmatprep.subr.bf16.mxu1 %v12057_v13  ;;  %v12133_v49 = vld [vmem:[#allocation3 + $0x328] ss:$16 sps:$4 sm:$0xff]   ;;  %v12138_v13 = vld [vmem:[#allocation3 + $0x14c] ss:$16 sps:$4 sm:$0xff]  }
 0x966   : > { %8081 = vmatpush1.bf16.msra.mxu0 %v12052_v62  ;;  %v12141_v62 = vld [vmem:[#allocation3 + $0x34c] ss:$16 sps:$4 sm:$0xff]  }
 0x967   : > { %8122 = vmatpush1.bf16.msra.mxu1 %v12055_v16  ;;  %8082 = vmatprep.subr.bf16.mxu0 %v12060_v19  ;;  %v12136_v16 = vld [vmem:[#allocation3 + $0x148] ss:$16 sps:$4 sm:$0xff]  }
 0x968   : > { %8123 = vmatprep.subr.bf16.mxu1 %v12063_v20  ;;  %v12139_v19 = vld [vmem:[#allocation3 + $0x348] ss:$16 sps:$4 sm:$0xff]   ;;  %v12144_v20 = vld [vmem:[#allocation3 + $0x16c] ss:$16 sps:$4 sm:$0xff]  }
 0x96a   : > { %8083 = vmatpush1.bf16.msra.mxu0 %v12058_v21  ;;  %v12147_v21 = vld [vmem:[#allocation3 + $0x36c] ss:$16 sps:$4 sm:$0xff]  }
 0x96b   : > { %8124 = vmatpush1.bf16.msra.mxu1 %v12061_v7  ;;  %8084 = vmatprep.subr.bf16.mxu0 %v12066_v23  ;;  %v12142_v7 = vld [vmem:[#allocation3 + $0x168] ss:$16 sps:$4 sm:$0xff]  }
 0x96c   : > { %8125 = vmatprep.subr.bf16.mxu1 %v12069_v47  ;;  %v12145_v23 = vld [vmem:[#allocation3 + $0x368] ss:$16 sps:$4 sm:$0xff]   ;;  %v12150_v47 = vld [vmem:[#allocation3 + $0x18c] ss:$16 sps:$4 sm:$0xff]  }
 0x96e   : > { %8085 = vmatpush1.bf16.msra.mxu0 %v12064_v24  ;;  %v12153_v24 = vld [vmem:[#allocation3 + $0x38c] ss:$16 sps:$4 sm:$0xff]  }
 0x96f   : > { %8126 = vmatpush1.bf16.msra.mxu1 %v12067_v41  ;;  %8086 = vmatprep.subr.bf16.mxu0 %v12072_v29  ;;  %v12148_v41 = vld [vmem:[#allocation3 + $0x188] ss:$16 sps:$4 sm:$0xff]  }
 0x970   : > { %8127 = vmatprep.subr.bf16.mxu1 %v12075_v50  ;;  %v12151_v29 = vld [vmem:[#allocation3 + $0x388] ss:$16 sps:$4 sm:$0xff]   ;;  %v12156_v50 = vld [vmem:[#allocation3 + $0x1ac] ss:$16 sps:$4 sm:$0xff]  }
 0x972   : > { %8087 = vmatpush1.bf16.msra.mxu0 %v12070_v32  ;;  %v12159_v32 = vld [vmem:[#allocation3 + $0x3ac] ss:$16 sps:$4 sm:$0xff]  }
 0x973   : > { %8128 = vmatpush1.bf16.msra.mxu1 %v12073_v38  ;;  %8138 = vmatprep.subr.bf16.mxu0 %v12078_v34  ;;  %v12154_v38 = vld [vmem:[#allocation3 + $0x1a8] ss:$16 sps:$4 sm:$0xff]  }
 0x974   : > { %8179 = vmatprep.subr.bf16.mxu1 %v12081_v44  ;;  %v12157_v34 = vld [vmem:[#allocation3 + $0x3a8] ss:$16 sps:$4 sm:$0xff]   ;;  %v12165_v44 = vld [vmem:[#allocation3 + $0x3cc] ss:$16 sps:$4 sm:$0xff]  }
 0x975   : > { %8089 = vmatmul.mubr.bf16.vlgmr.msra.gmra.mrb[56].mxu0 %v12933_v61 }
 0x976   : > { %8130 = vmatmul.mubr.bf16.vlgmr.msra.gmra.mrb[56].mxu1 %v12935_v10  ;;  %8139 = vmatpush1.bf16.msra.mxu0 %v12076_v40  ;;  %v12163_v40 = vld [vmem:[#allocation3 + $0x3c8] ss:$16 sps:$4 sm:$0xff]  }
 0x977   : > { %8170 = vmatprep.mubr.bf16.mxu0 %v12926_v2  ;;  %8180 = vmatpush1.bf16.msra.mxu1 %v12079_v15  ;;  %v12097_v2 = vld [vmem:[#allocation3 + $0x268] ss:$16 sps:$4 sm:$0xff]   ;;  %v12168_v15 = vld [vmem:[#allocation3 + $0x1ec] ss:$16 sps:$4 sm:$0xff]  }
 0x978   : > { %8211 = vmatprep.mubr.bf16.mxu1 %v12929_v33  ;;  %8140 = vmatprep.subr.bf16.mxu0 %v12084_v45  ;;  %v12100_v33 = vld [vmem:[#allocation3 + $0x88] ss:$16 sps:$4 sm:$0xff]   ;;  %v12171_v45 = vld [vmem:[#allocation3 + $0x3ec] ss:$16 sps:$4 sm:$0xff]  }
 0x979   : > { %8181 = vmatprep.subr.bf16.mxu1 %v12087_v58  ;;  %v8221_v58 = vld [vmem:[#allocation2 + $0x8] sm:$0xfc] }
 0x97a   : > { %8141 = vmatpush1.bf16.msra.mxu0 %v12082_v42  ;;  %v12166_v42 = vld [vmem:[#allocation3 + $0x1e8] ss:$16 sps:$4 sm:$0xff]  }
 0x97b   : > { %8182 = vmatpush1.bf16.msra.mxu1 %v12085_v43  ;;  %8142 = vmatprep.subr.bf16.mxu0 %v12090_v35  ;;  %v8225_v43 = vld [vmem:[#allocation2 + $0x28] sm:$0x3]  ;;  %v8223_v35 = vld [vmem:[#allocation2 + $0x18] sm:$0xfc] }
 0x97c   : > { %8183 = vmatprep.subr.bf16.mxu1 %v12093_v60  ;;  %v12169_v60 = vld [vmem:[#allocation3 + $0x3e8] ss:$16 sps:$4 sm:$0xff]  }
 0x97e   : > { %8143 = vmatpush1.bf16.msra.mxu0 %v12088_v18  ;;  %v12174_v18 = vld [vmem:[#allocation3 + $0x804] ss:$16 sps:$4 sm:$0xff]  }
 0x97f   : > { %8184 = vmatpush1.bf16.msra.mxu1 %v12091_v12  ;;  %8144 = vmatprep.subr.bf16.mxu0 %v12096_v52  ;;  %v8227_v12 = vld [vmem:[#allocation2 + $0x38] sm:$0x3]  ;;  %v12177_v52 = vld [vmem:[#allocation3 + $0xa04] ss:$16 sps:$4 sm:$0xff]  }
 0x980   : > { %8185 = vmatprep.subr.bf16.mxu1 %v12099_v54  ;;  %v8229_v54 = vpack.c.bf16 %v8225_v43, %v8221_v58  ;;  %v12229_v58 = vld [vmem:[#allocation3 + $0xb20] ss:$16 sps:$4 sm:$0xff]   ;;  %v12237_v43 = vld [vmem:[#allocation3 + $0xb44] ss:$16 sps:$4 sm:$0xff]  }
 0x982   : > { %8145 = vmatpush1.bf16.msra.mxu0 %v12094_v28  ;;  %v12172_v28 = vld [vmem:[#allocation3 + $0x800] ss:$16 sps:$4 sm:$0xff]  }
 0x983   : > { %8186 = vmatpush1.bf16.msra.mxu1 %v12097_v2  ;;  %8146 = vmatprep.subr.bf16.mxu0 %v12102_v36  ;;  %v8231_v2 = vpack.c.bf16 %v8227_v12, %v8223_v35  ;;  %v12175_v36 = vld [vmem:[#allocation3 + $0xa00] ss:$16 sps:$4 sm:$0xff]   ;;  %v12243_v12 = vld [vmem:[#allocation3 + $0xb64] ss:$16 sps:$4 sm:$0xff]  }
 0x984   : > { %8187 = vmatprep.subr.bf16.mxu1 %v12105_v1  ;;  %v12180_v1 = vld [vmem:[#allocation3 + $0x824] ss:$16 sps:$4 sm:$0xff]   ;;  %v12232_v35 = vld [vmem:[#allocation3 + $0x940] ss:$16 sps:$4 sm:$0xff]  }
 0x986   : > { %8147 = vmatpush1.bf16.msra.mxu0 %v12100_v33  ;;  %v12942_v33 = vrot.slane %v8229_v54, 1  ;;  %v12241_v54 = vld [vmem:[#allocation3 + $0xb60] ss:$16 sps:$4 sm:$0xff]  }
 0x987   : > { %8188 = vmatpush1.bf16.msra.mxu1 %v12103_v56  ;;  %8148 = vmatprep.subr.bf16.mxu0 %v12108_v57  ;;  %v12183_v56 = vld [vmem:[#allocation3 + $0xa24] ss:$16 sps:$4 sm:$0xff]   ;;  %v12945_v57 = vrot.slane %v8231_v2, 1 }
 0x988   : > { %8189 = vmatprep.subr.bf16.mxu1 %v12111_v37  ;;  %v12178_v37 = vld [vmem:[#allocation3 + $0x820] ss:$16 sps:$4 sm:$0xff]   ;;  %v12249_v2 = vld [vmem:[#allocation3 + $0xb84] ss:$16 sps:$4 sm:$0xff]  }
 0x98a   : > { %8149 = vmatpush1.bf16.msra.mxu0 %v12106_v31  ;;  %v12181_v31 = vld [vmem:[#allocation3 + $0xa20] ss:$16 sps:$4 sm:$0xff]  }
 0x98b   : > { %8190 = vmatpush1.bf16.msra.mxu1 %v12109_v14  ;;  %8150 = vmatprep.subr.bf16.mxu0 %v12114_v63  ;;  %v12186_v14 = vld [vmem:[#allocation3 + $0x844] ss:$16 sps:$4 sm:$0xff]  }
 0x98c   : > { %8191 = vmatprep.subr.bf16.mxu1 %v12117_v11  ;;  %v12189_v63 = vld [vmem:[#allocation3 + $0xa44] ss:$16 sps:$4 sm:$0xff]   ;;  %v12187_v11 = vld [vmem:[#allocation3 + $0xa40] ss:$16 sps:$4 sm:$0xff]  }
 0x98e   : > { %8151 = vmatpush1.bf16.msra.mxu0 %v12112_v27  ;;  %v12195_v27 = vld [vmem:[#allocation3 + $0xa64] ss:$16 sps:$4 sm:$0xff]  }
 0x98f   : > { %8192 = vmatpush1.bf16.msra.mxu1 %v12115_v55  ;;  %8152 = vmatprep.subr.bf16.mxu0 %v12120_v0  ;;  %v12190_v55 = vld [vmem:[#allocation3 + $0x860] ss:$16 sps:$4 sm:$0xff]  }
 0x990   : > { %8193 = vmatprep.subr.bf16.mxu1 %v12123_v48  ;;  %v12193_v0 = vld [vmem:[#allocation3 + $0xa60] ss:$16 sps:$4 sm:$0xff]   ;;  %v12198_v48 = vld [vmem:[#allocation3 + $0x884] ss:$16 sps:$4 sm:$0xff]  }
 0x992   : > { %8153 = vmatpush1.bf16.msra.mxu0 %v12118_v3  ;;  %v12201_v3 = vld [vmem:[#allocation3 + $0xa84] ss:$16 sps:$4 sm:$0xff]  }
 0x993   : > { %8194 = vmatpush1.bf16.msra.mxu1 %v12121_v30  ;;  %8154 = vmatprep.subr.bf16.mxu0 %v12126_v51  ;;  %v12196_v30 = vld [vmem:[#allocation3 + $0x880] ss:$16 sps:$4 sm:$0xff]  }
 0x994   : > { %8195 = vmatprep.subr.bf16.mxu1 %v12129_v4  ;;  %v12199_v51 = vld [vmem:[#allocation3 + $0xa80] ss:$16 sps:$4 sm:$0xff]   ;;  %v12204_v4 = vld [vmem:[#allocation3 + $0x8a4] ss:$16 sps:$4 sm:$0xff]  }
 0x996   : > { %8155 = vmatpush1.bf16.msra.mxu0 %v12124_v5  ;;  %v12207_v5 = vld [vmem:[#allocation3 + $0xaa4] ss:$16 sps:$4 sm:$0xff]  }
 0x997   : > { %8196 = vmatpush1.bf16.msra.mxu1 %v12127_v53  ;;  %8156 = vmatprep.subr.bf16.mxu0 %v12132_v6  ;;  %v12202_v53 = vld [vmem:[#allocation3 + $0x8a0] ss:$16 sps:$4 sm:$0xff]  }
 0x998   : > { %8197 = vmatprep.subr.bf16.mxu1 %v12135_v8  ;;  %v12205_v6 = vld [vmem:[#allocation3 + $0xaa0] ss:$16 sps:$4 sm:$0xff]   ;;  %v12210_v8 = vld [vmem:[#allocation3 + $0x8c4] ss:$16 sps:$4 sm:$0xff]  }
 0x99a   : > { %8157 = vmatpush1.bf16.msra.mxu0 %v12130_v9 }
 0x99b   : > { %8198 = vmatpush1.bf16.msra.mxu1 %v12133_v49  ;;  %8158 = vmatprep.subr.bf16.mxu0 %v12138_v13  ;;  %v12213_v49 = vld [vmem:[#allocation3 + $0xac4] ss:$16 sps:$4 sm:$0xff]  }
 0x99c   : > { %8199 = vmatprep.subr.bf16.mxu1 %v12141_v62 }
 0x99e   : > { %8159 = vmatpush1.bf16.msra.mxu0 %v12136_v16 }
 0x99f   : > { %8200 = vmatpush1.bf16.msra.mxu1 %v12139_v19  ;;  %8160 = vmatprep.subr.bf16.mxu0 %v12144_v20 }
 0x9a0   : > { %8201 = vmatprep.subr.bf16.mxu1 %v12147_v21  ;;  %v12208_v21 = vld [vmem:[#allocation3 + $0x8c0] ss:$16 sps:$4 sm:$0xff]  }
 0x9a2   : > { %8161 = vmatpush1.bf16.msra.mxu0 %v12142_v7 }
 0x9a3   : > { %8202 = vmatpush1.bf16.msra.mxu1 %v12145_v23  ;;  %8162 = vmatprep.subr.bf16.mxu0 %v12150_v47 }
 0x9a4   : > { %8203 = vmatprep.subr.bf16.mxu1 %v12153_v24  ;;  %v12211_v24 = vld [vmem:[#allocation3 + $0xac0] ss:$16 sps:$4 sm:$0xff]  }
 0x9a6   : > { %8163 = vmatpush1.bf16.msra.mxu0 %v12148_v41  ;;  %v12216_v41 = vld [vmem:[#allocation3 + $0x8e4] ss:$16 sps:$4 sm:$0xff]  }
 0x9a7   : > { %8204 = vmatpush1.bf16.msra.mxu1 %v12151_v29  ;;  %8164 = vmatprep.subr.bf16.mxu0 %v12156_v50  ;;  %v12219_v50 = vld [vmem:[#allocation3 + $0xae4] ss:$16 sps:$4 sm:$0xff]  }
 0x9a8   : > { %8205 = vmatprep.subr.bf16.mxu1 %v12159_v32  ;;  %v12214_v32 = vld [vmem:[#allocation3 + $0x8e0] ss:$16 sps:$4 sm:$0xff]  }
 0x9aa   : > { %8165 = vmatpush1.bf16.msra.mxu0 %v12154_v38  ;;  %v12217_v38 = vld [vmem:[#allocation3 + $0xae0] ss:$16 sps:$4 sm:$0xff]  }
 0x9ab   : > { %8206 = vmatpush1.bf16.msra.mxu1 %v12157_v34  ;;  %8166 = vmatprep.subr.bf16.mxu0 %v12162_v39  ;;  %v12222_v34 = vld [vmem:[#allocation3 + $0x904] ss:$16 sps:$4 sm:$0xff]  }
 0x9ac   : > { %8207 = vmatprep.subr.bf16.mxu1 %v12165_v44  ;;  %v12225_v39 = vld [vmem:[#allocation3 + $0xb04] ss:$16 sps:$4 sm:$0xff]   ;;  %v12220_v44 = vld [vmem:[#allocation3 + $0x900] ss:$16 sps:$4 sm:$0xff]  }
 0x9ae   : > { %8167 = vmatpush1.bf16.msra.mxu0 %v12160_v17  ;;  %v12223_v17 = vld [vmem:[#allocation3 + $0xb00] ss:$16 sps:$4 sm:$0xff]  }
 0x9af   : > { %8208 = vmatpush1.bf16.msra.mxu1 %v12163_v40  ;;  %8168 = vmatprep.subr.bf16.mxu0 %v12168_v15  ;;  %v12228_v40 = vld [vmem:[#allocation3 + $0x924] ss:$16 sps:$4 sm:$0xff]  }
 0x9b0   : > { %8209 = vmatprep.subr.bf16.mxu1 %v12171_v45  ;;  %v12231_v15 = vld [vmem:[#allocation3 + $0xb24] ss:$16 sps:$4 sm:$0xff]   ;;  %v12226_v45 = vld [vmem:[#allocation3 + $0x920] ss:$16 sps:$4 sm:$0xff]  }
 0x9b2   : > { %8169 = vmatpush1.bf16.msra.mxu0 %v12166_v42  ;;  %v12234_v42 = vld [vmem:[#allocation3 + $0x944] ss:$16 sps:$4 sm:$0xff]  }
 0x9b3   : > { %8210 = vmatpush1.bf16.msra.mxu1 %v12169_v60  ;;  %9012 = vmatprep.subr.bf16.mxu0 %v12174_v18  ;;  %v12235_v60 = vld [vmem:[#allocation3 + $0xb40] ss:$16 sps:$4 sm:$0xff]   ;;  %v12240_v18 = vld [vmem:[#allocation3 + $0x964] ss:$16 sps:$4 sm:$0xff]  }
 0x9b4   : > { %9053 = vmatprep.subr.bf16.mxu1 %v12177_v52  ;;  %v12238_v52 = vld [vmem:[#allocation3 + $0x960] ss:$16 sps:$4 sm:$0xff]  }
 0x9b5   : > { %8171 = vmatmul.mubr.bf16.vlgmr.msra.gmra.mrb[60].mxu0 %v12933_v61  ;;  %v12184_v61 = vld [vmem:[#allocation3 + $0x840] ss:$16 sps:$4 sm:$0xff]  }
 0x9b6   : > { %8212 = vmatmul.mubr.bf16.vlgmr.msra.gmra.mrb[60].mxu1 %v12935_v10  ;;  %9013 = vmatpush1.bf16.msra.mxu0 %v12172_v28  ;;  %v12192_v10 = vld [vmem:[#allocation3 + $0x864] ss:$16 sps:$4 sm:$0xff]  }
 0x9b7   : > { %9044 = vmatprep.mubr.bf16.mxu0 %v12942_v33  ;;  %9054 = vmatpush1.bf16.msra.mxu1 %v12175_v36  ;;  %v12246_v28 = vld [vmem:[#allocation3 + $0x984] ss:$16 sps:$4 sm:$0xff]   ;;  %v12244_v36 = vld [vmem:[#allocation3 + $0x980] ss:$16 sps:$4 sm:$0xff]  }
 0x9b8   : > { %9085 = vmatprep.mubr.bf16.mxu1 %v12945_v57  ;;  %9014 = vmatprep.subr.bf16.mxu0 %v12180_v1  ;;  %v12247_v1 = vld [vmem:[#allocation3 + $0xb80] ss:$16 sps:$4 sm:$0xff]  }
 0x9b9   : > { %9055 = vmatprep.subr.bf16.mxu1 %v12183_v56  ;;  %v12252_v56 = vld [vmem:[#allocation3 + $0x9a4] ss:$16 sps:$4 sm:$0xff]  }
 0x9ba   : > { %9015 = vmatpush1.bf16.msra.mxu0 %v12178_v37  ;;  %v12255_v37 = vld [vmem:[#allocation3 + $0xba4] ss:$16 sps:$4 sm:$0xff]  }
 0x9bb   : > { %9056 = vmatpush1.bf16.msra.mxu1 %v12181_v31  ;;  %9016 = vmatprep.subr.bf16.mxu0 %v12186_v14  ;;  %v12250_v31 = vld [vmem:[#allocation3 + $0x9a0] ss:$16 sps:$4 sm:$0xff]  }
 0x9bc   : > { %9057 = vmatprep.subr.bf16.mxu1 %v12189_v63  ;;  %v12253_v14 = vld [vmem:[#allocation3 + $0xba0] ss:$16 sps:$4 sm:$0xff]   ;;  %v12258_v63 = vld [vmem:[#allocation3 + $0x9c4] ss:$16 sps:$4 sm:$0xff]  }
 0x9be   : > { %9017 = vmatpush1.bf16.msra.mxu0 %v12184_v61  ;;  %v12261_v61 = vld [vmem:[#allocation3 + $0xbc4] ss:$16 sps:$4 sm:$0xff]  }
 0x9bf   : > { %9058 = vmatpush1.bf16.msra.mxu1 %v12187_v11  ;;  %9018 = vmatprep.subr.bf16.mxu0 %v12192_v10  ;;  %v12256_v11 = vld [vmem:[#allocation3 + $0x9c0] ss:$16 sps:$4 sm:$0xff]  }
 0x9c0   : > { %9059 = vmatprep.subr.bf16.mxu1 %v12195_v27  ;;  %v12259_v10 = vld [vmem:[#allocation3 + $0xbc0] ss:$16 sps:$4 sm:$0xff]   ;;  %v12264_v27 = vld [vmem:[#allocation3 + $0x9e4] ss:$16 sps:$4 sm:$0xff]  }
 0x9c2   : > { %9019 = vmatpush1.bf16.msra.mxu0 %v12190_v55  ;;  %v12267_v55 = vld [vmem:[#allocation3 + $0xbe4] ss:$16 sps:$4 sm:$0xff]  }
 0x9c3   : > { %9060 = vmatpush1.bf16.msra.mxu1 %v12193_v0  ;;  %9020 = vmatprep.subr.bf16.mxu0 %v12198_v48  ;;  %v8220_v0 = vld [vmem:[#allocation2] sm:$0xfc]  ;;  %v8224_v48 = vld [vmem:[#allocation2 + $0x20] sm:$0x3] }
 0x9c4   : > { %9061 = vmatprep.subr.bf16.mxu1 %v12201_v3  ;;  %v8222_v3 = vld [vmem:[#allocation2 + $0x10] sm:$0xfc] }
 0x9c6   : > { %9021 = vmatpush1.bf16.msra.mxu0 %v12196_v30  ;;  %v8226_v30 = vld [vmem:[#allocation2 + $0x30] sm:$0x3] }
 0x9c7   : > { %9062 = vmatpush1.bf16.msra.mxu1 %v12199_v51  ;;  %9022 = vmatprep.subr.bf16.mxu0 %v12204_v4  ;;  %v12262_v51 = vld [vmem:[#allocation3 + $0x9e0] ss:$16 sps:$4 sm:$0xff]  }
 0x9c8   : > { %v7286_v9 = vpop.f32.mrb[48].mxu0  ;;  %9063 = vmatprep.subr.bf16.mxu1 %v12207_v5  ;;  %v12265_v4 = vld [vmem:[#allocation3 + $0xbe0] ss:$16 sps:$4 sm:$0xff]   ;;  %v8228_v5 = vpack.c.bf16 %v8224_v48, %v8220_v0  ;;  %v12327_v0 = vld [vmem:[#allocation3 + $0xb2c] ss:$16 sps:$4 sm:$0xff]  }
 0x9c9   : > { %v7327_v13 = vpop.f32.mrb[48].mxu1  ;;  %v7288_v62 = vpop.f32.mrb[49].mxu0  ;;  %v12322_v48 = vld [vmem:[#allocation3 + $0x928] ss:$16 sps:$4 sm:$0xff]  }
 0x9ca   : > { %v12949_v16 = vadd.f32 %v7327_v13, %v7286_v9  ;;  %v7329_v19 = vpop.f32.mrb[49].mxu1  ;;  %9023 = vmatpush1.bf16.msra.mxu0 %v12202_v53  ;;  %v7290_v20 = vpop.f32.mrb[50].mxu0  ;;  %v12270_v53 = vld [vmem:[#allocation3 + $0x80c] ss:$16 sps:$4 sm:$0xff]   ;;  %v12268_v9 = vld [vmem:[#allocation3 + $0x808] ss:$16 sps:$4 sm:$0xff]  }
 0x9cb   : > { %v12951_v7 = vadd.f32 %v7329_v19, %v7288_v62  ;;  %9064 = vmatpush1.bf16.msra.mxu1 %v12205_v6  ;;  %v7331_v23 = vpop.f32.mrb[50].mxu1  ;;  %v7291_v47 = vpop.f32.mrb[51].mxu0  ;;  %9024 = vmatprep.subr.bf16.mxu0 %v12210_v8  ;;  %v8230_v6 = vpack.c.bf16 %v8226_v30, %v8222_v3  ;;  %v12273_v8 = vld [vmem:[#allocation3 + $0xa0c] ss:$16 sps:$4 sm:$0xff]   ;;  %v12271_v13 = vld [vmem:[#allocation3 + $0xa08] ss:$16 sps:$4 sm:$0xff]  }
 0x9cc   : > { %v7332_v29 = vpop.f32.mrb[51].mxu1  ;;  %9065 = vmatprep.subr.bf16.mxu1 %v12213_v49  ;;  %v12953_v49 = vrot.slane %v8228_v5, 1  ;;  %v12276_v19 = vld [vmem:[#allocation3 + $0x82c] ss:$16 sps:$4 sm:$0xff]   ;;  %v12277_v23 = vld [vmem:[#allocation3 + $0xa28] ss:$16 sps:$4 sm:$0xff]  }
 0x9cd   : > { %v12955_v62 = vrot.slane %v8230_v6, 1  ;;  %v12279_v20 = vld [vmem:[#allocation3 + $0xa2c] ss:$16 sps:$4 sm:$0xff]   ;;  %v12283_v29 = vld [vmem:[#allocation3 + $0xa48] ss:$16 sps:$4 sm:$0xff]  }
 0x9ce   : > { %9025 = vmatpush1.bf16.msra.mxu0 %v12208_v21  ;;  %v12274_v21 = vld [vmem:[#allocation3 + $0x828] ss:$16 sps:$4 sm:$0xff]   ;;  %v12282_v47 = vld [vmem:[#allocation3 + $0x84c] ss:$16 sps:$4 sm:$0xff]  }
 0x9cf   : > { %9066 = vmatpush1.bf16.msra.mxu1 %v12211_v24  ;;  %9026 = vmatprep.subr.bf16.mxu0 %v12216_v41  ;;  %v12285_v24 = vld [vmem:[#allocation3 + $0xa4c] ss:$16 sps:$4 sm:$0xff]   ;;  %v12280_v41 = vld [vmem:[#allocation3 + $0x848] ss:$16 sps:$4 sm:$0xff]  }
 0x9d0   : > { %9067 = vmatprep.subr.bf16.mxu1 %v12219_v50  ;;  %v12288_v50 = vld [vmem:[#allocation3 + $0x86c] ss:$16 sps:$4 sm:$0xff]   ;;  %v12325_v3 = vld [vmem:[#allocation3 + $0xb28] ss:$16 sps:$4 sm:$0xff]  }
 0x9d1   : > { %v12330_v30 = vld [vmem:[#allocation3 + $0x94c] ss:$16 sps:$4 sm:$0xff]   ;;  %v12331_v5 = vld [vmem:[#allocation3 + $0xb48] ss:$16 sps:$4 sm:$0xff]  }
 0x9d2   : > { %9027 = vmatpush1.bf16.msra.mxu0 %v12214_v32  ;;  %v12291_v32 = vld [vmem:[#allocation3 + $0xa6c] ss:$16 sps:$4 sm:$0xff]  }
 0x9d3   : > { %9068 = vmatpush1.bf16.msra.mxu1 %v12217_v38  ;;  %9028 = vmatprep.subr.bf16.mxu0 %v12222_v34  ;;  %v12286_v38 = vld [vmem:[#allocation3 + $0x868] ss:$16 sps:$4 sm:$0xff]   ;;  %v12294_v34 = vld [vmem:[#allocation3 + $0x88c] ss:$16 sps:$4 sm:$0xff]  }
 0x9d4   : > { %9069 = vmatprep.subr.bf16.mxu1 %v12225_v39  ;;  %v12297_v39 = vld [vmem:[#allocation3 + $0xa8c] ss:$16 sps:$4 sm:$0xff]  }
 0x9d5   : > { %v12339_v6 = vld [vmem:[#allocation3 + $0xb6c] ss:$16 sps:$4 sm:$0xff]  }
 0x9d6   : > { %9029 = vmatpush1.bf16.msra.mxu0 %v12220_v44  ;;  %v12295_v44 = vld [vmem:[#allocation3 + $0xa88] ss:$16 sps:$4 sm:$0xff]  }
 0x9d7   : > { %9070 = vmatpush1.bf16.msra.mxu1 %v12223_v17  ;;  %9030 = vmatprep.subr.bf16.mxu0 %v12228_v40  ;;  %v12300_v17 = vld [vmem:[#allocation3 + $0x8ac] ss:$16 sps:$4 sm:$0xff]  }
 0x9d8   : > { %9071 = vmatprep.subr.bf16.mxu1 %v12231_v15  ;;  %v12303_v40 = vld [vmem:[#allocation3 + $0xaac] ss:$16 sps:$4 sm:$0xff]   ;;  %v12298_v15 = vld [vmem:[#allocation3 + $0x8a8] ss:$16 sps:$4 sm:$0xff]  }
 0x9da   : > { %9031 = vmatpush1.bf16.msra.mxu0 %v12226_v45  ;;  %v12301_v45 = vld [vmem:[#allocation3 + $0xaa8] ss:$16 sps:$4 sm:$0xff]  }
 0x9db   : > { %9072 = vmatpush1.bf16.msra.mxu1 %v12229_v58  ;;  %9032 = vmatprep.subr.bf16.mxu0 %v12234_v42  ;;  %v12306_v58 = vld [vmem:[#allocation3 + $0x8cc] ss:$16 sps:$4 sm:$0xff]  }
 0x9dc   : > { %9073 = vmatprep.subr.bf16.mxu1 %v12237_v43  ;;  %v12309_v43 = vld [vmem:[#allocation3 + $0xacc] ss:$16 sps:$4 sm:$0xff]  }
 0x9de   : > { %9033 = vmatpush1.bf16.msra.mxu0 %v12232_v35 }
 0x9df   : > { %9074 = vmatpush1.bf16.msra.mxu1 %v12235_v60  ;;  %9034 = vmatprep.subr.bf16.mxu0 %v12240_v18 }
 0x9e0   : > { %9075 = vmatprep.subr.bf16.mxu1 %v12243_v12 }
 0x9e2   : > { %9035 = vmatpush1.bf16.msra.mxu0 %v12238_v52 }
 0x9e3   : > { %9076 = vmatpush1.bf16.msra.mxu1 %v12241_v54  ;;  %9036 = vmatprep.subr.bf16.mxu0 %v12246_v28  ;;  %v12304_v54 = vld [vmem:[#allocation3 + $0x8c8] ss:$16 sps:$4 sm:$0xff]  }
 0x9e4   : > { %9077 = vmatprep.subr.bf16.mxu1 %v12249_v2 }
 0x9e6   : > { %9037 = vmatpush1.bf16.msra.mxu0 %v12244_v36 }
 0x9e7   : > { %9078 = vmatpush1.bf16.msra.mxu1 %v12247_v1  ;;  %9038 = vmatprep.subr.bf16.mxu0 %v12252_v56  ;;  %v12307_v1 = vld [vmem:[#allocation3 + $0xac8] ss:$16 sps:$4 sm:$0xff]   ;;  %v12312_v56 = vld [vmem:[#allocation3 + $0x8ec] ss:$16 sps:$4 sm:$0xff]  }
 0x9e8   : > { %9079 = vmatprep.subr.bf16.mxu1 %v12255_v37 }
 0x9ea   : > { %9039 = vmatpush1.bf16.msra.mxu0 %v12250_v31  ;;  %v12315_v31 = vld [vmem:[#allocation3 + $0xaec] ss:$16 sps:$4 sm:$0xff]  }
 0x9eb   : > { %9080 = vmatpush1.bf16.msra.mxu1 %v12253_v14  ;;  %9040 = vmatprep.subr.bf16.mxu0 %v12258_v63  ;;  %v12310_v14 = vld [vmem:[#allocation3 + $0x8e8] ss:$16 sps:$4 sm:$0xff]  }
 0x9ec   : > { %9081 = vmatprep.subr.bf16.mxu1 %v12261_v61  ;;  %v12313_v63 = vld [vmem:[#allocation3 + $0xae8] ss:$16 sps:$4 sm:$0xff]   ;;  %v12318_v61 = vld [vmem:[#allocation3 + $0x90c] ss:$16 sps:$4 sm:$0xff]  }
 0x9ee   : > { %9041 = vmatpush1.bf16.msra.mxu0 %v12256_v11  ;;  %v12321_v11 = vld [vmem:[#allocation3 + $0xb0c] ss:$16 sps:$4 sm:$0xff]  }
 0x9ef   : > { %9082 = vmatpush1.bf16.msra.mxu1 %v12259_v10  ;;  %9042 = vmatprep.subr.bf16.mxu0 %v12264_v27  ;;  %v12316_v10 = vld [vmem:[#allocation3 + $0x908] ss:$16 sps:$4 sm:$0xff]  }
 0x9f0   : > { %9083 = vmatprep.subr.bf16.mxu1 %v12267_v55  ;;  %v12319_v27 = vld [vmem:[#allocation3 + $0xb08] ss:$16 sps:$4 sm:$0xff]   ;;  %v12324_v55 = vld [vmem:[#allocation3 + $0x92c] ss:$16 sps:$4 sm:$0xff]  }
 0x9f2   : > { %9043 = vmatpush1.bf16.msra.mxu0 %v12262_v51  ;;  %v12333_v51 = vld [vmem:[#allocation3 + $0xb4c] ss:$16 sps:$4 sm:$0xff]  }
 0x9f3   : > { %9084 = vmatpush1.bf16.msra.mxu1 %v12265_v4  ;;  %9094 = vmatprep.subr.bf16.mxu0 %v12270_v53  ;;  %v12328_v4 = vld [vmem:[#allocation3 + $0x948] ss:$16 sps:$4 sm:$0xff]   ;;  %v12336_v53 = vld [vmem:[#allocation3 + $0x96c] ss:$16 sps:$4 sm:$0xff]  }
 0x9f4   : > { %9135 = vmatprep.subr.bf16.mxu1 %v12273_v8  ;;  %v12334_v8 = vld [vmem:[#allocation3 + $0x968] ss:$16 sps:$4 sm:$0xff]  }
 0x9f5   : > { %9045 = vmatmul.mubr.bf16.vlgmr.msra.gmra.mrb[64].mxu0 %v12953_v49 }
 0x9f6   : > { %9086 = vmatmul.mubr.bf16.vlgmr.msra.gmra.mrb[64].mxu1 %v12955_v62  ;;  %9095 = vmatpush1.bf16.msra.mxu0 %v12268_v9  ;;  %v12337_v9 = vld [vmem:[#allocation3 + $0xb68] ss:$16 sps:$4 sm:$0xff]  }
 0x9f7   : > { %9126 = vmatprep.mubr.bf16.mxu0 %v12942_v33  ;;  %9136 = vmatpush1.bf16.msra.mxu1 %v12271_v13  ;;  %v12289_v33 = vld [vmem:[#allocation3 + $0xa68] ss:$16 sps:$4 sm:$0xff]   ;;  %v12342_v13 = vld [vmem:[#allocation3 + $0x98c] ss:$16 sps:$4 sm:$0xff]  }
 0x9f8   : > { %9167 = vmatprep.mubr.bf16.mxu1 %v12945_v57  ;;  %9096 = vmatprep.subr.bf16.mxu0 %v12276_v19  ;;  %v12292_v57 = vld [vmem:[#allocation3 + $0x888] ss:$16 sps:$4 sm:$0xff]   ;;  %v12345_v19 = vld [vmem:[#allocation3 + $0xb8c] ss:$16 sps:$4 sm:$0xff]  }
 0x9f9   : > { %9137 = vmatprep.subr.bf16.mxu1 %v12279_v20  ;;  %v12340_v20 = vld [vmem:[#allocation3 + $0x988] ss:$16 sps:$4 sm:$0xff]  }
 0x9fa   : > { %9097 = vmatpush1.bf16.msra.mxu0 %v12274_v21  ;;  %v12343_v21 = vld [vmem:[#allocation3 + $0xb88] ss:$16 sps:$4 sm:$0xff]  }
 0x9fb   : > { %9138 = vmatpush1.bf16.msra.mxu1 %v12277_v23  ;;  %9098 = vmatprep.subr.bf16.mxu0 %v12282_v47  ;;  %v12348_v23 = vld [vmem:[#allocation3 + $0x9ac] ss:$16 sps:$4 sm:$0xff]  }
 0x9fc   : > { %9139 = vmatprep.subr.bf16.mxu1 %v12285_v24  ;;  %v12351_v47 = vld [vmem:[#allocation3 + $0xbac] ss:$16 sps:$4 sm:$0xff]   ;;  %v12346_v24 = vld [vmem:[#allocation3 + $0x9a8] ss:$16 sps:$4 sm:$0xff]  }
 0x9fe   : > { %9099 = vmatpush1.bf16.msra.mxu0 %v12280_v41  ;;  %v12349_v41 = vld [vmem:[#allocation3 + $0xba8] ss:$16 sps:$4 sm:$0xff]  }
 0x9ff   : > { %9140 = vmatpush1.bf16.msra.mxu1 %v12283_v29  ;;  %9100 = vmatprep.subr.bf16.mxu0 %v12288_v50  ;;  %v12354_v29 = vld [vmem:[#allocation3 + $0x9cc] ss:$16 sps:$4 sm:$0xff]  }
 0xa00   : > { %9141 = vmatprep.subr.bf16.mxu1 %v12291_v32  ;;  %v12357_v50 = vld [vmem:[#allocation3 + $0xbcc] ss:$16 sps:$4 sm:$0xff]   ;;  %v12352_v32 = vld [vmem:[#allocation3 + $0x9c8] ss:$16 sps:$4 sm:$0xff]  }
 0xa02   : > { %9101 = vmatpush1.bf16.msra.mxu0 %v12286_v38  ;;  %v12355_v38 = vld [vmem:[#allocation3 + $0xbc8] ss:$16 sps:$4 sm:$0xff]  }
 0xa03   : > { %9142 = vmatpush1.bf16.msra.mxu1 %v12289_v33  ;;  %9102 = vmatprep.subr.bf16.mxu0 %v12294_v34  ;;  %v12360_v33 = vld [vmem:[#allocation3 + $0x9ec] ss:$16 sps:$4 sm:$0xff]  }
 0xa04   : > { %9143 = vmatprep.subr.bf16.mxu1 %v12297_v39  ;;  %v12363_v34 = vld [vmem:[#allocation3 + $0xbec] ss:$16 sps:$4 sm:$0xff]   ;;  %v12358_v39 = vld [vmem:[#allocation3 + $0x9e8] ss:$16 sps:$4 sm:$0xff]  }
 0xa06   : > { %9103 = vmatpush1.bf16.msra.mxu0 %v12292_v57  ;;  %v12361_v57 = vld [vmem:[#allocation3 + $0xbe8] ss:$16 sps:$4 sm:$0xff]  }
 0xa07   : > { %9144 = vmatpush1.bf16.msra.mxu1 %v12295_v44  ;;  %9104 = vmatprep.subr.bf16.mxu0 %v12300_v17 }
 0xa08   : > { %v7368_v42 = vpop.f32.mrb[52].mxu0  ;;  %9145 = vmatprep.subr.bf16.mxu1 %v12303_v40 }
 0xa09   : > { %v7409_v35 = vpop.f32.mrb[52].mxu1  ;;  %v7370_v60 = vpop.f32.mrb[53].mxu0 }
 0xa0a   : > { %v12961_v18 = vadd.f32 %v7409_v35, %v7368_v42  ;;  %v7411_v12 = vpop.f32.mrb[53].mxu1  ;;  %v7372_v52 = vpop.f32.mrb[54].mxu0  ;;  %9105 = vmatpush1.bf16.msra.mxu0 %v12298_v15 }
 0xa0b   : > { %v12963_v28 = vadd.f32 %v7411_v12, %v7370_v60  ;;  %v7413_v2 = vpop.f32.mrb[54].mxu1  ;;  %9146 = vmatpush1.bf16.msra.mxu1 %v12301_v45  ;;  %v7373_v36 = vpop.f32.mrb[55].mxu0  ;;  %9106 = vmatprep.subr.bf16.mxu0 %v12306_v58 }
 0xa0c   : > { %v7414_v37 = vpop.f32.mrb[55].mxu1  ;;  %9147 = vmatprep.subr.bf16.mxu1 %v12309_v43 }
 0xa0e   : > { %9107 = vmatpush1.bf16.msra.mxu0 %v12304_v54 }
 0xa0f   : > { %9148 = vmatpush1.bf16.msra.mxu1 %v12307_v1  ;;  %9108 = vmatprep.subr.bf16.mxu0 %v12312_v56 }
 0xa10   : > { %9149 = vmatprep.subr.bf16.mxu1 %v12315_v31 }
 0xa12   : > { %9109 = vmatpush1.bf16.msra.mxu0 %v12310_v14 }
 0xa13   : > { %9150 = vmatpush1.bf16.msra.mxu1 %v12313_v63  ;;  %9110 = vmatprep.subr.bf16.mxu0 %v12318_v61 }
 0xa14   : > { %9151 = vmatprep.subr.bf16.mxu1 %v12321_v11 }
 0xa16   : > { %9111 = vmatpush1.bf16.msra.mxu0 %v12316_v10 }
 0xa17   : > { %9152 = vmatpush1.bf16.msra.mxu1 %v12319_v27  ;;  %9112 = vmatprep.subr.bf16.mxu0 %v12324_v55 }
 0xa18   : > { %9153 = vmatprep.subr.bf16.mxu1 %v12327_v0 }
 0xa1a   : > { %9113 = vmatpush1.bf16.msra.mxu0 %v12322_v48 }
 0xa1b   : > { %9154 = vmatpush1.bf16.msra.mxu1 %v12325_v3  ;;  %9114 = vmatprep.subr.bf16.mxu0 %v12330_v30 }
 0xa1c   : > { %9155 = vmatprep.subr.bf16.mxu1 %v12333_v51 }
 0xa1e   : > { %9115 = vmatpush1.bf16.msra.mxu0 %v12328_v4 }
 0xa1f   : > { %9156 = vmatpush1.bf16.msra.mxu1 %v12331_v5  ;;  %9116 = vmatprep.subr.bf16.mxu0 %v12336_v53 }
 0xa20   : > { %9157 = vmatprep.subr.bf16.mxu1 %v12339_v6 }
 0xa22   : > { %9117 = vmatpush1.bf16.msra.mxu0 %v12334_v8 }
 0xa23   : > { %9158 = vmatpush1.bf16.msra.mxu1 %v12337_v9  ;;  %9118 = vmatprep.subr.bf16.mxu0 %v12342_v13 }
 0xa24   : > { %9159 = vmatprep.subr.bf16.mxu1 %v12345_v19 }
 0xa26   : > { %9119 = vmatpush1.bf16.msra.mxu0 %v12340_v20 }
 0xa27   : > { %9160 = vmatpush1.bf16.msra.mxu1 %v12343_v21  ;;  %9120 = vmatprep.subr.bf16.mxu0 %v12348_v23 }
 0xa28   : > { %9161 = vmatprep.subr.bf16.mxu1 %v12351_v47 }
 0xa2a   : > { %9121 = vmatpush1.bf16.msra.mxu0 %v12346_v24 }
 0xa2b   : > { %9162 = vmatpush1.bf16.msra.mxu1 %v12349_v41  ;;  %9122 = vmatprep.subr.bf16.mxu0 %v12354_v29 }
 0xa2c   : > { %9163 = vmatprep.subr.bf16.mxu1 %v12357_v50 }
 0xa2e   : > { %9123 = vmatpush1.bf16.msra.mxu0 %v12352_v32 }
 0xa2f   : > { %9164 = vmatpush1.bf16.msra.mxu1 %v12355_v38  ;;  %9124 = vmatprep.subr.bf16.mxu0 %v12360_v33 }
 0xa30   : > { %9165 = vmatprep.subr.bf16.mxu1 %v12363_v34 }
 0xa32   : > { %9125 = vmatpush1.bf16.msra.mxu0 %v12358_v39 }
 0xa33   : > { %9166 = vmatpush1.bf16.msra.mxu1 %v12361_v57 }
 0xa35   : > { %9127 = vmatmul.mubr.bf16.vlgmr.msra.gmra.mrb[68].mxu0 %v12953_v49 }
 0xa36   : > { %9168 = vmatmul.mubr.bf16.vlgmr.msra.gmra.mrb[68].mxu1 %v12955_v62 }
 0xa48   : > { %v8090_v44 = vpop.f32.mrb[56].mxu0 }
 0xa49   : > { %v8091_v17 = vadd.f32 %v8090_v44, %v12949_v16  ;;  %v8131_v40 = vpop.f32.mrb[56].mxu1  ;;  %v8092_v15 = vpop.f32.mrb[57].mxu0 }
 0xa4a   : > { %v8093_v45 = vadd.f32 %v8092_v15, %v12951_v7  ;;  %v8133_v58 = vpop.f32.mrb[57].mxu1  ;;  %v8094_v42 = vpop.f32.mrb[58].mxu0 }
 0xa4b   : > { %v8132_v43 = vadd.f32 %v8131_v40, %v8091_v17  ;;  %v8135_v35 = vpop.f32.mrb[58].mxu1  ;;  %v8095_v60 = vpop.f32.mrb[59].mxu0 }
 0xa4c   : > { %v8134_v12 = vadd.f32 %v8133_v58, %v8093_v45  ;;  %v8136_v52 = vpop.f32.mrb[59].mxu1 }
 0xa88   : > { %v8172_v54 = vpop.f32.mrb[60].mxu0 }
 0xa89   : > { %v8173_v2 = vadd.f32 %v8172_v54, %v12961_v18  ;;  %v8213_v49 = vpop.f32.mrb[60].mxu1  ;;  %v8174_v36 = vpop.f32.mrb[61].mxu0 }
 0xa8a   : > { %v8175_v62 = vadd.f32 %v8174_v36, %v12963_v28  ;;  %v8215_v1 = vpop.f32.mrb[61].mxu1  ;;  %v8176_v16 = vpop.f32.mrb[62].mxu0 }
 0xa8b   : > { %v8214_v56 = vadd.f32 %v8213_v49, %v8173_v2  ;;  %v8217_v37 = vpop.f32.mrb[62].mxu1  ;;  %v8177_v31 = vpop.f32.mrb[63].mxu0 }
 0xa8c   : > { %v8216_v7 = vadd.f32 %v8215_v1, %v8175_v62  ;;  %v8218_v14 = vpop.f32.mrb[63].mxu1 }
 0xac8   : > { %v9046_v63 = vpop.f32.mrb[64].mxu0 }
 0xac9   : > { %v9087_v61 = vpop.f32.mrb[64].mxu1  ;;  %v9048_v11 = vpop.f32.mrb[65].mxu0 }
 0xaca   : > { %v9088_v10 = vadd.f32 %v9087_v61, %v9046_v63  ;;  %v9089_v27 = vpop.f32.mrb[65].mxu1  ;;  %v9050_v55 = vpop.f32.mrb[66].mxu0 }
 0xacb   : > { %v9090_v0 = vadd.f32 %v9089_v27, %v9048_v11  ;;  %v9091_v48 = vpop.f32.mrb[66].mxu1  ;;  %v9051_v18 = vpop.f32.mrb[67].mxu0 }
 0xacc   : > { %v9176_v3 = vadd.f32 %v9088_v10, %v8132_v43  ;;  %v9092_v30 = vpop.f32.mrb[67].mxu1 }
 0xacd   : > { %v9177_v51 = vadd.f32 %v9090_v0, %v8134_v12 }
 0xace   : > { %v12972_v28 = vadd.f32 %v9176_v3, %v12735_v25 }
 0xacf   : > { %v12975_v4 = vadd.f32 %v9177_v51, %v12737_v26 }
 0xad0   : > { %v9208_v5 = vmul.f32 %v12972_v28, %v12972_v28  ;;  %v9184_v6 = vrot.slane %v12972_v28, 4 }
 0xad1   : > { %v9209_v53 = vmul.f32 %v12975_v4, %v12975_v4  ;;  %v9190_v8 = vrot.slane %v12975_v4, 4 }
 0xad2   : > { %v9212_v13 = vrot.slane %v9208_v5, 4  ;;  %v9185_v26 = vadd.f32 %v9184_v6, %v12972_v28 }
 0xad3   : > { %v9218_v21 = vrot.slane %v9209_v53, 4  ;;  %v9191_v50 = vadd.f32 %v9190_v8, %v12975_v4 }
 0xad4   : > { %v9213_v33 = vadd.f32 %v9212_v13, %v9208_v5  ;;  %v9186_v44 = vrot.slane %v9185_v26, 2 }
 0xad5   : > { %v9219_v39 = vadd.f32 %v9218_v21, %v9209_v53  ;;  %v9192_v40 = vrot.slane %v9191_v50, 2 }
 0xad6   : > { %v9214_v58 = vrot.slane %v9213_v33, 2  ;;  %v9187_v60 = vadd.f32 %v9186_v44, %v9185_v26 }
 0xad7   : > { %v9220_v35 = vrot.slane %v9219_v39, 2  ;;  %v9193_v52 = vadd.f32 %v9192_v40, %v9191_v50 }
 0xad8   : > { %v9215_v49 = vadd.f32 %v9214_v58, %v9213_v33 }
 0xad9   : > { %v9221_v1 = vadd.f32 %v9220_v35, %v9219_v39 }
 0xada   : > { %v9216_v11 = vrot.slane %v9215_v49, 1 }
 0xadb   : > { %v9222_v55 = vrot.slane %v9221_v1, 1 }
 0xadc   : > { %v9217_v6 = vadd.f32 %v9216_v11, %v9215_v49 }
 0xadd   : > { %v9223_v13 = vadd.f32 %v9222_v55, %v9221_v1 }
 0xb08   : > { %v9128_v9 = vpop.f32.mrb[68].mxu0 }
 0xb09   : > { %v9169_v19 = vpop.f32.mrb[68].mxu1  ;;  %v9130_v20 = vpop.f32.mrb[69].mxu0 }
 0xb0a   : > { %v9170_v25 = vadd.f32 %v9169_v19, %v9128_v9  ;;  %v9171_v23 = vpop.f32.mrb[69].mxu1  ;;  %v9132_v47 = vpop.f32.mrb[70].mxu0 }
 0xb0b   : > { %v9172_v24 = vadd.f32 %v9171_v23, %v9130_v20  ;;  %v9173_v41 = vpop.f32.mrb[70].mxu1  ;;  %v9133_v29 = vpop.f32.mrb[71].mxu0 }
 0xb0c   : > { %v9178_v32 = vadd.f32 %v9170_v25, %v8214_v56  ;;  %v9174_v38 = vpop.f32.mrb[71].mxu1  ;;  %v9188_v56 = vrot.slane %v9187_v60, 1 }
 0xb0d   : > { %v9179_v34 = vadd.f32 %v9172_v24, %v8216_v7  ;;  %v9194_v7 = vrot.slane %v9193_v52, 1 }
 0xb0e   : > { %v12986_v57 = vadd.f32 %v9178_v32, %v12751_v46  ;;  %v9189_v48 = vadd.f32 %v9188_v56, %v9187_v60 }
 0xb0f   : > { %v12989_v17 = vadd.f32 %v9179_v34, %v12754_v59  ;;  %v9195_v30 = vadd.f32 %v9194_v7, %v9193_v52 }
 0xb10   : > { %v9196_v15 = vrot.slane %v12986_v57, 4  ;;  %v9210_v45 = vmul.f32 %v12986_v57, %v12986_v57 }
 0xb11   : > { %v9202_v42 = vrot.slane %v12989_v17, 4  ;;  %v9211_v43 = vmul.f32 %v12989_v17, %v12989_v17 }
 0xb12   : > { %v9197_v46 = vadd.f32 %v9196_v15, %v12986_v57  ;;  %v9224_v12 = vrot.slane %v9210_v45, 4 }
 0xb13   : > { %v9203_v59 = vadd.f32 %v9202_v42, %v12989_v17  ;;  %v9230_v54 = vrot.slane %v9211_v43, 4 }
 0xb14   : > { %v9198_v2 = vrot.slane %v9197_v46, 2  ;;  %v9225_v36 = vadd.f32 %v9224_v12, %v9210_v45 }
 0xb15   : > { %v9204_v62 = vrot.slane %v9203_v59, 2  ;;  %v9231_v16 = vadd.f32 %v9230_v54, %v9211_v43 }
 0xb16   : > { %v9199_v37 = vadd.f32 %v9198_v2, %v9197_v46  ;;  %v9226_v31 = vrot.slane %v9225_v36, 2 }
 0xb17   : > { %v9205_v14 = vadd.f32 %v9204_v62, %v9203_v59  ;;  %v9232_v63 = vrot.slane %v9231_v16, 2 }
 0xb18   : > { %v9200_v61 = vrot.slane %v9199_v37, 1  ;;  %v9227_v10 = vadd.f32 %v9226_v31, %v9225_v36 }
 0xb19   : > { %v9206_v27 = vrot.slane %v9205_v14, 1  ;;  %v9233_v0 = vadd.f32 %v9232_v63, %v9231_v16 }
 0xb1a   : > { %v9201_v18 = vadd.f32 %v9200_v61, %v9199_v37  ;;  %v9228_v3 = vrot.slane %v9227_v10, 1 }
 0xb1b   : > { %v9207_v51 = vadd.f32 %v9206_v27, %v9205_v14  ;;  %v9234_v5 = vrot.slane %v9233_v0, 1 }
 0xb1c   : > { %v9236_v53 = vadd.f32 %v9201_v18, %v9189_v48  ;;  %v9229_v8 = vadd.f32 %v9228_v3, %v9227_v10 }
 0xb1d   : > { %v9237_v9 = vadd.f32 %v9207_v51, %v9195_v30  ;;  %v9235_v19 = vadd.f32 %v9234_v5, %v9233_v0 }
 0xb1e   : > { %v9252_v20 = vadd.f32 %v9229_v8, %v9217_v6 }
 0xb1f   : > { %v9238_v21 = vadd.f32 %v9237_v9, %v9236_v53  ;;  %v9253_v25 = vadd.f32 %v9235_v19, %v9223_v13 }
 0xb21   : > { %9239 = vrot.lane.b32.xlu0 %v9238_v21, %s12508_s17  ;;  %v9254_v23 = vadd.f32 %v9253_v25, %v9252_v20 }
 0xb23   : > { %9255 = vrot.lane.b32.xlu1 %v9254_v23, %s12508_s17 }
 0xb93   : > { %v9240_v47 = vpop.permute.xlu0 %9239 }
 0xb94   : > { %v9241_v26 = vadd.f32 %v9240_v47, %v9238_v21 }
 0xb95   : > { %v9256_v24 = vpop.permute.xlu1 %9255 }
 0xb96   : > { %v9257_v41 = vadd.f32 %v9256_v24, %v9254_v23  ;;  %9242 = vrot.lane.b32.xlu0 %v9241_v26, %s12509_s19 }
 0xb98   : > { %9258 = vrot.lane.b32.xlu1 %v9257_v41, %s12509_s19 }
 0xc08   : > { %v9243_v29 = vpop.permute.xlu0 %9242 }
 0xc09   : > { %v9244_v50 = vadd.f32 %v9243_v29, %v9241_v26 }
 0xc0a   : > { %v9259_v32 = vpop.permute.xlu1 %9258 }
 0xc0b   : > { %v9260_v38 = vadd.f32 %v9259_v32, %v9257_v41  ;;  %9245 = vrot.lane.b32.xlu0 %v9244_v50, %s12510_s20 }
 0xc0d   : > { %9261 = vrot.lane.b32.xlu1 %v9260_v38, %s12510_s20 }
 0xc7d   : > { %v9246_v33 = vpop.permute.xlu0 %9245 }
 0xc7e   : > { %v9247_v34 = vadd.f32 %v9246_v33, %v9244_v50 }
 0xc7f   : > { %v9262_v39 = vpop.permute.xlu1 %9261 }
 0xc80   : > { %v9263_v44 = vadd.f32 %v9262_v39, %v9260_v38  ;;  %9248 = vrot.lane.b32.xlu0 %v9247_v34, %s12511_s25 }
 0xc82   : > { %9264 = vrot.lane.b32.xlu1 %v9263_v44, %s12511_s25 }
 0xcf2   : > { %v9249_v40 = vpop.permute.xlu0 %9248 }
 0xcf3   : > { %v9250_v15 = vadd.f32 %v9249_v40, %v9247_v34 }
 0xcf4   : > { %v9265_v45 = vpop.permute.xlu1 %9264 }
 0xcf5   : > { %v9251_v58 = vmul.f32 0.001953125, %v9250_v15  ;;  %v9266_v42 = vadd.f32 %v9265_v45, %v9263_v44 }
 0xcf7   : > { %v9268_v43 = vmul.f32 %v9251_v58, %v9251_v58  ;;  %v9267_v35 = vmul.f32 0.001953125, %v9266_v42  ;;  %v9275_v12 = vrot.slane %v9251_v58, %v12732_v22 }
 0xcf9   : > { %v9269_v60 = vsub.f32 %v9267_v35, %v9268_v43  ;;  %v9276_v59 = vsub.f32 %v12972_v28, %v9275_v12  ;;  %v9277_v54 = vsub.f32 %v12975_v4, %v9275_v12  ;;  %v9278_v2 = vsub.f32 %v12986_v57, %v9275_v12 }
 0xcfa   : > { %v9279_v49 = vsub.f32 %v12989_v17, %v9275_v12 }
 0xcfb   : > { %v9270_v46 = vadd.f32 1e-05, %v9269_v60 }
 0xcfd   : > { %12368 = vrsqrt.f32 %v9270_v46 }
 0xd07   : > { %v12369_v52 = vpop.eup %12368 }
 0xd08   : > { %v9283_v36 = vrot.slane %v12369_v52, %v12732_v22 }
 0xd0a   : > { %v9284_v62 = vmul.f32 %v9283_v36, %v9276_v59  ;;  %v9285_v1 = vmul.f32 %v9283_v36, %v9277_v54  ;;  %v9286_v16 = vmul.f32 %v9283_v36, %v9278_v2  ;;  %v9287_v56 = vmul.f32 %v9283_v36, %v9279_v49 }
 0xd0c   : > { %vm9288_vm9 = vcmp.ge.f32.partialorder %v9284_v62, 0.0  ;;  %vm9289_vm10 = vcmp.ge.f32.partialorder %v9285_v1, 0.0  ;;  %vm9290_vm11 = vcmp.ge.f32.partialorder %v9286_v16, 0.0  ;;  %vm9291_vm12 = vcmp.ge.f32.partialorder %v9287_v56, 0.0 }
 0xd0d   : > { %v9292_v28 = vmul.f32 0.01, %v9284_v62  ;;  %v9293_v4 = vmul.f32 0.01, %v9285_v1  ;;  %v9294_v57 = vmul.f32 0.01, %v9286_v16 }
 0xd0e   : > { %v9295_v37 = vmul.f32 0.01, %v9287_v56 }
 0xd0f   : > { %v9296_v17 = vsel %vm9288_vm9, %v9284_v62, %v9292_v28  ;;  %v9297_v31 = vsel %vm9289_vm10, %v9285_v1, %v9293_v4  ;;  %v9298_v22 = vsel %vm9290_vm11, %v9286_v16, %v9294_v57 }
 0xd10   : > { %v9299_v7 = vsel %vm9291_vm12, %v9287_v56, %v9295_v37  ;;  %9300 = vst [vmem:[%s191_s5] sm:$0xff] %v9296_v17  ;;  %9301 = vst [vmem:[%s191_s5 + $0x8] sm:$0xff] %v9297_v31 }
 0xd11   : > { %9302 = vst [vmem:[%s191_s5 + $0x10] sm:$0xff] %v9298_v22  ;;  %9303 = vst [vmem:[%s191_s5 + $0x18] sm:$0xff] %v9299_v7 }
 0xd12   : > { %12445 = shalt.err (!%p12442_p11)
}
 0xd13   : > { %s12446_s10 = scalar_lea.hbm %s13020_s8, 512  ;;  %s12450_s19 = scalar_lea.hbm %s13067_s3, 1024 }
 0xd14   : > { %p12447_p13 = scmp.ne.s32.totalorder %s13020_s8, %s12446_s10  ;;  %p12451_p6 = scmp.lt.u32.totalorder %s13020_s8, %s13067_s3 }
 0xd15   : > { %p12452_p9 = scmp.lt.u32.totalorder %s12450_s19, %s12446_s10  ;;  %p12454_p10 = scmp.lt.u32.totalorder %s12446_s10, %s13020_s8 }
 0xd16   : > { %p12448_p5 = pnand %p12447_p13, %p13080_p1 }
 0xd17   : > { %p12453_p12 = por %p12452_p9, %p12451_p6 }
 0xd18   : > { %p12449_p0 = pneg %p12448_p5 }
 0xd19   : > { %p12455_p2 = por %p12454_p10, %p12453_p12 }
 0xd1b   : > { %p12456_p3 = pnand %p12455_p2, %p12449_p0 }
 0xd1d   : > { %12459 = shalt.err (!%p12456_p3)
}
 0xd1e   : > { %10578 = dma.vmem_to_hbm [thread:$0]  (%p13080_p1), %s13022_s6, 512, %s13020_s8, %s9305_s16  }
 0xd1f PF: > { %p10595_p4 = scmp.ge.s32.totalorder %s12502_s15, 2  ;;  %s9331_s28 = sand.u32 1, %s12490_s12  }
 0xd20   : > { %p13081_p7 = scmp.ne.s32.totalorder %s13072_s23, 0  ;;  %s9332_s30 = scalar_lea.sflag [#allocation5], %s9331_s28 }
 0xd22   : > { %p10588_p8 = pnand %p10595_p4, %p13081_p7 }
 0xd24   : > { %12485 = dma.done.wait (!%p10588_p8), %s9332_s30, 512  }
 0xd25   : > { %12487 = vsyncadd (!%p10588_p8), %s9332_s30, 4294966784  ;;  %p15_p11 = scmp.ge.s32.totalorder %s12558_s18, 4   ;;  %s13082_s12 = smov %s12494_s13 }
 0xd26   : > { %s13083_s13 = smov %s12498_s14  ;;  %s13084_s14 = smov %s12569_s21 }
 0xd27   : > { %s13085_s15 = smov %s12558_s18  ;;  %17 = sbr.rel (!%p15_p11) target bundleno = 5 (0x5), region = 78 }
 0xd2e   :  { %9337 = vsyncpa [#allocation4], 1 }
 0xd2f   :  { %9339 = vsyncpa [#allocation4 + $0x1], 1 }
 0xd30   :  { %9340 = vsyncpa [#allocation7], 1 }
 0xd31   :  { %9341 = vsyncpa [#allocation5], 1 }
 0xd32   :  { %9343 = vsyncpa [#allocation5 + $0x1], 1 }

</bundles_post_ra>
